<compile_context>
chip_gen: v7x
topology: tpu7x:2x2x1
jax: 0.10.0
libtpu: 0.0.40
codegen_flags: <defaults>
</compile_context>

<pallas_src>
import functools

import jax
import jax.numpy as jnp
from jax.experimental import pallas as pl
from jax.experimental.pallas import tpu as pltpu


def _g_spa_kernel(x_ref, w1_ref, w2_ref, o_ref):
    # x_ref : (1, tt*J, C)   time-major rows, channels on the lane axis
    # w*_ref: (C, D)         resident transposed 1x1-conv weights
    # o_ref : (1, tt, J, J)
    tt, J = o_ref.shape[1], o_ref.shape[2]

    xf = x_ref[0]                                                        # (tt*J, C)
    g1 = jnp.dot(xf, w1_ref[...], preferred_element_type=jnp.float32)   # (tt*J, D)
    g2 = jnp.dot(xf, w2_ref[...], preferred_element_type=jnp.float32)   # (tt*J, D)

    d = g1.shape[-1]
    g1 = g1.reshape(tt, J, d)
    g2 = g2.reshape(tt, J, d)

    # Per-frame joint affinity: s[t, j, k] = sum_d g1[t, j, d] * g2[t, k, d]
    s = jnp.einsum("tjd,tkd->tjk", g1, g2, preferred_element_type=jnp.float32)

    # Numerically stable softmax over the last (k) axis.
    m = jnp.max(s, axis=-1, keepdims=True)
    e = jnp.exp(s - m)
    denom = jnp.sum(e, axis=-1, keepdims=True)
    o_ref[0] = (e / denom).astype(o_ref.dtype)


@functools.partial(jax.jit, static_argnames=("t_tile",))
def compute_g_spa_forward(x, w1, w2, *, t_tile=128):
    """Forward pass of compute_g_spa.

    x      : (bs, dim1, num_joints, step)   Conv2d-style NCHW input
    w1, w2 : (dim2, dim1)                   1x1-conv weights (= conv.weight[:, :, 0, 0])
    returns: (bs, step, num_joints, num_joints), softmax-normalized along the last axis.
    """
    bs, C, J, T = x.shape
    D = w1.shape[0]

    # Single layout pass: channels -> lanes, time-major rows.  (The PyTorch module
    # itself materializes permuted/contiguous copies of both conv outputs; here we
    # permute only the smaller input once and never touch the output layout.)
    xt = jnp.transpose(x, (0, 3, 2, 1))                       # (bs, T, J, C)

    # Time tiling bounds VMEM per grid step.  Fall back to one full tile if a
    # partial tile's row count would violate the (8, 128) block constraint.
    tt = min(t_tile, T)
    if (tt * J) % 8 != 0:
        tt = T
    nt = pl.cdiv(T, tt)
    T_pad = nt * tt
    if T_pad != T:
        xt = jnp.pad(xt, ((0, 0), (0, T_pad - T), (0, 0), (0, 0)))
    xt = xt.reshape(bs, T_pad * J, C)                         # free (contiguous) reshape

    w1t = jnp.transpose(w1)                                   # (C, D)
    w2t = jnp.transpose(w2)

    itemsize = x.dtype.itemsize
    cost = pl.CostEstimate(
        flops=2 * bs * T_pad * J * (2 * C * D + J * D),
        transcendentals=bs * T_pad * J * J,
        bytes_accessed=(xt.size + w1t.size + w2t.size + bs * T_pad * J * J) * itemsize,
    )

    g = pl.pallas_call(
        _g_spa_kernel,
        out_shape=jax.ShapeDtypeStruct((bs, T_pad, J, J), x.dtype),
        grid_spec=pltpu.PrefetchScalarGridSpec(
            num_scalar_prefetch=0,
            grid=(bs, nt),
            in_specs=[
                pl.BlockSpec((1, tt * J, C), lambda b, t: (b, t, 0)),
                pl.BlockSpec((C, D), lambda b, t: (0, 0)),    # resident weights
                pl.BlockSpec((C, D), lambda b, t: (0, 0)),    # resident weights
            ],
            out_specs=pl.BlockSpec((1, tt, J, J), lambda b, t: (b, t, 0, 0)),
        ),
        compiler_params=pltpu.CompilerParams(
            dimension_semantics=("parallel", "parallel"),
            vmem_limit_bytes=48 * 1024 * 1024,
        ),
        cost_estimate=cost,
    )(xt, w1t, w2t)

    if T_pad != T:
        g = g[:, :T]
    return g


def _reference(x, w1, w2):
    hp = jax.lax.Precision.HIGHEST
    g1 = jnp.einsum("bcjt,dc->btjd", x, w1, precision=hp)   # conv1x1 + permute(0,3,2,1)
    g2 = jnp.einsum("bcjt,dc->btdj", x, w2, precision=hp)   # conv1x1 + permute(0,3,1,2)
    g3 = jnp.einsum("btjd,btdk->btjk", g1, g2, precision=hp)
    return jax.nn.softmax(g3, axis=-1)


if __name__ == "__main__":
    key = jax.random.PRNGKey(0)
    kx, k1, k2 = jax.random.split(key, 3)

    # Small shapes consistent with the module (module default dim1=dim2=64*3,
    # 25 skeleton joints): here dim1 = dim2 = 16*3 = 48, batch 2, 16 frames.
    bs, C, J, T = 2, 48, 25, 16
    D = C

    x = jax.random.normal(kx, (bs, C, J, T), dtype=jnp.float32)
    # Conv2d(bias=False) weights; scaled so affinity logits stay O(1).
    w1 = (1.0 / C) * jax.random.normal(k1, (D, C), dtype=jnp.float32)
    w2 = (1.0 / C) * jax.random.normal(k2, (D, C), dtype=jnp.float32)

    g = compute_g_spa_forward(x, w1, w2)
    g = jax.block_until_ready(g)

    g_ref = _reference(x, w1, w2)
    assert g.shape == (bs, T, J, J)
    assert bool(jnp.allclose(jnp.sum(g, axis=-1), 1.0, atol=1e-4)), "softmax rows must sum to 1"
    err = float(jnp.max(jnp.abs(g - g_ref)))
    assert err < 2e-3, f"max abs error vs reference: {err}"

    print("KERNEL_OK")
</pallas_src>

<mosaic_0001>
module attributes {stable_mosaic.version = 11 : i64} {
  func.func @_g_spa_kernel(%arg0: i32, %arg1: i32, %arg2: memref<1x400x48xf32, #tpu.memory_space<vmem>>, %arg3: memref<48x48xf32, #tpu.memory_space<vmem>>, %arg4: memref<48x48xf32, #tpu.memory_space<vmem>>, %arg5: memref<1x16x25x25xf32, #tpu.memory_space<vmem>>) attributes {dimension_semantics = [#tpu.dimension_semantics<parallel>, #tpu.dimension_semantics<parallel>], iteration_bounds = array<i64: 2, 1>, scalar_prefetch = 0 : i64, scratch_operands = 0 : i64, tpu.core_type = #tpu.core_type<tc>, window_params = [{transform_indices = @transform_0, window_bounds = array<i64: 1, 400, 48>}, {pipeline_mode = #tpu.pipeline_mode<synchronous>, transform_indices = @transform_1, window_bounds = array<i64: 48, 48>}, {pipeline_mode = #tpu.pipeline_mode<synchronous>, transform_indices = @transform_2, window_bounds = array<i64: 48, 48>}, {transform_indices = @transform_3, window_bounds = array<i64: 1, 16, 25, 25>}]} {
    %c0 = arith.constant 0 : index
    %c0_0 = arith.constant 0 : index
    %c0_1 = arith.constant 0 : index
    %0 = vector.load %arg2[%c0, %c0_0, %c0_1] : memref<1x400x48xf32, #tpu.memory_space<vmem>>, vector<1x400x48xf32>
    %1 = vector.shape_cast %0 : vector<1x400x48xf32> to vector<400x48xf32>
    %c0_2 = arith.constant 0 : index
    %c0_3 = arith.constant 0 : index
    %2 = vector.load %arg3[%c0_2, %c0_3] : memref<48x48xf32, #tpu.memory_space<vmem>>, vector<48x48xf32>
    %cst = arith.constant dense<0.000000e+00> : vector<400x48xf32>
    %3 = tpu.matmul %1, %2, %cst {dimension_numbers = #tpu.dot_dimension_numbers<[1], [0], [0], [1], [0, 0, 1, 1], [], []>} : vector<400x48xf32>, vector<48x48xf32>, vector<400x48xf32> -> vector<400x48xf32>
    %c0_4 = arith.constant 0 : index
    %c0_5 = arith.constant 0 : index
    %4 = vector.load %arg4[%c0_4, %c0_5] : memref<48x48xf32, #tpu.memory_space<vmem>>, vector<48x48xf32>
    %cst_6 = arith.constant dense<0.000000e+00> : vector<400x48xf32>
    %5 = tpu.matmul %1, %4, %cst_6 {dimension_numbers = #tpu.dot_dimension_numbers<[1], [0], [0], [1], [0, 0, 1, 1], [], []>} : vector<400x48xf32>, vector<48x48xf32>, vector<400x48xf32> -> vector<400x48xf32>
    %6 = vector.shape_cast %3 : vector<400x48xf32> to vector<16x25x48xf32>
    %7 = vector.shape_cast %5 : vector<400x48xf32> to vector<16x25x48xf32>
    "tpu.trace_start"() <{level = 10 : i32, message = "tjd,tkd->tjk"}> : () -> ()
    %cst_7 = arith.constant dense<0.000000e+00> : vector<16x25x25xf32>
    %8 = tpu.matmul %6, %7, %cst_7 {dimension_numbers = #tpu.dot_dimension_numbers<[2], [2], [1], [1], [0, 0, 0, 1, 1, 1], [0], [0]>} : vector<16x25x48xf32>, vector<16x25x48xf32>, vector<16x25x25xf32> -> vector<16x25x25xf32>
    "tpu.trace_stop"() : () -> ()
    %cst_8 = arith.constant dense<0xFF800000> : vector<16x25xf32>
    %9 = vector.multi_reduction <maximumf>, %8, %cst_8 [2] : vector<16x25x25xf32> to vector<16x25xf32>
    %10 = vector.shape_cast %9 : vector<16x25xf32> to vector<16x25x1xf32>
    %11 = vector.broadcast %10 : vector<16x25x1xf32> to vector<16x25x25xf32>
    %12 = arith.subf %8, %11 : vector<16x25x25xf32>
    %13 = math.exp %12 : vector<16x25x25xf32>
    %cst_9 = arith.constant dense<0.000000e+00> : vector<16x25xf32>
    %14 = vector.multi_reduction <add>, %13, %cst_9 [2] : vector<16x25x25xf32> to vector<16x25xf32>
    %15 = vector.shape_cast %14 : vector<16x25xf32> to vector<16x25x1xf32>
    %16 = vector.broadcast %15 : vector<16x25x1xf32> to vector<16x25x25xf32>
    %17 = arith.divf %13, %16 : vector<16x25x25xf32>
    %c0_10 = arith.constant 0 : index
    %c0_11 = arith.constant 0 : index
    %c0_12 = arith.constant 0 : index
    %c0_13 = arith.constant 0 : index
    %18 = vector.load %arg5[%c0_10, %c0_11, %c0_12, %c0_13] : memref<1x16x25x25xf32, #tpu.memory_space<vmem>>, vector<1x16x25x25xf32>
    %19 = vector.shape_cast %18 : vector<1x16x25x25xf32> to vector<16x25x25xf32>
    %20 = vector.shape_cast %17 : vector<16x25x25xf32> to vector<1x16x25x25xf32>
    tpu.vector_store %arg5[%c0_10, %c0_11, %c0_12, %c0_13], %20 {strides = array<i32>} : memref<1x16x25x25xf32, #tpu.memory_space<vmem>>, vector<1x16x25x25xf32>,
    return
  }
  func.func @transform_0(%arg0: i32, %arg1: i32) -> (i32, i32, i32) {
    %c0_i32 = arith.constant 0 : i32
    %c0_i32_0 = arith.constant 0 : i32
    return %arg0, %arg1, %c0_i32 : i32, i32, i32
  }
  func.func @transform_1(%arg0: i32, %arg1: i32) -> (i32, i32) {
    %c0_i32 = arith.constant 0 : i32
    %c0_i32_0 = arith.constant 0 : i32
    %c0_i32_1 = arith.constant 0 : i32
    return %c0_i32, %c0_i32_0 : i32, i32
  }
  func.func @transform_2(%arg0: i32, %arg1: i32) -> (i32, i32) {
    %c0_i32 = arith.constant 0 : i32
    %c0_i32_0 = arith.constant 0 : i32
    %c0_i32_1 = arith.constant 0 : i32
    return %c0_i32, %c0_i32_0 : i32, i32
  }
  func.func @transform_3(%arg0: i32, %arg1: i32) -> (i32, i32, i32, i32) {
    %c0_i32 = arith.constant 0 : i32
    %c0_i32_0 = arith.constant 0 : i32
    %c0_i32_1 = arith.constant 0 : i32
    return %arg0, %arg1, %c0_i32, %c0_i32_0 : i32, i32, i32, i32
  }
}

</mosaic_0001>

<bundles_post_ra>
// kernel: compute_g_spa_forward.1
= control target key start
LH: loop header
LB: loop body
LE: loop exit
PB: predicated region body
PF: predicated region fallthrough
CT: control target
= control target key end

     0   :  { %s15202_s12 = smov 0   ;;  %s15204_s13 = smov 0   ;;  %s19970_s0 = inlined_call_operand.vmem [shape: f32[2,400,48], index: 0, kind: input, shape index: {}]   ;;  %s19971_s1 = inlined_call_operand.vmem [shape: f32[48,48], index: 1, kind: input, shape index: {}]   ;;  %s19972_s2 = inlined_call_operand.vmem [shape: f32[48,48], index: 2, kind: input, shape index: {}]   ;;  %s19973_s3 = inlined_call_operand.vmem [shape: f32[2,16,25,25], index: 3, kind: output, shape index: {}]  }
   0x1   :  { %s15206_s14 = smov 0  }
   0x2 LB: > { %s25_s15 = sadd.s32 1, %s15175_s13  ;;  %p13690_p0 = scmp.ge.s32.totalorder %s15179_s14, 1  ;;  %s15179_s14 = sphi %s15206_s14, %s13_s14   ;;  %s15175_s13 = sphi %s15204_s13, %s20793_s13   ;;  %s15171_s12 = sphi %s15202_s12, %s20792_s12  }
   0x3   : > { %p27_p1 = scmp.ge.s32.totalorder %s25_s15, 2  ;;  %p158_p2 = scmp.lt.s32.totalorder %s15179_s14, 3 }
   0x5   : > { %s20795_s15 = smov (%p27_p1, %s25_s15), 0  ;;  %p159_p3 = pnand %p13690_p0, %p158_p2 }
   0x7   : > { %162 = sbr.rel (%p159_p3) target bundleno = 1410 (0x582), region = 32 }
   0xe   : > { %v734_v0 = vld [vmem:[%s19972_s2] sm:$0xff]  ;;  %v735_v1 = vld [vmem:[%s19972_s2 + $0x8] sm:$0xff]  ;;  %v736_v2 = vld [vmem:[%s19972_s2 + $0x10] sm:$0xff]  ;;  %p192_p4 = scmp.lt.s32.totalorder %s15171_s12, 1  ;;  %vm268_vm0 = vcmask 392192   ;;  %vm12823_vm2 = vcmask 203776  }
   0xf   : > { %v14671_v3 = vpack.c.bf16 %v735_v1, %v734_v0  ;;  %v737_v4 = vld [vmem:[%s19972_s2 + $0x18] sm:$0xff]  ;;  %v738_v5 = vld [vmem:[%s19972_s2 + $0x20] sm:$0xff]  ;;  %v739_v6 = vld [vmem:[%s19972_s2 + $0x28] sm:$0xff]  ;;  %vm12833_vm3 = vcmask 196608  }
  0x10   : > { %v14675_v7 = vpack.c.bf16 %v737_v4, %v736_v2  ;;  %s20797_s12 = smov (!%p192_p4, %s15171_s12), 1  ;;  %v262_v8 = vld [vmem:[%s19971_s1] sm:$0xff]  ;;  %v263_v9 = vld [vmem:[%s19971_s1 + $0x8] sm:$0xff]  ;;  %v264_v10 = vld [vmem:[%s19971_s1 + $0x10] sm:$0xff]  ;;  %v14679_v16 = vpack.c.bf16 %v739_v6, %v738_v5  ;;  %v15181_v4 = vmov 1966171168   ;;  %v1109_v6 = vlaneseq }
  0x11   : > { %14672 = vmatprep.subr.bf16.mxu1 %v14671_v3  ;;  %v14659_v11 = vpack.c.bf16 %v263_v9, %v262_v8  ;;  %v265_v12 = vld [vmem:[%s19971_s1 + $0x18] sm:$0xff]  ;;  %s14875_s9 = smul.u32 400, %s20797_s12  ;;  %v266_v14 = vld [vmem:[%s19971_s1 + $0x20] sm:$0xff]  ;;  %v267_v15 = vld [vmem:[%s19971_s1 + $0x28] sm:$0xff]  ;;  %v1107_v5 = vunpack.c.l.s4 %v15181_v4  ;;  %s14020_s21 = sshll.u32 %s20797_s12, 9 }
  0x12   : > { %14674 = vmatpush3.bf16.msra.mxu1 %v14671_v3  ;;  %v14663_v13 = vpack.c.bf16 %v265_v12, %v264_v10  ;;  %v14667_v18 = vpack.c.bf16 %v267_v15, %v266_v14  ;;  %v1110_v8 = vshrl.u32 %v1109_v6, 7  ;;  %vm15827_vm1 = vmpackc.low %vm268_vm0, %vm268_vm0  ;;  %s19765_s24 = scalar_lea.vmem %s19973_s3, %s14020_s21 }
  0x13   : > { %14676 = vmatprep.subr.bf16.mxu1 %v14675_v7  ;;  %14660 = vmatprep.subr.bf16.mxu0 %v14659_v11  ;;  %s15262_s20 = scalar_lea.vmem %s19970_s0, %s14875_s9 }
  0x14   : > { %14662 = vmatpush3.bf16.msra.mxu0 %v14659_v11  ;;  %v212_v17 = vld [vmem:[%s15262_s20] sm:$0xff]  ;;  %v213_v19 = vld [vmem:[%s15262_s20 + $0x8] sm:$0xff]  ;;  %v214_v20 = vld [vmem:[%s15262_s20 + $0x10] sm:$0xff] }
  0x15   : > { %14664 = vmatprep.subr.bf16.mxu0 %v14663_v13  ;;  %14360 = vmatprep.mubr.msk.f32.mxu1 %vm268_vm0, %v212_v17  ;;  %v215_v21 = vld [vmem:[%s15262_s20 + $0x18] sm:$0xff]  ;;  %v216_v22 = vld [vmem:[%s15262_s20 + $0x20] sm:$0xff]  ;;  %v217_v23 = vld [vmem:[%s15262_s20 + $0x28] sm:$0xff] }
  0x16   : > { %14678 = vmatpush3.bf16.msra.mxu1 %v14675_v7  ;;  %14273 = vmatprep.mubr.msk.f32.mxu0 %vm268_vm0, %v212_v17  ;;  %v218_v24 = vld [vmem:[%s15262_s20 + $0x30] sm:$0xff]  ;;  %v219_v25 = vld [vmem:[%s15262_s20 + $0x38] sm:$0xff]  ;;  %v220_v26 = vld [vmem:[%s15262_s20 + $0x40] sm:$0xff]  ;;  %v1108_v7 = vunpack.c.0.s8 %v1107_v5 }
  0x17   : > { %14680 = vmatprep.subr.bf16.mxu1 %v14679_v16  ;;  %v221_v27 = vld [vmem:[%s15262_s20 + $0x48] sm:$0xff]  ;;  %v222_v28 = vld [vmem:[%s15262_s20 + $0x50] sm:$0xff]  ;;  %v223_v29 = vld [vmem:[%s15262_s20 + $0x58] sm:$0xff] }
  0x18   : > { %14666 = vmatpush3.bf16.msra.mxu0 %v14663_v13  ;;  %v224_v30 = vld [vmem:[%s15262_s20 + $0x60] sm:$0xff]  ;;  %v225_v31 = vld [vmem:[%s15262_s20 + $0x68] sm:$0xff]  ;;  %v226_v32 = vld [vmem:[%s15262_s20 + $0x70] sm:$0xff]  ;;  %v15414_v9 = vsub.s32 %v1108_v7, %v1110_v8 }
  0x19   : > { %14668 = vmatprep.subr.bf16.mxu0 %v14667_v18  ;;  %v227_v33 = vld [vmem:[%s15262_s20 + $0x78] sm:$0xff]  ;;  %v228_v34 = vld [vmem:[%s15262_s20 + $0x80] sm:$0xff]  ;;  %v229_v35 = vld [vmem:[%s15262_s20 + $0x88] sm:$0xff] }
  0x1a   : > { %14682 = vmatpush3.bf16.msra.mxu1 %v14679_v16  ;;  %v230_v36 = vld [vmem:[%s15262_s20 + $0x90] sm:$0xff]  ;;  %v231_v37 = vld [vmem:[%s15262_s20 + $0x98] sm:$0xff]  ;;  %v232_v38 = vld [vmem:[%s15262_s20 + $0xa0] sm:$0xff] }
  0x1b   : > { %v233_v39 = vld [vmem:[%s15262_s20 + $0xa8] sm:$0xff]  ;;  %v234_v40 = vld [vmem:[%s15262_s20 + $0xb0] sm:$0xff]  ;;  %v235_v41 = vld [vmem:[%s15262_s20 + $0xb8] sm:$0xff] }
  0x1c   : > { %14670 = vmatpush3.bf16.msra.mxu0 %v14667_v18  ;;  %v236_v42 = vld [vmem:[%s15262_s20 + $0xc0] sm:$0xff]  ;;  %v237_v43 = vld [vmem:[%s15262_s20 + $0xc8] sm:$0xff]  ;;  %v238_v44 = vld [vmem:[%s15262_s20 + $0xd0] sm:$0xff] }
  0x1d   : > { %14361 = vmatmul.mubr.msk.f32.vlgmr.msra.gmra.mrb[0].mxu1 %vm268_vm0, %v213_v19  ;;  %v239_v45 = vld [vmem:[%s15262_s20 + $0xd8] sm:$0xff]  ;;  %v240_v46 = vld [vmem:[%s15262_s20 + $0xe0] sm:$0xff]  ;;  %v241_v47 = vld [vmem:[%s15262_s20 + $0xe8] sm:$0xff] }
  0x1e   : > { %14363 = vmatprep.mubr.msk.f32.mxu1 %vm268_vm0, %v214_v20  ;;  %v242_v48 = vld [vmem:[%s15262_s20 + $0xf0] sm:$0xff]  ;;  %v243_v49 = vld [vmem:[%s15262_s20 + $0xf8] sm:$0xff]  ;;  %v244_v50 = vld [vmem:[%s15262_s20 + $0x100] sm:$0xff] }
  0x1f   : > { %14274 = vmatmul.mubr.msk.f32.vlgmr.msra.gmra.mrb[0].mxu0 %vm268_vm0, %v213_v19  ;;  %v245_v51 = vld [vmem:[%s15262_s20 + $0x108] sm:$0xff]  ;;  %v246_v52 = vld [vmem:[%s15262_s20 + $0x110] sm:$0xff]  ;;  %v247_v53 = vld [vmem:[%s15262_s20 + $0x118] sm:$0xff] }
  0x20   : > { %14276 = vmatprep.mubr.msk.f32.mxu0 %vm268_vm0, %v214_v20  ;;  %v248_v54 = vld [vmem:[%s15262_s20 + $0x120] sm:$0xff]  ;;  %v249_v55 = vld [vmem:[%s15262_s20 + $0x128] sm:$0xff]  ;;  %v250_v56 = vld [vmem:[%s15262_s20 + $0x130] sm:$0xff] }
  0x21   : > { %14364 = vmatmul.mubr.msk.f32.gmra.mrb[2].mxu1 %vm268_vm0, %v215_v21  ;;  %v251_v57 = vld [vmem:[%s15262_s20 + $0x138] sm:$0xff]  ;;  %v252_v58 = vld [vmem:[%s15262_s20 + $0x140] sm:$0xff]  ;;  %v253_v59 = vld [vmem:[%s15262_s20 + $0x148] sm:$0xff] }
  0x22   : > { %14366 = vmatprep.mubr.msk.f32.mxu1 %vm268_vm0, %v216_v22  ;;  %v254_v60 = vld [vmem:[%s15262_s20 + $0x150] sm:$0xff]  ;;  %v255_v61 = vld [vmem:[%s15262_s20 + $0x158] sm:$0xff]  ;;  %v256_v62 = vld [vmem:[%s15262_s20 + $0x160] sm:$0xff] }
  0x23   : > { %14277 = vmatmul.mubr.msk.f32.gmra.mrb[2].mxu0 %vm268_vm0, %v215_v21  ;;  %v257_v63 = vld [vmem:[%s15262_s20 + $0x168] sm:$0xff]  ;;  %v258_v0 = vld [vmem:[%s15262_s20 + $0x170] sm:$0xff]  ;;  %v259_v1 = vld [vmem:[%s15262_s20 + $0x178] sm:$0xff] }
  0x24   : > { %14279 = vmatprep.mubr.msk.f32.mxu0 %vm268_vm0, %v216_v22  ;;  %v260_v2 = vld [vmem:[%s15262_s20 + $0x180] sm:$0xff]  ;;  %v261_v3 = vld [vmem:[%s15262_s20 + $0x188] sm:$0xff] }
  0x25   : > { %14367 = vmatmul.mubr.msk.f32.gmra.mrb[4].mxu1 %vm268_vm0, %v217_v23 }
  0x26   : > { %14369 = vmatprep.mubr.msk.f32.mxu1 %vm268_vm0, %v218_v24 }
  0x27   : > { %14280 = vmatmul.mubr.msk.f32.gmra.mrb[4].mxu0 %vm268_vm0, %v217_v23 }
  0x28   : > { %14282 = vmatprep.mubr.msk.f32.mxu0 %vm268_vm0, %v218_v24 }
  0x29   : > { %14370 = vmatmul.mubr.msk.f32.gmra.mrb[6].mxu1 %vm268_vm0, %v219_v25 }
  0x2a   : > { %14372 = vmatprep.mubr.msk.f32.mxu1 %vm268_vm0, %v220_v26 }
  0x2b   : > { %14283 = vmatmul.mubr.msk.f32.gmra.mrb[6].mxu0 %vm268_vm0, %v219_v25 }
  0x2c   : > { %14285 = vmatprep.mubr.msk.f32.mxu0 %vm268_vm0, %v220_v26 }
  0x2d   : > { %14373 = vmatmul.mubr.msk.f32.gmra.mrb[8].mxu1 %vm268_vm0, %v221_v27 }
  0x2e   : > { %14375 = vmatprep.mubr.msk.f32.mxu1 %vm268_vm0, %v222_v28 }
  0x2f   : > { %14286 = vmatmul.mubr.msk.f32.gmra.mrb[8].mxu0 %vm268_vm0, %v221_v27 }
  0x30   : > { %14288 = vmatprep.mubr.msk.f32.mxu0 %vm268_vm0, %v222_v28 }
  0x31   : > { %14376 = vmatmul.mubr.msk.f32.gmra.mrb[10].mxu1 %vm268_vm0, %v223_v29 }
  0x32   : > { %14378 = vmatprep.mubr.msk.f32.mxu1 %vm268_vm0, %v224_v30 }
  0x33   : > { %14289 = vmatmul.mubr.msk.f32.gmra.mrb[10].mxu0 %vm268_vm0, %v223_v29 }
  0x34   : > { %14291 = vmatprep.mubr.msk.f32.mxu0 %vm268_vm0, %v224_v30 }
  0x35   : > { %14379 = vmatmul.mubr.msk.f32.gmra.mrb[12].mxu1 %vm268_vm0, %v225_v31 }
  0x36   : > { %14381 = vmatprep.mubr.msk.f32.mxu1 %vm268_vm0, %v226_v32 }
  0x37   : > { %14292 = vmatmul.mubr.msk.f32.gmra.mrb[12].mxu0 %vm268_vm0, %v225_v31 }
  0x38   : > { %14294 = vmatprep.mubr.msk.f32.mxu0 %vm268_vm0, %v226_v32 }
  0x39   : > { %14382 = vmatmul.mubr.msk.f32.gmra.mrb[14].mxu1 %vm268_vm0, %v227_v33 }
  0x3a   : > { %14384 = vmatprep.mubr.msk.f32.mxu1 %vm268_vm0, %v228_v34 }
  0x3b   : > { %14295 = vmatmul.mubr.msk.f32.gmra.mrb[14].mxu0 %vm268_vm0, %v227_v33 }
  0x3c   : > { %14297 = vmatprep.mubr.msk.f32.mxu0 %vm268_vm0, %v228_v34 }
  0x3d   : > { %14385 = vmatmul.mubr.msk.f32.gmra.mrb[16].mxu1 %vm268_vm0, %v229_v35 }
  0x3e   : > { %14387 = vmatprep.mubr.msk.f32.mxu1 %vm268_vm0, %v230_v36 }
  0x3f   : > { %14298 = vmatmul.mubr.msk.f32.gmra.mrb[16].mxu0 %vm268_vm0, %v229_v35 }
  0x40   : > { %14300 = vmatprep.mubr.msk.f32.mxu0 %vm268_vm0, %v230_v36 }
  0x41   : > { %14388 = vmatmul.mubr.msk.f32.gmra.mrb[18].mxu1 %vm268_vm0, %v231_v37 }
  0x42   : > { %14390 = vmatprep.mubr.msk.f32.mxu1 %vm268_vm0, %v232_v38 }
  0x43   : > { %14301 = vmatmul.mubr.msk.f32.gmra.mrb[18].mxu0 %vm268_vm0, %v231_v37 }
  0x44   : > { %14303 = vmatprep.mubr.msk.f32.mxu0 %vm268_vm0, %v232_v38 }
  0x45   : > { %14391 = vmatmul.mubr.msk.f32.gmra.mrb[20].mxu1 %vm268_vm0, %v233_v39 }
  0x46   : > { %14393 = vmatprep.mubr.msk.f32.mxu1 %vm268_vm0, %v234_v40 }
  0x47   : > { %14304 = vmatmul.mubr.msk.f32.gmra.mrb[20].mxu0 %vm268_vm0, %v233_v39 }
  0x48   : > { %14306 = vmatprep.mubr.msk.f32.mxu0 %vm268_vm0, %v234_v40 }
  0x49   : > { %14394 = vmatmul.mubr.msk.f32.gmra.mrb[22].mxu1 %vm268_vm0, %v235_v41 }
  0x4a   : > { %14396 = vmatprep.mubr.msk.f32.mxu1 %vm268_vm0, %v236_v42 }
  0x4b   : > { %14307 = vmatmul.mubr.msk.f32.gmra.mrb[22].mxu0 %vm268_vm0, %v235_v41 }
  0x4c   : > { %14309 = vmatprep.mubr.msk.f32.mxu0 %vm268_vm0, %v236_v42 }
  0x4d   : > { %14397 = vmatmul.mubr.msk.f32.gmra.mrb[24].mxu1 %vm268_vm0, %v237_v43 }
  0x4e   : > { %14399 = vmatprep.mubr.msk.f32.mxu1 %vm268_vm0, %v238_v44 }
  0x4f   : > { %14310 = vmatmul.mubr.msk.f32.gmra.mrb[24].mxu0 %vm268_vm0, %v237_v43 }
  0x50   : > { %14312 = vmatprep.mubr.msk.f32.mxu0 %vm268_vm0, %v238_v44 }
  0x51   : > { %14400 = vmatmul.mubr.msk.f32.gmra.mrb[26].mxu1 %vm268_vm0, %v239_v45 }
  0x52   : > { %14402 = vmatprep.mubr.msk.f32.mxu1 %vm268_vm0, %v240_v46 }
  0x53   : > { %14313 = vmatmul.mubr.msk.f32.gmra.mrb[26].mxu0 %vm268_vm0, %v239_v45 }
  0x54   : > { %14315 = vmatprep.mubr.msk.f32.mxu0 %vm268_vm0, %v240_v46 }
  0x55   : > { %14403 = vmatmul.mubr.msk.f32.gmra.mrb[28].mxu1 %vm268_vm0, %v241_v47 }
  0x56   : > { %14405 = vmatprep.mubr.msk.f32.mxu1 %vm268_vm0, %v242_v48 }
  0x57   : > { %14316 = vmatmul.mubr.msk.f32.gmra.mrb[28].mxu0 %vm268_vm0, %v241_v47 }
  0x58   : > { %14318 = vmatprep.mubr.msk.f32.mxu0 %vm268_vm0, %v242_v48 }
  0x59   : > { %14406 = vmatmul.mubr.msk.f32.gmra.mrb[30].mxu1 %vm268_vm0, %v243_v49 }
  0x5a   : > { %14408 = vmatprep.mubr.msk.f32.mxu1 %vm268_vm0, %v244_v50 }
  0x5b   : > { %14319 = vmatmul.mubr.msk.f32.gmra.mrb[30].mxu0 %vm268_vm0, %v243_v49 }
  0x5c   : > { %14321 = vmatprep.mubr.msk.f32.mxu0 %vm268_vm0, %v244_v50 }
  0x5d   : > { %14409 = vmatmul.mubr.msk.f32.gmra.mrb[32].mxu1 %vm268_vm0, %v245_v51 }
  0x5e   : > { %14411 = vmatprep.mubr.msk.f32.mxu1 %vm268_vm0, %v246_v52 }
  0x5f   : > { %14322 = vmatmul.mubr.msk.f32.gmra.mrb[32].mxu0 %vm268_vm0, %v245_v51 }
  0x60   : > { %14324 = vmatprep.mubr.msk.f32.mxu0 %vm268_vm0, %v246_v52 }
  0x61   : > { %14412 = vmatmul.mubr.msk.f32.gmra.mrb[34].mxu1 %vm268_vm0, %v247_v53 }
  0x62   : > { %14414 = vmatprep.mubr.msk.f32.mxu1 %vm268_vm0, %v248_v54 }
  0x63   : > { %14325 = vmatmul.mubr.msk.f32.gmra.mrb[34].mxu0 %vm268_vm0, %v247_v53 }
  0x64   : > { %14327 = vmatprep.mubr.msk.f32.mxu0 %vm268_vm0, %v248_v54 }
  0x65   : > { %14415 = vmatmul.mubr.msk.f32.gmra.mrb[36].mxu1 %vm268_vm0, %v249_v55 }
  0x66   : > { %14417 = vmatprep.mubr.msk.f32.mxu1 %vm268_vm0, %v250_v56 }
  0x67   : > { %14328 = vmatmul.mubr.msk.f32.gmra.mrb[36].mxu0 %vm268_vm0, %v249_v55 }
  0x68   : > { %14330 = vmatprep.mubr.msk.f32.mxu0 %vm268_vm0, %v250_v56 }
  0x69   : > { %14418 = vmatmul.mubr.msk.f32.gmra.mrb[38].mxu1 %vm268_vm0, %v251_v57 }
  0x6a   : > { %14420 = vmatprep.mubr.msk.f32.mxu1 %vm268_vm0, %v252_v58 }
  0x6b   : > { %14331 = vmatmul.mubr.msk.f32.gmra.mrb[38].mxu0 %vm268_vm0, %v251_v57 }
  0x6c   : > { %14333 = vmatprep.mubr.msk.f32.mxu0 %vm268_vm0, %v252_v58 }
  0x6d   : > { %14421 = vmatmul.mubr.msk.f32.gmra.mrb[40].mxu1 %vm268_vm0, %v253_v59 }
  0x6e   : > { %14423 = vmatprep.mubr.msk.f32.mxu1 %vm268_vm0, %v254_v60 }
  0x6f   : > { %14334 = vmatmul.mubr.msk.f32.gmra.mrb[40].mxu0 %vm268_vm0, %v253_v59 }
  0x70   : > { %14336 = vmatprep.mubr.msk.f32.mxu0 %vm268_vm0, %v254_v60 }
  0x71   : > { %14424 = vmatmul.mubr.msk.f32.gmra.mrb[42].mxu1 %vm268_vm0, %v255_v61 }
  0x72   : > { %14426 = vmatprep.mubr.msk.f32.mxu1 %vm268_vm0, %v256_v62 }
  0x73   : > { %14337 = vmatmul.mubr.msk.f32.gmra.mrb[42].mxu0 %vm268_vm0, %v255_v61 }
  0x74   : > { %14339 = vmatprep.mubr.msk.f32.mxu0 %vm268_vm0, %v256_v62 }
  0x75   : > { %14427 = vmatmul.mubr.msk.f32.gmra.mrb[44].mxu1 %vm268_vm0, %v257_v63 }
  0x76   : > { %14429 = vmatprep.mubr.msk.f32.mxu1 %vm268_vm0, %v258_v0 }
  0x77   : > { %14340 = vmatmul.mubr.msk.f32.gmra.mrb[44].mxu0 %vm268_vm0, %v257_v63 }
  0x78   : > { %14342 = vmatprep.mubr.msk.f32.mxu0 %vm268_vm0, %v258_v0 }
  0x79   : > { %14430 = vmatmul.mubr.msk.f32.gmra.mrb[46].mxu1 %vm268_vm0, %v259_v1 }
  0x7a   : > { %14432 = vmatprep.mubr.msk.f32.mxu1 %vm268_vm0, %v260_v2 }
  0x7b   : > { %14343 = vmatmul.mubr.msk.f32.gmra.mrb[46].mxu0 %vm268_vm0, %v259_v1 }
  0x7c   : > { %14345 = vmatprep.mubr.msk.f32.mxu0 %vm268_vm0, %v260_v2 }
  0x7d   : > { %14433 = vmatmul.mubr.msk.f32.gmra.mrb[48].mxu1 %vm268_vm0, %v261_v3 }
  0x7f   : > { %14346 = vmatmul.mubr.msk.f32.gmra.mrb[48].mxu0 %vm268_vm0, %v261_v3 }
  0xf0   : > { %v14362_v10 = vpop.f32.mrb[0].mxu1 }
  0xf1   : > { %v3654_v11 = vcombine.high %v14362_v10, %v14362_v10  ;;  %v3661_v12 = vrot.slane %v14362_v10, %v15414_v9  ;;  %v806_v13 = vpop.f32.mrb[1].mxu1 }
  0xf2   : > { %v3605_v14 = vcombine.high %v806_v13, %v806_v13  ;;  %v3612_v15 = vrot.slane %v806_v13, %v15414_v9  ;;  %v15418_v16 = vpop.f32.mrb[0].mxu0 }
  0xf3   : > { %v3668_v17 = vrot.slane %v3654_v11, %v15414_v9  ;;  %v3669_v18 = vcombine.high %v3661_v12, %v3661_v12  ;;  %v15421_v19 = vpop.f32.mrb[1].mxu0  ;;  %v3677_v20 = vrot.slane %v3661_v12, %v15414_v9  ;;  %v15461_v58 = vrot.slane %v15418_v16, %v15414_v9 }
  0xf4   : > { %v3619_v21 = vrot.slane %v3605_v14, %v15414_v9  ;;  %v3620_v22 = vcombine.high %v3612_v15, %v3612_v15  ;;  %v3628_v23 = vrot.slane %v3612_v15, %v15414_v9  ;;  %v14365_v24 = vpop.f32.mrb[2].mxu1 }
  0xf5   : > { %v3670_v25 = vcombine.high %v3668_v17, %v3668_v17  ;;  %v3684_v26 = vrot.slane %v3668_v17, %v15414_v9  ;;  %v3691_v27 = vrot.slane %v3669_v18, %v15414_v9  ;;  %v3752_v28 = vcombine.high %v14365_v24, %v14365_v24  ;;  %v816_v29 = vpop.f32.mrb[3].mxu1 }
  0xf6   : > { %v3621_v30 = vcombine.high %v3619_v21, %v3619_v21  ;;  %v3635_v31 = vrot.slane %v3619_v21, %v15414_v9  ;;  %v3642_v32 = vrot.slane %v3620_v22, %v15414_v9  ;;  %v3759_v33 = vrot.slane %v14365_v24, %v15414_v9  ;;  %v15431_v34 = vpop.f32.mrb[2].mxu0 }
  0xf7   : > { %v3698_v35 = vrot.slane %v3670_v25, %v15414_v9  ;;  %v6265_v36 = vcombine.low %v3677_v20, %v3691_v27  ;;  %v13802_v37 = vcombine.high %v3677_v20, %v3691_v27  ;;  %v3766_v38 = vrot.slane %v3752_v28, %v15414_v9  ;;  %v15435_v39 = vpop.f32.mrb[3].mxu0 }
  0xf8   : > { %v3649_v40 = vrot.slane %v3621_v30, %v15414_v9  ;;  %v6216_v41 = vcombine.low %v3628_v23, %v3642_v32  ;;  %v13800_v42 = vcombine.high %v3628_v23, %v3642_v32  ;;  %v3767_v43 = vcombine.high %v3759_v33, %v3759_v33  ;;  %v14368_v44 = vpop.f32.mrb[4].mxu1 }
  0xf9   : > { %v6267_v45 = vcombine.low %v3684_v26, %v3698_v35  ;;  %v13803_v46 = vcombine.high %v3684_v26, %v3698_v35  ;;  %v15439_v47 = vrot.slane %v6265_v36, %v15414_v9  ;;  %v15442_v48 = vrot.slane %v13802_v37, %v15414_v9  ;;  %v15444_v49 = vpop.f32.mrb[5].mxu1 }
  0xfa   : > { %v6218_v50 = vcombine.low %v3635_v31, %v3649_v40  ;;  %v13801_v51 = vcombine.high %v3635_v31, %v3649_v40  ;;  %v15447_v52 = vrot.slane %v6216_v41, %v15414_v9  ;;  %v15450_v53 = vrot.slane %v13800_v42, %v15414_v9  ;;  %v15452_v54 = vpop.f32.mrb[4].mxu0 }
  0xfb   : > { %v15455_v55 = vrot.slane %v6267_v45, %v15414_v9  ;;  %v3768_v56 = vcombine.high %v3766_v38, %v3766_v38  ;;  %v15463_v59 = vpop.f32.mrb[5].mxu0  ;;  %v15466_v60 = vrot.slane %v13803_v46, %v15414_v9  ;;  %v3775_v63 = vrot.slane %v3759_v33, %v15414_v9 }
  0xfc   : > { %v15471_v62 = vrot.slane %v6218_v50, %v15414_v9  ;;  %v15474_v0 = vpop.f32.mrb[6].mxu1  ;;  %v15477_v1 = vrot.slane %v13801_v51, %v15414_v9  ;;  %v3782_v3 = vrot.slane %v3766_v38, %v15414_v9  ;;  %v3789_v4 = vrot.slane %v3767_v43, %v15414_v9 }
  0xfd   : > { %v15483_v5 = vpop.f32.mrb[7].mxu1  ;;  %v15486_v6 = vrot.slane %v3768_v56, %v15414_v9  ;;  %v3797_v7 = vcombine.high %v3775_v63, %v3775_v63  ;;  %v6369_v8 = vrot.slane %v3775_v63, %v15414_v9  ;;  %v3703_v10 = vcombine.high %v816_v29, %v816_v29 }
  0xfe   : > { %v15489_v11 = vpop.f32.mrb[6].mxu0  ;;  %v3798_v12 = vcombine.high %v3782_v3, %v3782_v3  ;;  %v3799_v13 = vcombine.high %v3789_v4, %v3789_v4  ;;  %v3710_v14 = vrot.slane %v816_v29, %v15414_v9  ;;  %v3850_v15 = vcombine.high %v14368_v44, %v14368_v44 }
  0xff   : > { %v15492_v17 = vpop.f32.mrb[7].mxu0  ;;  %v6639_v20 = vcombine.low %v3789_v4, %v3797_v7  ;;  %v3717_v21 = vrot.slane %v3703_v10, %v15414_v9  ;;  %v3857_v22 = vrot.slane %v14368_v44, %v15414_v9  ;;  %v15503_v25 = vrot.slane %v6369_v8, %v15414_v9 }
 0x100   : > { %v15498_v23 = vpop.f32.mrb[8].mxu1  ;;  %v6640_v26 = vcombine.low %v3799_v13, %v3782_v3  ;;  %v3718_v27 = vcombine.high %v3710_v14, %v3710_v14  ;;  %v15508_v29 = vcombine.low %v15486_v6, %v3798_v12  ;;  %v3726_v31 = vrot.slane %v3710_v14, %v15414_v9 }
 0x101   : > { %v15505_v28 = vpop.f32.mrb[9].mxu1  ;;  %v3719_v30 = vcombine.high %v3717_v21, %v3717_v21  ;;  %v3864_v32 = vrot.slane %v3850_v15, %v15414_v9  ;;  %v6649_v35 = vrot.slane %v6639_v20, %v15414_v9  ;;  %v3865_v37 = vcombine.high %v3857_v22, %v3857_v22 }
 0x102   : > { %v15512_v33 = vpop.f32.mrb[8].mxu0  ;;  %v3740_v36 = vrot.slane %v3718_v27, %v15414_v9  ;;  %v15517_v38 = vrot.slane %v3857_v22, %v15414_v9  ;;  %v3733_v41 = vrot.slane %v3717_v21, %v15414_v9  ;;  %v6656_v46 = vrot.slane %v6640_v26, %v15414_v9 }
 0x103   : > { %v15519_v40 = vpop.f32.mrb[9].mxu0  ;;  %v3747_v42 = vrot.slane %v3719_v30, %v15414_v9  ;;  %v3866_v43 = vcombine.high %v3864_v32, %v3864_v32  ;;  %v3880_v44 = vrot.slane %v3864_v32, %v15414_v9  ;;  %v3887_v56 = vrot.slane %v3865_v37, %v15414_v9 }
 0x104   : > { %20176 = vst [vmem:[#allocation2_spill] sm:$0xff] %v15519_v40  ;;  %v15524_v45 = vpop.f32.mrb[10].mxu1  ;;  %v6314_v50 = vcombine.low %v3726_v31, %v3740_v36  ;;  %v13804_v51 = vcombine.high %v3726_v31, %v3740_v36  ;;  %v3895_v8 = vcombine.high %v15517_v38, %v15517_v38  ;;  %v3801_v22 = vcombine.high %v15444_v49, %v15444_v49 }
 0x105   : > { %v15528_v63 = vpop.f32.mrb[11].mxu1  ;;  %v6316_v3 = vcombine.low %v3733_v41, %v3747_v42  ;;  %v13805_v4 = vcombine.high %v3733_v41, %v3747_v42  ;;  %v15531_v7 = vrot.slane %v3866_v43, %v15414_v9  ;;  %v3896_v13 = vcombine.high %v3880_v44, %v3880_v44 }
 0x106   : > { %v15536_v10 = vrot.slane %v6314_v50, %v15414_v9  ;;  %v15539_v12 = vrot.slane %v13804_v51, %v15414_v9  ;;  %v3897_v14 = vcombine.high %v3887_v56, %v3887_v56  ;;  %v6737_v21 = vcombine.low %v3887_v56, %v3895_v8  ;;  %v15567_v43 = vpop.f32.mrb[10].mxu0 }
 0x107   : > { %v15542_v15 = vrot.slane %v6316_v3, %v15414_v9  ;;  %v15545_v20 = vrot.slane %v13805_v4, %v15414_v9  ;;  %v15551_v27 = vcombine.low %v6649_v35, %v6656_v46  ;;  %v3800_v31 = vcombine.high %v15486_v6, %v15486_v6  ;;  %20177 = vst [vmem:[#allocation3_spill] sm:$0xff] %v15567_v43 }
 0x108   : > { %v15549_v26 = vpop.f32.mrb[12].mxu1  ;;  %v6738_v30 = vcombine.low %v3897_v14, %v3880_v44  ;;  %v3808_v32 = vrot.slane %v15444_v49, %v15414_v9  ;;  %v15564_v42 = vcombine.low %v15531_v7, %v3896_v13  ;;  %v3815_v35 = vrot.slane %v3801_v22, %v15414_v9 }
 0x109   : > { %v15557_v36 = vpop.f32.mrb[13].mxu1  ;;  %v6747_v6 = vrot.slane %v6737_v21, %v15414_v9  ;;  %v3948_v46 = vcombine.high %v15474_v0, %v15474_v0  ;;  %v6663_v56 = vrot.slane %v15508_v29, %v15414_v9  ;;  %v3955_v3 = vrot.slane %v15474_v0, %v15414_v9 }
 0x10a   : > { %v3816_v44 = vcombine.high %v3808_v32, %v3808_v32  ;;  %v3824_v49 = vrot.slane %v3808_v32, %v15414_v9  ;;  %v3817_v50 = vcombine.high %v3815_v35, %v3815_v35  ;;  %v3831_v51 = vrot.slane %v3815_v35, %v15414_v9 }
 0x10b   : > { %v6754_v8 = vrot.slane %v6738_v30, %v15414_v9  ;;  %v3962_v35 = vrot.slane %v3948_v46, %v15414_v9  ;;  %v3963_v37 = vcombine.high %v3955_v3, %v3955_v3  ;;  %v3971_v61 = vrot.slane %v3955_v3, %v15414_v9 }
 0x10c   : > { %v15578_v4 = vpop.f32.mrb[14].mxu1  ;;  %v3838_v13 = vrot.slane %v3816_v44, %v15414_v9  ;;  %v3846_v14 = vcombine.high %v3824_v49, %v3824_v49  ;;  %v6642_v21 = vcombine.low %v3800_v31, %v3824_v49  ;;  %v3845_v32 = vrot.slane %v3817_v50, %v15414_v9 }
 0x10d   : > { %v15582_v22 = vpop.f32.mrb[15].mxu1  ;;  %v3847_v41 = vcombine.high %v3831_v51, %v3831_v51  ;;  %v3964_v44 = vcombine.high %v3962_v35, %v3962_v35  ;;  %v3978_v31 = vrot.slane %v3962_v35, %v15414_v9  ;;  %v3985_v46 = vrot.slane %v3963_v37, %v15414_v9 }
 0x10e   : > { %v3848_v29 = vcombine.high %v3838_v13, %v3838_v13  ;;  %v6670_v18 = vrot.slane %v6642_v21, %v15414_v9  ;;  %v6688_v0 = vcombine.low %v3838_v13, %v3846_v14  ;;  %v3849_v24 = vcombine.high %v3845_v32, %v3845_v32 }
 0x10f   : > { %v15588_v30 = vcombine.low %v3845_v32, %v3847_v41  ;;  %v3898_v57 = vcombine.high %v15531_v7, %v15531_v7  ;;  %v3992_v13 = vrot.slane %v3964_v44, %v15414_v9  ;;  %v3899_v14 = vcombine.high %v15483_v5, %v15483_v5 }
 0x110   : > { %v15591_v49 = vpop.f32.mrb[16].mxu1  ;;  %v15593_v2 = vcombine.low %v6663_v56, %v6670_v18  ;;  %v6689_v50 = vcombine.low %v3848_v29, %v3831_v51  ;;  %v15601_v3 = vcombine.low %v3849_v24, %v15517_v38  ;;  %v6698_v41 = vrot.slane %v6688_v0, %v15414_v9  ;;  %v15607_v18 = vpop.f32.mrb[11].mxu0 }
 0x111   : > { %20178 = vst [vmem:[#allocation4_spill] sm:$0xff] %v15591_v49  ;;  %v15598_v21 = vpop.f32.mrb[17].mxu1  ;;  %20180 = vst [vmem:[#allocation6_spill] sm:$0xff] %v15607_v18  ;;  %v7065_v37 = vcombine.low %v3971_v61, %v3985_v46  ;;  %v13830_v56 = vcombine.high %v3971_v61, %v3985_v46  ;;  %v3906_v7 = vrot.slane %v15483_v5, %v15414_v9 }
 0x112   : > { %20179 = vst [vmem:[#allocation5_spill] sm:$0xff] %v15598_v21  ;;  %v6705_v51 = vrot.slane %v6689_v50, %v15414_v9  ;;  %v15612_v32 = vcombine.low %v6747_v6, %v6754_v8  ;;  %v7112_v38 = vcombine.low %v3978_v31, %v3992_v13  ;;  %v3913_v35 = vrot.slane %v3899_v14, %v15414_v9 }
 0x113   : > { %v13831_v44 = vcombine.high %v3978_v31, %v3992_v13  ;;  %v3914_v50 = vcombine.high %v3906_v7, %v3906_v7  ;;  %v15622_v61 = vrot.slane %v7065_v37, %v15414_v9  ;;  %v15625_v5 = vrot.slane %v13830_v56, %v15414_v9 }
 0x114   : > { %v15619_v0 = vcombine.low %v6698_v41, %v6705_v51  ;;  %v3915_v6 = vcombine.high %v3913_v35, %v3913_v35  ;;  %v3922_v8 = vrot.slane %v3906_v7, %v15414_v9  ;;  %v15629_v46 = vrot.slane %v7112_v38, %v15414_v9  ;;  %v15652_v29 = vpop.f32.mrb[18].mxu1 }
 0x115   : > { %20181 = vst [vmem:[#allocation7_spill] sm:$0xff] %v15622_v61  ;;  %20182 = vst [vmem:[#allocation8_spill] sm:$0xff] %v15625_v5  ;;  %v3929_v14 = vrot.slane %v3913_v35, %v15414_v9  ;;  %v15633_v24 = vrot.slane %v3914_v50, %v15414_v9  ;;  %v20184_v31 = vcombine.high %v15418_v16, %v15418_v16  ;;  %v15722_v5 = vpop.f32.mrb[19].mxu1 }
 0x116   : > { %20183 = vst [vmem:[#allocation9_spill] sm:$0xff] %v15629_v46  ;;  %v3943_v13 = vrot.slane %v3915_v6, %v15414_v9  ;;  %v6740_v51 = vcombine.low %v3898_v57, %v3922_v8  ;;  %v6761_v37 = vrot.slane %v15564_v42, %v15414_v9  ;;  %v1169_v56 = vcombine.high %v15461_v58, %v15461_v58 }
 0x117   : > { %v1168_v41 = vrot.slane %v20184_v31, %v15414_v9  ;;  %v15645_v7 = vrot.slane %v13831_v44, %v15414_v9  ;;  %v13828_v38 = vcombine.high %v3922_v8, %v15633_v24  ;;  %v1177_v50 = vrot.slane %v15461_v58, %v15414_v9  ;;  %20185 = vst [vmem:[#allocation10_spill] sm:$0xff] %v15652_v29 }
 0x118   : > { %v6768_v16 = vrot.slane %v6740_v51, %v15414_v9  ;;  %v7063_v31 = vcombine.low %v3929_v14, %v3943_v13  ;;  %v13829_v6 = vcombine.high %v3929_v14, %v3943_v13  ;;  %v1191_v44 = vrot.slane %v1169_v56, %v15414_v9  ;;  %20191 = vst [vmem:[#allocation16_spill] sm:$0xff] %v15722_v5 }
 0x119   : > { %v1170_v35 = vcombine.high %v1168_v41, %v1168_v41  ;;  %v1184_v57 = vrot.slane %v1168_v41, %v15414_v9  ;;  %v1105_v8 = vcombine.high %v15421_v19, %v15421_v19  ;;  %v15663_v58 = vrot.slane %v13828_v38, %v15414_v9 }
 0x11a   : > { %v15660_v43 = vcombine.low %v6761_v37, %v6768_v16  ;;  %v15666_v14 = vrot.slane %v13829_v6, %v15414_v9  ;;  %v1112_v41 = vrot.slane %v15421_v19, %v15414_v9  ;;  %v6104_v13 = vcombine.low %v1177_v50, %v1191_v44 }
 0x11b   : > { %v1198_v18 = vrot.slane %v1170_v35, %v15414_v9  ;;  %20186 = vst [vmem:[#allocation11_spill] sm:$0xff] %v15663_v58  ;;  %v13796_v51 = vcombine.high %v1177_v50, %v1191_v44  ;;  %v15671_v35 = vrot.slane %v7063_v31, %v15414_v9  ;;  %v1119_v16 = vrot.slane %v1105_v8, %v15414_v9 }
 0x11c   : > { %20187 = vst [vmem:[#allocation12_spill] sm:$0xff] %v15666_v14  ;;  %v1120_v38 = vcombine.high %v1112_v41, %v1112_v41  ;;  %v6114_v29 = vrot.slane %v6104_v13, %v15414_v9  ;;  %v4046_v8 = vcombine.high %v15498_v23, %v15498_v23  ;;  %v4053_v13 = vrot.slane %v15498_v23, %v15414_v9 }
 0x11d   : > { %v6106_v42 = vcombine.low %v1184_v57, %v1198_v18  ;;  %v13797_v56 = vcombine.high %v1184_v57, %v1198_v18  ;;  %20188 = vst [vmem:[#allocation13_spill] sm:$0xff] %v15671_v35  ;;  %v6121_v6 = vrot.slane %v13796_v51, %v15414_v9  ;;  %v1121_v50 = vcombine.high %v1119_v16, %v1119_v16 }
 0x11e   : > { %v1128_v18 = vrot.slane %v1112_v41, %v15414_v9  ;;  %v1135_v31 = vrot.slane %v1119_v16, %v15414_v9  ;;  %v1142_v57 = vrot.slane %v1120_v38, %v15414_v9  ;;  %v3997_v14 = vcombine.high %v15505_v28, %v15505_v28 }
 0x11f   : > { %v6128_v21 = vrot.slane %v6106_v42, %v15414_v9  ;;  %v6135_v19 = vrot.slane %v13797_v56, %v15414_v9  ;;  %v6136_v44 = vcombine.low %v6114_v29, %v6121_v6  ;;  %v1149_v51 = vrot.slane %v1121_v50, %v15414_v9 }
 0x120   : > { %v6055_v56 = vcombine.low %v1128_v18, %v1142_v57  ;;  %v13794_v46 = vcombine.high %v1128_v18, %v1142_v57  ;;  %v4061_v29 = vcombine.high %v4053_v13, %v4053_v13  ;;  %v4069_v57 = vrot.slane %v4053_v13, %v15414_v9 }
 0x121   : > { %v6137_v37 = vcombine.low %v6128_v21, %v6135_v19  ;;  %v15691_v41 = vrot.slane %v6136_v44, %v15414_v9  ;;  %v4060_v21 = vrot.slane %v4046_v8, %v15414_v9  ;;  %v6057_v23 = vcombine.low %v1135_v31, %v1149_v51 }
 0x122   : > { %v13795_v6 = vcombine.high %v1135_v31, %v1149_v51  ;;  %v1252_v19 = vcombine.high %v15431_v34, %v15431_v34  ;;  %v15702_v50 = vrot.slane %v6055_v56, %v15414_v9  ;;  %v15709_v8 = vrot.slane %v13794_v46, %v15414_v9  ;;  %v15715_v51 = vpop.f32.mrb[12].mxu0 }
 0x123   : > { %v15694_v16 = vrot.slane %v6137_v37, %v15414_v9  ;;  %v4062_v18 = vcombine.high %v4060_v21, %v4060_v21  ;;  %v4076_v37 = vrot.slane %v4060_v21, %v15414_v9  ;;  %v15712_v38 = vrot.slane %v6057_v23, %v15414_v9  ;;  %20190 = vst [vmem:[#allocation15_spill] sm:$0xff] %v15715_v51  ;;  %v15734_v35 = vpop.f32.mrb[13].mxu0 }
 0x124   : > { %v4083_v31 = vrot.slane %v4061_v29, %v15414_v9  ;;  %v4091_v42 = vcombine.high %v4069_v57, %v4069_v57  ;;  %v1259_v21 = vrot.slane %v15431_v34, %v15414_v9  ;;  %v15725_v46 = vrot.slane %v13795_v6, %v15414_v9  ;;  %20193 = vst [vmem:[#allocation18_spill] sm:$0xff] %v15734_v35  ;;  %v15736_v34 = vpop.f32.mrb[20].mxu1 }
 0x125   : > { %20189 = vst [vmem:[#allocation14_spill] sm:$0xff] %v15694_v16  ;;  %v15718_v56 = vrot.slane %v4062_v18, %v15414_v9  ;;  %v4092_v13 = vcombine.high %v4076_v37, %v4076_v37  ;;  %v1266_v61 = vrot.slane %v1252_v19, %v15414_v9  ;;  %20194 = vst [vmem:[#allocation19_spill] sm:$0xff] %v15736_v34 }
 0x126   : > { %v4093_v44 = vcombine.high %v4083_v31, %v4083_v31  ;;  %v7163_v23 = vcombine.low %v4069_v57, %v4083_v31  ;;  %v1267_v51 = vcombine.high %v1259_v21, %v1259_v21  ;;  %v15730_v18 = vrot.slane %v1259_v21, %v15414_v9  ;;  %v15741_v31 = vpop.f32.mrb[21].mxu1 }
 0x127   : > { %v7486_v29 = vcombine.low %v15718_v56, %v4092_v13  ;;  %v1268_v57 = vcombine.high %v1266_v61, %v1266_v61  ;;  %v1282_v19 = vrot.slane %v1266_v61, %v15414_v9  ;;  %20195 = vst [vmem:[#allocation20_spill] sm:$0xff] %v15741_v31  ;;  %v15744_v13 = vrot.slane %v4091_v42, %v15414_v9 }
 0x128   : > { %20192 = vst [vmem:[#allocation17_spill] sm:$0xff] %v15730_v18  ;;  %v7485_v5 = vcombine.low %v4093_v44, %v4076_v37  ;;  %v1289_v58 = vrot.slane %v1267_v51, %v15414_v9  ;;  %v1297_v35 = vcombine.high %v15730_v18, %v15730_v18  ;;  %v15751_v34 = vrot.slane %v7163_v23, %v15414_v9 }
 0x129   : > { %20196 = vst [vmem:[#allocation21_spill] sm:$0xff] %v15744_v13  ;;  %v7502_v21 = vrot.slane %v7486_v29, %v15414_v9  ;;  %v1298_v44 = vcombine.high %v1282_v19, %v1282_v19  ;;  %v4004_v61 = vrot.slane %v15505_v28, %v15414_v9  ;;  %v15757_v6 = vrot.slane %v1268_v57, %v15414_v9 }
 0x12a   : > { %20197 = vst [vmem:[#allocation22_spill] sm:$0xff] %v15751_v34  ;;  %v7495_v37 = vrot.slane %v7485_v5, %v15414_v9  ;;  %v1299_v42 = vcombine.high %v1289_v58, %v1289_v58  ;;  %v4011_v29 = vrot.slane %v3997_v14, %v15414_v9  ;;  %v1203_v51 = vcombine.high %v15435_v39, %v15435_v39 }
 0x12b   : > { %v15764_v23 = vcombine.low %v1289_v58, %v1297_v35  ;;  %v4012_v13 = vcombine.high %v4004_v61, %v4004_v61  ;;  %v4020_v5 = vrot.slane %v4004_v61, %v15414_v9  ;;  %v15770_v28 = vcombine.low %v15757_v6, %v1298_v44 }
 0x12c   : > { %v15767_v49 = vcombine.low %v7495_v37, %v7502_v21  ;;  %v4013_v57 = vcombine.high %v4011_v29, %v4011_v29  ;;  %v4027_v40 = vrot.slane %v4011_v29, %v15414_v9  ;;  %v15773_v14 = vcombine.low %v1299_v42, %v1282_v19 }
 0x12d   : > { %20198 = vst [vmem:[#allocation23_spill] sm:$0xff] %v15764_v23  ;;  %v4034_v16 = vrot.slane %v4012_v13, %v15414_v9  ;;  %v1210_v31 = vrot.slane %v15435_v39, %v15414_v9  ;;  %v1217_v58 = vrot.slane %v1203_v51, %v15414_v9  ;;  %v20201_v21 = vcombine.low %v15447_v52, %v15450_v53 }
 0x12e   : > { %20199 = vst [vmem:[#allocation24_spill] sm:$0xff] %v15767_v49  ;;  %20200 = vst [vmem:[#allocation25_spill] sm:$0xff] %v15773_v14  ;;  %v4041_v35 = vrot.slane %v4013_v57, %v15414_v9  ;;  %v20202_v44 = vcombine.low %v15471_v62, %v15477_v1  ;;  %v20203_v13 = vcombine.low %v15439_v47, %v15442_v48 }
 0x12f   : > { %v6256_v37 = vrot.slane %v20201_v21, %v15414_v9  ;;  %v7114_v39 = vcombine.low %v4020_v5, %v4034_v16  ;;  %v13832_v42 = vcombine.high %v4020_v5, %v4034_v16  ;;  %v1218_v29 = vcombine.high %v1210_v31, %v1210_v31 }
 0x130   : > { %v6263_v19 = vrot.slane %v20202_v44, %v15414_v9  ;;  %v6305_v61 = vrot.slane %v20203_v13, %v15414_v9  ;;  %v1219_v51 = vcombine.high %v1217_v58, %v1217_v58  ;;  %v7161_v57 = vcombine.low %v4027_v40, %v4041_v35 }
 0x131   : > { %v13833_v49 = vcombine.high %v4027_v40, %v4041_v35  ;;  %v1226_v18 = vrot.slane %v1210_v31, %v15414_v9  ;;  %v1233_v52 = vrot.slane %v1217_v58, %v15414_v9  ;;  %v15795_v53 = vrot.slane %v7114_v39, %v15414_v9 }
 0x132   : > { %v15798_v62 = vrot.slane %v13832_v42, %v15414_v9  ;;  %v1240_v1 = vrot.slane %v1218_v29, %v15414_v9  ;;  %v1247_v47 = vrot.slane %v1219_v51, %v15414_v9  ;;  %v15803_v48 = vrot.slane %v7161_v57, %v15414_v9 }
 0x133   : > { %v15806_v16 = vrot.slane %v13833_v49, %v15414_v9  ;;  %v6264_v40 = vcombine.low %v6256_v37, %v6263_v19  ;;  %v20207_v31 = vcombine.low %v15455_v55, %v15466_v60  ;;  %v4144_v19 = vcombine.high %v15524_v45, %v15524_v45 }
 0x134   : > { %20204 = vst [vmem:[#allocation26_spill] sm:$0xff] %v15798_v62  ;;  %20205 = vst [vmem:[#allocation27_spill] sm:$0xff] %v15803_v48  ;;  %v6153_v35 = vcombine.low %v1226_v18, %v1240_v1  ;;  %v13798_v21 = vcombine.high %v1226_v18, %v1240_v1  ;;  %v6155_v44 = vcombine.low %v1233_v52, %v1247_v47 }
 0x135   : > { %20206 = vst [vmem:[#allocation28_spill] sm:$0xff] %v15806_v16  ;;  %v6312_v5 = vrot.slane %v20207_v31, %v15414_v9  ;;  %v13799_v49 = vcombine.high %v1233_v52, %v1247_v47  ;;  %v4151_v57 = vrot.slane %v15524_v45, %v15414_v9  ;;  %v4158_v1 = vrot.slane %v4144_v19, %v15414_v9 }
 0x136   : > { %v15823_v60 = vrot.slane %v6153_v35, %v15414_v9  ;;  %v15837_v29 = vrot.slane %v6155_v44, %v15414_v9  ;;  %v4095_v47 = vcombine.high %v15528_v63, %v15528_v63  ;;  %v4102_v31 = vrot.slane %v15528_v63, %v15414_v9 }
 0x137   : > { %v6313_v42 = vcombine.low %v6305_v61, %v6312_v5  ;;  %v15834_v61 = vrot.slane %v13798_v21, %v15414_v9  ;;  %v15842_v52 = vrot.slane %v13799_v49, %v15414_v9  ;;  %v4159_v5 = vcombine.high %v4151_v57, %v4151_v57 }
 0x138   : > { %20210 = vst [vmem:[#allocation29_spill] sm:$0xff] %v15837_v29  ;;  %v4094_v45 = vcombine.high %v15718_v56, %v15718_v56  ;;  %v1350_v35 = vcombine.high %v15452_v54, %v15452_v54  ;;  %v4160_v21 = vcombine.high %v4158_v1, %v4158_v1  ;;  %v4174_v44 = vrot.slane %v4158_v1, %v15414_v9 }
 0x139   : > { %v14683_v51 = vpack.c.bf16 %v6313_v42, %v6264_v40  ;;  %20211 = vst [vmem:[#allocation30_spill] sm:$0xff] %v15842_v52  ;;  %v4167_v40 = vrot.slane %v4151_v57, %v15414_v9  ;;  %v4109_v63 = vrot.slane %v4095_v47, %v15414_v9  ;;  %v4110_v49 = vcombine.high %v4102_v31, %v4102_v31 }
 0x13a   : > { %v4181_v42 = vrot.slane %v4159_v5, %v15414_v9  ;;  %v4118_v57 = vrot.slane %v4102_v31, %v15414_v9  ;;  %v1357_v56 = vrot.slane %v15452_v54, %v15414_v9  ;;  %v15865_v39 = vrot.slane %v4160_v21, %v15414_v9  ;;  %v15870_v5 = vpop.f32.mrb[14].mxu0 }
 0x13b   : > { %14685 = vmatprep.subr.msk.bf16.mxu0 %vm15827_vm1, %v14683_v51  ;;  %v4189_v19 = vcombine.high %v4167_v40, %v4167_v40  ;;  %v4190_v55 = vcombine.high %v4174_v44, %v4174_v44  ;;  %v4111_v13 = vcombine.high %v4109_v63, %v4109_v63  ;;  %v4132_v1 = vrot.slane %v4110_v49, %v15414_v9 }
 0x13c   : > { %14688 = vmatpush3.bf16.xpose.msk.msra.mxu0 %vm15827_vm1, %v14683_v51  ;;  %v4125_v51 = vrot.slane %v4109_v63, %v15414_v9  ;;  %v4191_v37 = vcombine.high %v4181_v42, %v4181_v42  ;;  %v4140_v47 = vcombine.high %v4118_v57, %v4118_v57  ;;  %v1364_v58 = vrot.slane %v1350_v35, %v15414_v9  ;;  %v15878_v35 = vpop.f32.mrb[15].mxu0 }
 0x13d   : > { %20212 = vst [vmem:[#allocation31_spill] sm:$0xff] %v15870_v5  ;;  %v7584_v31 = vcombine.low %v15865_v39, %v4190_v55  ;;  %v4139_v34 = vrot.slane %v4111_v13, %v15414_v9  ;;  %v7487_v16 = vcombine.low %v4094_v45, %v4118_v57  ;;  %v15874_v21 = vcombine.low %v4181_v42, %v4189_v19 }
 0x13e   : > { %v4141_v54 = vcombine.high %v4125_v51, %v4125_v51  ;;  %v7583_v48 = vcombine.low %v4191_v37, %v4174_v44  ;;  %v4142_v62 = vcombine.high %v4132_v1, %v4132_v1  ;;  %v7488_v23 = vcombine.low %v4132_v1, %v4140_v47  ;;  %v15907_v47 = vpop.f32.mrb[22].mxu1 }
 0x13f   : > { %v7600_v63 = vrot.slane %v7584_v31, %v15414_v9  ;;  %v4143_v14 = vcombine.high %v4139_v34, %v4139_v34  ;;  %v7509_v49 = vrot.slane %v7487_v16, %v15414_v9  ;;  %v1365_v52 = vcombine.high %v1357_v56, %v1357_v56 }
 0x140   : > { %v7535_v29 = vcombine.low %v4139_v34, %v4141_v54  ;;  %v7593_v5 = vrot.slane %v7583_v48, %v15414_v9  ;;  %v7516_v55 = vrot.slane %v7488_v23, %v15414_v9  ;;  %v7534_v13 = vcombine.low %v4142_v62, %v4125_v51 }
 0x141   : > { %v15882_v45 = vcombine.low %v4143_v14, %v4167_v40  ;;  %v1366_v44 = vcombine.high %v1364_v58, %v1364_v58  ;;  %v1373_v42 = vrot.slane %v1357_v56, %v15414_v9  ;;  %v1380_v48 = vrot.slane %v1364_v58, %v15414_v9 }
 0x142   : > { %v7551_v37 = vrot.slane %v7535_v29, %v15414_v9  ;;  %v15888_v16 = vcombine.low %v7509_v49, %v7516_v55  ;;  %v7544_v34 = vrot.slane %v7534_v13, %v15414_v9  ;;  %v15894_v62 = vcombine.low %v7593_v5, %v7600_v63 }
 0x143   : > { %v1387_v14 = vrot.slane %v1365_v52, %v15414_v9  ;;  %v1395_v29 = vcombine.high %v1373_v42, %v1373_v42  ;;  %v1396_v57 = vcombine.high %v1380_v48, %v1380_v48  ;;  %v20213_v56 = vcombine.low %v15536_v10, %v15539_v12 }
 0x144   : > { %v20214_v58 = vcombine.low %v15542_v15, %v15545_v20  ;;  %v15909_v5 = vcombine.low %v7544_v34, %v7551_v37  ;;  %v15912_v52 = vrot.slane %v1366_v44, %v15414_v9  ;;  %v1301_v54 = vcombine.high %v15463_v59, %v15463_v59 }
 0x145   : > { %v6354_v51 = vrot.slane %v20213_v56, %v15414_v9  ;;  %v1397_v31 = vcombine.high %v1387_v14, %v1387_v14  ;;  %v15916_v63 = vcombine.low %v1387_v14, %v1395_v29  ;;  %v1300_v12 = vcombine.high %v15757_v6, %v15757_v6 }
 0x146   : > { %v6361_v1 = vrot.slane %v20214_v58, %v15414_v9  ;;  %v1308_v15 = vrot.slane %v15463_v59, %v15414_v9  ;;  %v15923_v20 = vcombine.low %v15912_v52, %v1396_v57  ;;  %v1315_v49 = vrot.slane %v1301_v54, %v15414_v9 }
 0x147   : > { %v6502_v55 = vrot.slane %v15770_v28, %v15414_v9  ;;  %v6679_v13 = vrot.slane %v15551_v27, %v15414_v9  ;;  %v6686_v6 = vrot.slane %v15593_v2, %v15414_v9  ;;  %v15934_v59 = vcombine.low %v1397_v31, %v1380_v48 }
 0x148   : > { %v6362_v10 = vcombine.low %v6354_v51, %v6361_v1  ;;  %v1316_v44 = vcombine.high %v1308_v15, %v1308_v15  ;;  %v1324_v34 = vrot.slane %v1308_v15, %v15414_v9  ;;  %v1317_v14 = vcombine.high %v1315_v49, %v1315_v49 }
 0x149   : > { %v1331_v29 = vrot.slane %v1315_v49, %v15414_v9  ;;  %v20215_v57 = vrot.slane %v15601_v3, %v15414_v9  ;;  %v20216_v28 = vrot.slane %v15588_v30, %v15414_v9  ;;  %v6687_v2 = vcombine.low %v6679_v13, %v6686_v6  ;;  %v15961_v6 = vpop.f32.mrb[23].mxu1 }
 0x14a   : > { %v14689_v37 = vpack.c.bf16 %v15503_v25, %v6362_v10  ;;  %v1338_v25 = vrot.slane %v1316_v44, %v15414_v9  ;;  %v1346_v56 = vcombine.high %v1324_v34, %v1324_v34  ;;  %v6481_v51 = vcombine.low %v1300_v12, %v1324_v34 }
 0x14b   : > { %v6721_v27 = vcombine.low %v20216_v28, %v20215_v57  ;;  %v1345_v48 = vrot.slane %v1317_v14, %v15414_v9  ;;  %v1347_v58 = vcombine.high %v1331_v29, %v1331_v29  ;;  %v6728_v3 = vrot.slane %v15619_v0, %v15414_v9 }
 0x14c   : > { %14691 = vmatprep.subr.msk.bf16.mxu0 %vm15827_vm1, %v14689_v37  ;;  %v1348_v1 = vcombine.high %v1338_v25, %v1338_v25  ;;  %v6509_v31 = vrot.slane %v6481_v51, %v15414_v9  ;;  %v6527_v54 = vcombine.low %v1338_v25, %v1346_v56  ;;  %v4242_v10 = vcombine.high %v15549_v26, %v15549_v26 }
 0x14d   : > { %14694 = vmatpush3.bf16.xpose.msk.msra.mxu0 %vm15827_vm1, %v14689_v37  ;;  %v6735_v30 = vrot.slane %v6721_v27, %v15414_v9  ;;  %v1349_v12 = vcombine.high %v1345_v48, %v1345_v48  ;;  %v6529_v15 = vcombine.low %v1345_v48, %v1347_v58  ;;  %v4249_v13 = vrot.slane %v15549_v26, %v15414_v9 }
 0x14e   : > { %v15957_v44 = vcombine.low %v6502_v55, %v6509_v31  ;;  %v6528_v37 = vcombine.low %v1348_v1, %v1331_v29  ;;  %v6537_v0 = vrot.slane %v6527_v54, %v15414_v9  ;;  %v4256_v34 = vrot.slane %v4242_v10, %v15414_v9 }
 0x14f   : > { %v6736_v49 = vcombine.low %v6728_v3, %v6735_v30  ;;  %v6530_v14 = vcombine.low %v1349_v12, %v1373_v42  ;;  %v6551_v57 = vrot.slane %v6529_v15, %v15414_v9  ;;  %v4257_v27 = vcombine.high %v4249_v13, %v4249_v13  ;;  %v15984_v12 = vpop.f32.mrb[16].mxu0 }
 0x150   : > { %v6544_v25 = vrot.slane %v6528_v37, %v15414_v9  ;;  %v4258_v56 = vcombine.high %v4256_v34, %v4256_v34  ;;  %v4265_v51 = vrot.slane %v4249_v13, %v15414_v9  ;;  %v4272_v26 = vrot.slane %v4256_v34, %v15414_v9  ;;  %v15989_v37 = vpop.f32.mrb[17].mxu0 }
 0x151   : > { %v14695_v28 = vpack.c.bf16 %v6736_v49, %v6687_v2  ;;  %v6558_v55 = vrot.slane %v6530_v14, %v15414_v9  ;;  %v4279_v29 = vrot.slane %v4257_v27, %v15414_v9  ;;  %v6777_v42 = vrot.slane %v15612_v32, %v15414_v9  ;;  %20218 = vst [vmem:[#allocation32_spill] sm:$0xff] %v15989_v37 }
 0x152   : > { %v6784_v2 = vrot.slane %v15660_v43, %v15414_v9  ;;  %v6559_v48 = vcombine.low %v6537_v0, %v6544_v25  ;;  %v4286_v58 = vrot.slane %v4258_v56, %v15414_v9  ;;  %v20217_v3 = vrot.slane %v15633_v24, %v15414_v9 }
 0x153   : > { %14697 = vmatprep.subr.msk.bf16.mxu1 %vm15827_vm1, %v14695_v28  ;;  %v1448_v1 = vcombine.high %v15489_v11, %v15489_v11  ;;  %v6560_v31 = vcombine.low %v6551_v57, %v6558_v55  ;;  %v7910_v54 = vcombine.low %v4265_v51, %v4279_v29  ;;  %v13857_v32 = vcombine.high %v4265_v51, %v4279_v29 }
 0x154   : > { %14700 = vmatpush3.bf16.xpose.msk.msra.mxu1 %vm15827_vm1, %v14695_v28  ;;  %v6799_v30 = vrot.slane %v20217_v3, %v15414_v9  ;;  %v6785_v10 = vcombine.low %v6777_v42, %v6784_v2  ;;  %v6567_v43 = vrot.slane %v6559_v48, %v15414_v9  ;;  %v7957_v15 = vcombine.low %v4272_v26, %v4286_v58 }
 0x155   : > { %v13858_v49 = vcombine.high %v4272_v26, %v4286_v58  ;;  %v1455_v13 = vrot.slane %v15489_v11, %v15414_v9  ;;  %v6574_v24 = vrot.slane %v6560_v31, %v15414_v9  ;;  %v15993_v0 = vrot.slane %v7910_v54, %v15414_v9 }
 0x156   : > { %v15996_v34 = vrot.slane %v13857_v32, %v15414_v9  ;;  %v14701_v14 = vpack.c.bf16 %v6799_v30, %v6785_v10  ;;  %v15999_v57 = vrot.slane %v7957_v15, %v15414_v9  ;;  %v1462_v27 = vrot.slane %v1448_v1, %v15414_v9 }
 0x157   : > { %v16002_v28 = vrot.slane %v13858_v49, %v15414_v9  ;;  %v1463_v11 = vcombine.high %v1455_v13, %v1455_v13  ;;  %v16009_v51 = vcombine.low %v6567_v43, %v6574_v24  ;;  %v1471_v26 = vrot.slane %v1455_v13, %v15414_v9 }
 0x158   : > { %14703 = vmatprep.subr.msk.bf16.mxu1 %vm15827_vm1, %v14701_v14  ;;  %v1464_v29 = vcombine.high %v1462_v27, %v1462_v27  ;;  %v1478_v42 = vrot.slane %v1462_v27, %v15414_v9  ;;  %v4192_v48 = vcombine.high %v15865_v39, %v15865_v39  ;;  %v4193_v58 = vcombine.high %v15557_v36, %v15557_v36 }
 0x159   : > { %v1485_v2 = vrot.slane %v1463_v11, %v15414_v9  ;;  %v4200_v3 = vrot.slane %v15557_v36, %v15414_v9  ;;  %v1399_v30 = vcombine.high %v15492_v17, %v15492_v17  ;;  %v1398_v32 = vcombine.high %v15912_v52, %v15912_v52 }
 0x15a   : > { %v1492_v31 = vrot.slane %v1464_v29, %v15414_v9  ;;  %v4207_v39 = vrot.slane %v4193_v58, %v15414_v9  ;;  %v1406_v24 = vrot.slane %v15492_v17, %v15414_v9 }
 0x15b   : > { %v13824_v54 = vcombine.high %v1471_v26, %v1485_v2  ;;  %v4208_v10 = vcombine.high %v4200_v3, %v4200_v3  ;;  %v4216_v36 = vrot.slane %v4200_v3, %v15414_v9  ;;  %v1413_v43 = vrot.slane %v1399_v30, %v15414_v9 }
 0x15c   : > { %14706 = vmatpush3.bf16.xpose.msk.msra.mxu1 %vm15827_vm1, %v14701_v14  ;;  %v6904_v15 = vcombine.low %v1471_v26, %v1485_v2  ;;  %v6951_v49 = vcombine.low %v1478_v42, %v1492_v31  ;;  %v4209_v27 = vcombine.high %v4207_v39, %v4207_v39  ;;  %v4223_v52 = vrot.slane %v4207_v39, %v15414_v9 }
 0x15d   : > { %v6960_v13 = vrot.slane %v13824_v54, %v15414_v9  ;;  %v4230_v11 = vrot.slane %v4208_v10, %v15414_v9  ;;  %v4238_v14 = vcombine.high %v4216_v36, %v4216_v36  ;;  %v13825_v29 = vcombine.high %v1478_v42, %v1492_v31 }
 0x15e   : > { %v6967_v58 = vrot.slane %v6951_v49, %v15414_v9  ;;  %v7585_v1 = vcombine.low %v4192_v48, %v4216_v36  ;;  %v1414_v3 = vcombine.high %v1406_v24, %v1406_v24  ;;  %v4237_v30 = vrot.slane %v4209_v27, %v15414_v9 }
 0x15f   : > { %v4240_v26 = vcombine.high %v4230_v11, %v4230_v11  ;;  %v7586_v2 = vcombine.low %v4230_v11, %v4238_v14  ;;  %v1415_v55 = vcombine.high %v1413_v43, %v1413_v43  ;;  %v16044_v54 = vrot.slane %v6904_v15, %v15414_v9  ;;  %v16057_v11 = vpop.f32.mrb[18].mxu0 }
 0x160   : > { %v7607_v17 = vrot.slane %v7585_v1, %v15414_v9  ;;  %v1422_v39 = vrot.slane %v1406_v24, %v15414_v9  ;;  %v1429_v10 = vrot.slane %v1413_v43, %v15414_v9  ;;  %v6982_v25 = vcombine.low %v6960_v13, %v6967_v58  ;;  %20219 = vst [vmem:[#allocation33_spill] sm:$0xff] %v16057_v11 }
 0x161   : > { %v7614_v42 = vrot.slane %v7586_v2, %v15414_v9  ;;  %v7908_v31 = vcombine.low %v4223_v52, %v4237_v30  ;;  %v13856_v48 = vcombine.high %v4223_v52, %v4237_v30  ;;  %v16051_v36 = vrot.slane %v13825_v29, %v15414_v9  ;;  %v16074_v29 = vpop.f32.mrb[24].mxu1 }
 0x162   : > { %v16054_v49 = vrot.slane %v1414_v3, %v15414_v9  ;;  %v1443_v15 = vrot.slane %v1415_v55, %v15414_v9  ;;  %v6579_v27 = vcombine.low %v1398_v32, %v1422_v39  ;;  %v16062_v43 = vrot.slane %v4240_v26, %v15414_v9  ;;  %20220 = vst [vmem:[#allocation34_spill] sm:$0xff] %v16074_v29 }
 0x163   : > { %v16059_v1 = vcombine.low %v7607_v17, %v7614_v42  ;;  %v16065_v13 = vrot.slane %v7908_v31, %v15414_v9  ;;  %v6600_v24 = vrot.slane %v15923_v20, %v15414_v9  ;;  %v16070_v52 = vrot.slane %v13856_v48, %v15414_v9 }
 0x164   : > { %v6607_v14 = vrot.slane %v6579_v27, %v15414_v9  ;;  %v13822_v55 = vcombine.high %v1422_v39, %v16054_v49  ;;  %v6902_v32 = vcombine.low %v1429_v10, %v1443_v15  ;;  %v16077_v58 = vrot.slane %v6982_v25, %v15414_v9 }
 0x165   : > { %v13823_v3 = vcombine.high %v1429_v10, %v1443_v15  ;;  %v4340_v30 = vcombine.high %v15578_v4, %v15578_v4  ;;  %v4347_v20 = vrot.slane %v15578_v4, %v15414_v9  ;;  %v4291_v39 = vcombine.high %v15582_v22, %v15582_v22  ;;  %v16097_v4 = vpop.f32.mrb[19].mxu0 }
 0x166   : > { %v16083_v26 = vcombine.low %v6600_v24, %v6607_v14  ;;  %v16088_v17 = vrot.slane %v13822_v55, %v15414_v9  ;;  %v16093_v25 = vrot.slane %v6902_v32, %v15414_v9  ;;  %20221 = vst [vmem:[#allocation35_spill] sm:$0xff] %v16097_v4  ;;  %v4298_v15 = vrot.slane %v15582_v22, %v15414_v9 }
 0x167   : > { %v4354_v10 = vrot.slane %v4340_v30, %v15414_v9  ;;  %v4355_v42 = vcombine.high %v4347_v20, %v4347_v20  ;;  %v4363_v31 = vrot.slane %v4347_v20, %v15414_v9  ;;  %v4305_v27 = vrot.slane %v4291_v39, %v15414_v9 }
 0x168   : > { %v6088_v24 = vcombine.low %v15712_v38, %v15725_v46  ;;  %v16107_v14 = vrot.slane %v13823_v3, %v15414_v9  ;;  %v4306_v20 = vcombine.high %v4298_v15, %v4298_v15  ;;  %v4314_v48 = vrot.slane %v4298_v15, %v15414_v9 }
 0x169   : > { %v4356_v55 = vcombine.high %v4354_v10, %v4354_v10  ;;  %v16110_v32 = vrot.slane %v4354_v10, %v15414_v9  ;;  %v4377_v30 = vrot.slane %v4355_v42, %v15414_v9  ;;  %v4307_v2 = vcombine.high %v4305_v27, %v4305_v27 }
 0x16a   : > { %v4321_v22 = vrot.slane %v4305_v27, %v15414_v9  ;;  %v20223_v46 = vcombine.low %v15702_v50, %v15709_v8  ;;  %v4328_v42 = vrot.slane %v4306_v20, %v15414_v9  ;;  %v6102_v15 = vrot.slane %v6088_v24, %v15414_v9 }
 0x16b   : > { %20222 = vst [vmem:[#allocation36_spill] sm:$0xff] %v16110_v32  ;;  %v8008_v56 = vcombine.low %v4363_v31, %v4377_v30  ;;  %v13861_v38 = vcombine.high %v4363_v31, %v4377_v30  ;;  %v4386_v10 = vcombine.high %v16110_v32, %v16110_v32  ;;  %v4335_v40 = vrot.slane %v4307_v2, %v15414_v9 }
 0x16c   : > { %v6095_v3 = vrot.slane %v20223_v46, %v15414_v9  ;;  %v16127_v27 = vrot.slane %v4356_v55, %v15414_v9  ;;  %v1546_v50 = vcombine.high %v15512_v33, %v15512_v33  ;;  %v7959_v8 = vcombine.low %v4314_v48, %v4328_v42 }
 0x16d   : > { %v16130_v39 = vrot.slane %v8008_v56, %v15414_v9  ;;  %v16133_v31 = vrot.slane %v13861_v38, %v15414_v9  ;;  %v13859_v30 = vcombine.high %v4314_v48, %v4328_v42  ;;  %v8006_v46 = vcombine.low %v4321_v22, %v4335_v40 }
 0x16e   : > { %v13860_v20 = vcombine.high %v4321_v22, %v4335_v40  ;;  %v6103_v24 = vcombine.low %v6095_v3, %v6102_v15  ;;  %v1553_v55 = vrot.slane %v15512_v33, %v15414_v9  ;;  %v1560_v56 = vrot.slane %v1546_v50, %v15414_v9  ;;  %v20228_v15 = vld [vmem:[#allocation14_spill] sm:$0xff] }
 0x16f   : > { %20224 = vst [vmem:[#allocation37_spill] sm:$0xff] %v16130_v39  ;;  %20225 = vst [vmem:[#allocation38_spill] sm:$0xff] %v16133_v31  ;;  %v16145_v23 = vcombine.low %v16127_v27, %v4386_v10  ;;  %v16148_v19 = vrot.slane %v7959_v8, %v15414_v9  ;;  %v16151_v40 = vrot.slane %v13859_v30, %v15414_v9  ;;  %v20230_v8 = vld [vmem:[#allocation2_spill] sm:$0xff] }
 0x170   : > { %14443 = vmatprep.mubr.msk.f32.mxu0 %vm268_vm0, %v6103_v24  ;;  %v1561_v48 = vcombine.high %v1553_v55, %v1553_v55  ;;  %v1562_v22 = vcombine.high %v1560_v56, %v1560_v56  ;;  %v1569_v33 = vrot.slane %v1553_v55, %v15414_v9  ;;  %v1576_v3 = vrot.slane %v1560_v56, %v15414_v9 }
 0x171   : > { %v16157_v42 = vrot.slane %v8006_v46, %v15414_v9  ;;  %v16160_v10 = vrot.slane %v13860_v20, %v15414_v9  ;;  %v20229_v50 = vcombine.low %v15691_v41, %v20228_v15  ;;  %v1497_v30 = vcombine.high %v20230_v8, %v20230_v8  ;;  %v20231_v15 = vld [vmem:[#allocation4_spill] sm:$0xff] }
 0x172   : > { %v1504_v24 = vrot.slane %v20230_v8, %v15414_v9  ;;  %v1583_v55 = vrot.slane %v1561_v48, %v15414_v9  ;;  %v16172_v56 = vrot.slane %v1562_v22, %v15414_v9  ;;  %v1591_v46 = vcombine.high %v1569_v33, %v1569_v33  ;;  %v16183_v22 = vpop.f32.mrb[25].mxu1 }
 0x173   : > { %20226 = vst [vmem:[#allocation39_spill] sm:$0xff] %v16157_v42  ;;  %20227 = vst [vmem:[#allocation40_spill] sm:$0xff] %v16160_v10  ;;  %14444 = vmatmul.mubr.msk.f32.vlgmr.msra.gmra.mrb[50].mxu0 %vm268_vm0, %v20229_v50  ;;  %v1592_v2 = vcombine.high %v1576_v3, %v1576_v3  ;;  %v1511_v20 = vrot.slane %v1497_v30, %v15414_v9  ;;  %v4438_v50 = vcombine.high %v20231_v15, %v20231_v15 }
 0x174   : > { %v1512_v38 = vcombine.high %v1504_v24, %v1504_v24  ;;  %v1520_v41 = vrot.slane %v1504_v24, %v15414_v9  ;;  %v1593_v31 = vcombine.high %v1583_v55, %v1583_v55  ;;  %v7002_v8 = vcombine.low %v1569_v33, %v1583_v55  ;;  %20233 = vst [vmem:[#allocation2_spill] sm:$0xff] %v16183_v22 }
 0x175   : > { %v16181_v48 = vcombine.low %v16172_v56, %v1592_v2  ;;  %v1513_v39 = vcombine.high %v1511_v20, %v1511_v20  ;;  %v1527_v29 = vrot.slane %v1511_v20, %v15414_v9  ;;  %v4445_v24 = vrot.slane %v20231_v15, %v15414_v9 }
 0x176   : > { %v1534_v30 = vrot.slane %v1512_v38, %v15414_v9  ;;  %v16192_v32 = vrot.slane %v1591_v46, %v15414_v9  ;;  %v16194_v33 = vcombine.low %v1593_v31, %v1576_v3  ;;  %v4452_v2 = vrot.slane %v4438_v50, %v15414_v9  ;;  %v16205_v46 = vpop.f32.mrb[26].mxu1 }
 0x177   : > { %20232 = vst [vmem:[#allocation14_spill] sm:$0xff] %v16181_v48  ;;  %v1541_v55 = vrot.slane %v1513_v39, %v15414_v9  ;;  %v4453_v20 = vcombine.high %v4445_v24, %v4445_v24  ;;  %v16199_v38 = vrot.slane %v7002_v8, %v15414_v9  ;;  %v16202_v15 = vrot.slane %v4445_v24, %v15414_v9  ;;  %v20243_v48 = vld [vmem:[#allocation7_spill] sm:$0xff] }
 0x178   : > { %20234 = vst [vmem:[#allocation4_spill] sm:$0xff] %v16192_v32  ;;  %20235 = vst [vmem:[#allocation41_spill] sm:$0xff] %v16194_v33  ;;  %v6953_v22 = vcombine.low %v1520_v41, %v1534_v30  ;;  %v13826_v11 = vcombine.high %v1520_v41, %v1534_v30  ;;  %v4454_v37 = vcombine.high %v4452_v2, %v4452_v2  ;;  %v16210_v41 = vpop.f32.mrb[27].mxu1  ;;  %v20242_v33 = vld [vmem:[#allocation12_spill] sm:$0xff] }
 0x179   : > { %20236 = vst [vmem:[#allocation42_spill] sm:$0xff] %v16199_v38  ;;  %v4468_v4 = vrot.slane %v4452_v2, %v15414_v9  ;;  %20237 = vst [vmem:[#allocation43_spill] sm:$0xff] %v16205_v46  ;;  %v7000_v39 = vcombine.low %v1527_v29, %v1541_v55  ;;  %v13827_v50 = vcombine.high %v1527_v29, %v1541_v55  ;;  %v20239_v29 = vld [vmem:[#allocation11_spill] sm:$0xff]  ;;  %v20240_v55 = vld [vmem:[#allocation13_spill] sm:$0xff] }
 0x17a   : > { %v6981_v3 = vrot.slane %v6953_v22, %v15414_v9  ;;  %20238 = vst [vmem:[#allocation44_spill] sm:$0xff] %v16210_v41  ;;  %v4475_v30 = vrot.slane %v4453_v20, %v15414_v9  ;;  %v4483_v24 = vcombine.high %v16202_v15, %v16202_v15  ;;  %v16219_v10 = vrot.slane %v13826_v11, %v15414_v9  ;;  %v20246_v32 = vld [vmem:[#allocation8_spill] sm:$0xff] }
 0x17b   : > { %v4484_v2 = vcombine.high %v4468_v4, %v4468_v4  ;;  %v16222_v22 = vrot.slane %v4454_v37, %v15414_v9  ;;  %v20241_v31 = vcombine.low %v20239_v29, %v20240_v55  ;;  %v16229_v8 = vrot.slane %v7000_v39, %v15414_v9  ;;  %v20247_v29 = vld [vmem:[#allocation9_spill] sm:$0xff] }
 0x17c   : > { %v6983_v46 = vcombine.low %v16051_v36, %v6981_v3  ;;  %v4485_v20 = vcombine.high %v4475_v30, %v4475_v30  ;;  %v8382_v42 = vcombine.low %v4475_v30, %v4483_v24  ;;  %v20244_v36 = vcombine.low %v20242_v33, %v20243_v48 }
 0x17d   : > { %v7102_v41 = vrot.slane %v20241_v31, %v15414_v9  ;;  %v16239_v37 = vrot.slane %v13827_v50, %v15414_v9  ;;  %v20248_v31 = vcombine.low %v20246_v32, %v20247_v29  ;;  %v20249_v39 = vcombine.low %v15645_v7, %v15795_v53 }
 0x17e   : > { %v7109_v3 = vrot.slane %v20244_v36, %v15414_v9  ;;  %v16236_v11 = vrot.slane %v6983_v46, %v15414_v9  ;;  %v8383_v24 = vcombine.low %v4485_v20, %v4468_v4  ;;  %v8404_v48 = vrot.slane %v8382_v42, %v15414_v9  ;;  %v20251_v4 = vld [vmem:[#allocation30_spill] sm:$0xff]  ;;  %v20252_v42 = vld [vmem:[#allocation29_spill] sm:$0xff] }
 0x17f   : > { %20245 = vst [vmem:[#allocation11_spill] sm:$0xff] %v16239_v37  ;;  %v7151_v55 = vrot.slane %v20248_v31, %v15414_v9  ;;  %v7158_v30 = vrot.slane %v20249_v39, %v15414_v9  ;;  %v16251_v33 = vcombine.low %v16222_v22, %v4484_v2  ;;  %v20250_v37 = vld [vmem:[#allocation5_spill] sm:$0xff]  ;;  %v4388_v53 = vcombine.high %v16127_v27, %v16127_v27  ;;  %v20254_v27 = vld [vmem:[#allocation3_spill] sm:$0xff] }
 0x180   : > { %v7110_v46 = vcombine.low %v7102_v41, %v7109_v3  ;;  %v4389_v32 = vcombine.high %v20250_v37, %v20250_v37  ;;  %v4396_v29 = vrot.slane %v20250_v37, %v15414_v9  ;;  %v8411_v7 = vrot.slane %v8383_v24, %v15414_v9 }
 0x181   : > { %v7159_v36 = vcombine.low %v7151_v55, %v7158_v30  ;;  %v6186_v2 = vcombine.low %v20252_v42, %v20251_v4  ;;  %v20253_v41 = vcombine.low %v15823_v60, %v15834_v61  ;;  %v8341_v37 = vrot.slane %v16145_v23, %v15414_v9  ;;  %v16277_v42 = vpop.f32.mrb[20].mxu0 }
 0x182   : > { %v4403_v31 = vrot.slane %v4389_v32, %v15414_v9  ;;  %v4404_v55 = vcombine.high %v4396_v29, %v4396_v29  ;;  %v4412_v39 = vrot.slane %v4396_v29, %v15414_v9  ;;  %v1644_v24 = vcombine.high %v20254_v27, %v20254_v27  ;;  %20255 = vst [vmem:[#allocation13_spill] sm:$0xff] %v16277_v42  ;;  %v16283_v23 = vpop.f32.mrb[21].mxu0 }
 0x183   : > { %v6193_v20 = vrot.slane %v20253_v41, %v15414_v9  ;;  %v14707_v3 = vpack.c.bf16 %v7159_v36, %v7110_v46  ;;  %v6200_v30 = vrot.slane %v6186_v2, %v15414_v9  ;;  %v1651_v4 = vrot.slane %v20254_v27, %v15414_v9  ;;  %20256 = vst [vmem:[#allocation12_spill] sm:$0xff] %v16283_v23 }
 0x184   : > { %v4405_v60 = vcombine.high %v4403_v31, %v4403_v31  ;;  %v4419_v61 = vrot.slane %v4403_v31, %v15414_v9  ;;  %v4426_v46 = vrot.slane %v4404_v55, %v15414_v9  ;;  %v4434_v36 = vcombine.high %v4412_v39, %v4412_v39 }
 0x185   : > { %14709 = vmatprep.subr.msk.bf16.mxu0 %vm15827_vm1, %v14707_v3  ;;  %v8332_v32 = vcombine.low %v4388_v53, %v4412_v39  ;;  %v6201_v29 = vcombine.low %v6193_v20, %v6200_v30  ;;  %v1658_v2 = vrot.slane %v1644_v24, %v15414_v9  ;;  %v1659_v41 = vcombine.high %v1651_v4, %v1651_v4 }
 0x186   : > { %14712 = vmatpush3.bf16.xpose.msk.msra.mxu0 %vm15827_vm1, %v14707_v3  ;;  %v4433_v27 = vrot.slane %v4405_v60, %v15414_v9  ;;  %v4435_v50 = vcombine.high %v4419_v61, %v4419_v61  ;;  %v4436_v42 = vcombine.high %v4426_v46, %v4426_v46  ;;  %v8333_v38 = vcombine.low %v4426_v46, %v4434_v36 }
 0x187   : > { %v8348_v31 = vrot.slane %v8332_v32, %v15414_v9  ;;  %14446 = vmatprep.mubr.msk.f32.mxu0 %vm268_vm0, %v6201_v29  ;;  %v1660_v55 = vcombine.high %v1658_v2, %v1658_v2  ;;  %v1667_v23 = vrot.slane %v1651_v4, %v15414_v9  ;;  %v1674_v53 = vrot.slane %v1658_v2, %v15414_v9 }
 0x188   : > { %v4437_v20 = vcombine.high %v4433_v27, %v4433_v27  ;;  %v8334_v39 = vcombine.low %v4436_v42, %v4419_v61  ;;  %v8355_v3 = vrot.slane %v8333_v38, %v15414_v9  ;;  %v16294_v30 = vcombine.low %v4433_v27, %v4435_v50 }
 0x189   : > { %v16298_v60 = vcombine.low %v8341_v37, %v8348_v31  ;;  %v1681_v46 = vrot.slane %v1659_v41, %v15414_v9  ;;  %v1689_v36 = vcombine.high %v1667_v23, %v1667_v23  ;;  %v16301_v32 = vcombine.low %v8404_v48, %v8411_v7  ;;  %v20261_v37 = vld [vmem:[#allocation17_spill] sm:$0xff]  ;;  %v20264_v7 = vld [vmem:[#allocation6_spill] sm:$0xff] }
 0x18a   : > { %20257 = vst [vmem:[#allocation7_spill] sm:$0xff] %v16294_v30  ;;  %v8362_v4 = vrot.slane %v8334_v39, %v15414_v9  ;;  %v16305_v29 = vcombine.low %v4437_v20, %v16202_v15  ;;  %v1690_v42 = vcombine.high %v1674_v53, %v1674_v53  ;;  %v16308_v38 = vrot.slane %v1660_v55, %v15414_v9  ;;  %v16324_v55 = vpop.f32.mrb[28].mxu1  ;;  %v20270_v20 = vld [vmem:[#allocation10_spill] sm:$0xff] }
 0x18b   : > { %20258 = vst [vmem:[#allocation8_spill] sm:$0xff] %v16298_v60  ;;  %20259 = vst [vmem:[#allocation9_spill] sm:$0xff] %v16301_v32  ;;  %v1691_v50 = vcombine.high %v1681_v46, %v1681_v46  ;;  %v16310_v61 = vcombine.low %v1681_v46, %v1689_v36  ;;  %v20262_v2 = vrot.slane %v20261_v37, %v15414_v9  ;;  %v20266_v46 = vld [vmem:[#allocation25_spill] sm:$0xff] }
 0x18c   : > { %20260 = vst [vmem:[#allocation5_spill] sm:$0xff] %v16305_v29  ;;  %v16316_v27 = vcombine.low %v8355_v3, %v8362_v4  ;;  %v1594_v15 = vcombine.high %v16172_v56, %v16172_v56  ;;  %v1595_v31 = vcombine.high %v20264_v7, %v20264_v7  ;;  %20265 = vst [vmem:[#allocation29_spill] sm:$0xff] %v16324_v55  ;;  %v20268_v56 = vld [vmem:[#allocation23_spill] sm:$0xff] }
 0x18d   : > { %v6215_v41 = vrot.slane %v20262_v2, %v15414_v9  ;;  %v16329_v39 = vcombine.low %v16308_v38, %v1690_v42  ;;  %v1602_v3 = vrot.slane %v20264_v7, %v15414_v9  ;;  %v20267_v36 = vrot.slane %v20266_v46, %v15414_v9 }
 0x18e   : > { %20263 = vst [vmem:[#allocation30_spill] sm:$0xff] %v16316_v27  ;;  %v20269_v4 = vrot.slane %v20268_v56, %v15414_v9  ;;  %v7404_v2 = vrot.slane %v16310_v61, %v15414_v9  ;;  %v1609_v48 = vrot.slane %v1595_v31, %v15414_v9  ;;  %v6525_v42 = vrot.slane %v15957_v44, %v15414_v9 }
 0x18f   : > { %14447 = vmatmul.mubr.msk.f32.gmra.mrb[52].mxu0 %vm268_vm0, %v6215_v41  ;;  %v4536_v41 = vcombine.high %v20270_v20, %v20270_v20  ;;  %v16347_v24 = vcombine.low %v1691_v50, %v1674_v53  ;;  %v1610_v7 = vcombine.high %v1602_v3, %v1602_v3  ;;  %v1618_v46 = vrot.slane %v1602_v3, %v15414_v9 }
 0x190   : > { %v6510_v37 = vcombine.low %v20269_v4, %v20267_v36  ;;  %v1611_v56 = vcombine.high %v1609_v48, %v1609_v48  ;;  %v1625_v36 = vrot.slane %v1609_v48, %v15414_v9  ;;  %v4543_v61 = vrot.slane %v20270_v20, %v15414_v9 }
 0x191   : > { %v4550_v31 = vrot.slane %v4536_v41, %v15414_v9  ;;  %v1632_v44 = vrot.slane %v1610_v7, %v15414_v9  ;;  %v1640_v4 = vcombine.high %v1618_v46, %v1618_v46  ;;  %v7326_v32 = vcombine.low %v1594_v15, %v1618_v46 }
 0x192   : > { %v6518_v55 = vrot.slane %v6510_v37, %v15414_v9  ;;  %v1639_v53 = vrot.slane %v1611_v56, %v15414_v9  ;;  %v1641_v50 = vcombine.high %v1625_v36, %v1625_v36  ;;  %v4551_v29 = vcombine.high %v4543_v61, %v4543_v61  ;;  %v20272_v56 = vld [vmem:[#allocation27_spill] sm:$0xff] }
 0x193   : > { %v4552_v3 = vcombine.high %v4550_v31, %v4550_v31  ;;  %v1642_v27 = vcombine.high %v1632_v44, %v1632_v44  ;;  %v7327_v37 = vcombine.low %v1632_v44, %v1640_v4  ;;  %v7348_v60 = vrot.slane %v7326_v32, %v15414_v9  ;;  %v20271_v32 = vld [vmem:[#allocation26_spill] sm:$0xff] }
 0x194   : > { %v6526_v30 = vcombine.low %v6518_v55, %v6525_v42  ;;  %v4559_v48 = vrot.slane %v4543_v61, %v15414_v9  ;;  %v1643_v20 = vcombine.high %v1639_v53, %v1639_v53  ;;  %v7374_v41 = vcombine.low %v1639_v53, %v1641_v50 }
 0x195   : > { %v4566_v7 = vrot.slane %v4550_v31, %v15414_v9  ;;  %v4573_v15 = vrot.slane %v4551_v29, %v15414_v9  ;;  %v7355_v55 = vrot.slane %v7327_v37, %v15414_v9  ;;  %v7373_v42 = vcombine.low %v1642_v27, %v1625_v36 }
 0x196   : > { %14457 = vmatprep.mubr.msk.f32.mxu1 %vm268_vm0, %v6526_v30  ;;  %v4580_v46 = vrot.slane %v4552_v3, %v15414_v9  ;;  %v20273_v30 = vcombine.low %v20271_v32, %v20272_v56  ;;  %v7375_v61 = vcombine.low %v1643_v20, %v1667_v23  ;;  %v7390_v4 = vrot.slane %v7374_v41, %v15414_v9  ;;  %v20274_v23 = vld [vmem:[#allocation28_spill] sm:$0xff]  ;;  %v20275_v20 = vld [vmem:[#allocation22_spill] sm:$0xff] }
 0x197   : > { %14458 = vmatmul.mubr.msk.f32.vlgmr.msra.gmra.mrb[50].mxu1 %vm268_vm0, %v16009_v51  ;;  %v8755_v53 = vcombine.low %v4559_v48, %v4573_v15  ;;  %v13885_v31 = vcombine.high %v4559_v48, %v4573_v15  ;;  %v16373_v50 = vcombine.low %v7348_v60, %v7355_v55  ;;  %v7383_v51 = vrot.slane %v7373_v42, %v15414_v9  ;;  %v16383_v48 = vpop.f32.mrb[29].mxu1  ;;  %v20280_v42 = vld [vmem:[#allocation21_spill] sm:$0xff] }
 0x198   : > { %v7200_v44 = vrot.slane %v20273_v30, %v15414_v9  ;;  %v8757_v27 = vcombine.low %v4566_v7, %v4580_v46  ;;  %v7397_v3 = vrot.slane %v7375_v61, %v15414_v9  ;;  %v13886_v37 = vcombine.high %v4566_v7, %v4580_v46  ;;  %20277 = vst [vmem:[#allocation3_spill] sm:$0xff] %v16383_v48  ;;  %v20281_v7 = vld [vmem:[#allocation24_spill] sm:$0xff] }
 0x199   : > { %v20276_v41 = vcombine.low %v20274_v23, %v20275_v20  ;;  %v7405_v15 = vcombine.low %v7383_v51, %v7390_v4  ;;  %v16386_v60 = vrot.slane %v8755_v53, %v15414_v9  ;;  %v16389_v55 = vrot.slane %v13885_v31, %v15414_v9 }
 0x19a   : > { %v7222_v56 = vrot.slane %v20280_v42, %v15414_v9  ;;  %v7406_v30 = vcombine.low %v7397_v3, %v7404_v2  ;;  %v7525_v46 = vrot.slane %v20281_v7, %v15414_v9  ;;  %v7532_v23 = vrot.slane %v15888_v16, %v15414_v9  ;;  %v20285_v16 = vld [vmem:[#allocation15_spill] sm:$0xff]  ;;  %v20287_v42 = vld [vmem:[#allocation16_spill] sm:$0xff] }
 0x19b   : > { %v7207_v32 = vrot.slane %v20276_v41, %v15414_v9  ;;  %20278 = vst [vmem:[#allocation17_spill] sm:$0xff] %v16386_v60  ;;  %20279 = vst [vmem:[#allocation6_spill] sm:$0xff] %v16389_v55  ;;  %v7413_v20 = vrot.slane %v7405_v15, %v15414_v9  ;;  %v16399_v4 = vrot.slane %v8757_v27, %v15414_v9  ;;  %v16412_v15 = vpop.f32.mrb[22].mxu0 }
 0x19c   : > { %v20283_v53 = vrot.slane %v15874_v21, %v15414_v9  ;;  %v20284_v31 = vrot.slane %v15882_v45, %v15414_v9  ;;  %v7574_v2 = vrot.slane %v15909_v5, %v15414_v9  ;;  %v7533_v41 = vcombine.low %v7525_v46, %v7532_v23  ;;  %20286 = vst [vmem:[#allocation23_spill] sm:$0xff] %v16412_v15  ;;  %v16422_v7 = vpop.f32.mrb[23].mxu0 }
 0x19d   : > { %v7208_v61 = vcombine.low %v7200_v44, %v7207_v32  ;;  %20282 = vst [vmem:[#allocation25_spill] sm:$0xff] %v16399_v4  ;;  %v7420_v44 = vrot.slane %v7406_v30, %v15414_v9  ;;  %v1742_v32 = vcombine.high %v20285_v16, %v20285_v16  ;;  %v16415_v27 = vrot.slane %v13886_v37, %v15414_v9 }
 0x19e   : > { %v7567_v51 = vcombine.low %v20284_v31, %v20283_v53  ;;  %v1749_v45 = vrot.slane %v20285_v16, %v15414_v9  ;;  %v4487_v5 = vcombine.high %v20287_v42, %v20287_v42  ;;  %20288 = vst [vmem:[#allocation10_spill] sm:$0xff] %v16422_v7  ;;  %v4486_v37 = vcombine.high %v16222_v22, %v16222_v22 }
 0x19f   : > { %v14713_v3 = vpack.c.bf16 %v7222_v56, %v7208_v61  ;;  %v16424_v56 = vcombine.low %v7413_v20, %v7420_v44  ;;  %v1756_v30 = vrot.slane %v1742_v32, %v15414_v9  ;;  %v4494_v61 = vrot.slane %v20287_v42, %v15414_v9 }
 0x1a0   : > { %v7581_v21 = vrot.slane %v7567_v51, %v15414_v9  ;;  %v1757_v23 = vcombine.high %v1749_v45, %v1749_v45  ;;  %v1765_v53 = vrot.slane %v1749_v45, %v15414_v9  ;;  %v4501_v31 = vrot.slane %v4487_v5, %v15414_v9 }
 0x1a1   : > { %14715 = vmatprep.subr.msk.bf16.mxu0 %vm15827_vm1, %v14713_v3  ;;  %v1758_v20 = vcombine.high %v1756_v30, %v1756_v30  ;;  %v1772_v51 = vrot.slane %v1756_v30, %v15414_v9  ;;  %v4502_v44 = vcombine.high %v4494_v61, %v4494_v61  ;;  %v4510_v16 = vrot.slane %v4494_v61, %v15414_v9 }
 0x1a2   : > { %v7582_v46 = vcombine.low %v7574_v2, %v7581_v21  ;;  %14718 = vmatpush3.bf16.xpose.msk.msra.mxu0 %vm15827_vm1, %v14713_v3  ;;  %v1779_v22 = vrot.slane %v1757_v23, %v15414_v9  ;;  %v4503_v36 = vcombine.high %v4501_v31, %v4501_v31  ;;  %v4517_v2 = vrot.slane %v4501_v31, %v15414_v9 }
 0x1a3   : > { %v1786_v21 = vrot.slane %v1758_v20, %v15414_v9  ;;  %v4524_v45 = vrot.slane %v4502_v44, %v15414_v9  ;;  %v4532_v42 = vcombine.high %v4510_v16, %v4510_v16  ;;  %v8430_v5 = vcombine.low %v4486_v37, %v4510_v16 }
 0x1a4   : > { %v14719_v32 = vpack.c.bf16 %v7582_v46, %v7533_v41  ;;  %v7749_v3 = vcombine.low %v1765_v53, %v1779_v22  ;;  %v13851_v30 = vcombine.high %v1765_v53, %v1779_v22  ;;  %v16446_v29 = vrot.slane %v4503_v36, %v15414_v9 }
 0x1a5   : > { %v8439_v41 = vrot.slane %v16251_v33, %v15414_v9  ;;  %v7796_v61 = vcombine.low %v1772_v51, %v1786_v21  ;;  %v13852_v46 = vcombine.high %v1772_v51, %v1786_v21  ;;  %v4534_v23 = vcombine.high %v4524_v45, %v4524_v45 }
 0x1a6   : > { %14721 = vmatprep.subr.msk.bf16.mxu1 %vm15827_vm1, %v14719_v32  ;;  %20289 = vst [vmem:[#allocation26_spill] sm:$0xff] %v16446_v29  ;;  %v8431_v31 = vcombine.low %v4524_v45, %v4532_v42  ;;  %v16455_v20 = vrot.slane %v7749_v3, %v15414_v9  ;;  %v16458_v53 = vrot.slane %v13851_v30, %v15414_v9  ;;  %v20290_v45 = vld [vmem:[#allocation18_spill] sm:$0xff] }
 0x1a7   : > { %14724 = vmatpush3.bf16.xpose.msk.msra.mxu1 %vm15827_vm1, %v14719_v32  ;;  %v8446_v36 = vrot.slane %v8430_v5, %v15414_v9  ;;  %v7806_v33 = vrot.slane %v7796_v61, %v15414_v9  ;;  %v7813_v51 = vrot.slane %v13852_v46, %v15414_v9  ;;  %v8432_v44 = vcombine.low %v4534_v23, %v4517_v2  ;;  %v20291_v61 = vld [vmem:[#allocation19_spill] sm:$0xff]  ;;  %v20295_v5 = vld [vmem:[#allocation20_spill] sm:$0xff] }
 0x1a8   : > { %v1692_v16 = vcombine.high %v16308_v38, %v16308_v38  ;;  %v13884_v21 = vcombine.high %v4517_v2, %v16446_v29  ;;  %v1693_v42 = vcombine.high %v20290_v45, %v20290_v45  ;;  %v8453_v3 = vrot.slane %v8431_v31, %v15414_v9 }
 0x1a9   : > { %v16465_v32 = vcombine.low %v8439_v41, %v8446_v36  ;;  %v1700_v30 = vrot.slane %v20290_v45, %v15414_v9  ;;  %v4634_v38 = vcombine.high %v20291_v61, %v20291_v61  ;;  %v16479_v41 = vpop.f32.mrb[30].mxu1  ;;  %v7828_v46 = vcombine.low %v7806_v33, %v7813_v51 }
 0x1aa   : > { %20292 = vst [vmem:[#allocation27_spill] sm:$0xff] %v16479_v41  ;;  %v16482_v23 = vrot.slane %v13884_v21, %v15414_v9  ;;  %v1707_v2 = vrot.slane %v1693_v42, %v15414_v9  ;;  %v4641_v36 = vrot.slane %v20291_v61, %v15414_v9  ;;  %v16487_v37 = vpop.f32.mrb[31].mxu1  ;;  %v8460_v31 = vrot.slane %v8432_v44, %v15414_v9 }
 0x1ab   : > { %20294 = vst [vmem:[#allocation22_spill] sm:$0xff] %v16487_v37  ;;  %v1708_v22 = vcombine.high %v1700_v30, %v1700_v30  ;;  %v1716_v45 = vrot.slane %v1700_v30, %v15414_v9  ;;  %v4585_v7 = vcombine.high %v20295_v5, %v20295_v5  ;;  %v4648_v42 = vrot.slane %v4634_v38, %v15414_v9 }
 0x1ac   : > { %20293 = vst [vmem:[#allocation28_spill] sm:$0xff] %v16482_v23  ;;  %v1709_v51 = vcombine.high %v1707_v2, %v1707_v2  ;;  %v1723_v21 = vrot.slane %v1707_v2, %v15414_v9  ;;  %v4649_v44 = vcombine.high %v4641_v36, %v4641_v36  ;;  %v4657_v48 = vrot.slane %v4641_v36, %v15414_v9 }
 0x1ad   : > { %v16498_v61 = vrot.slane %v1708_v22, %v15414_v9  ;;  %v1738_v37 = vcombine.high %v1716_v45, %v1716_v45  ;;  %v7424_v41 = vcombine.low %v1692_v16, %v1716_v45  ;;  %v4650_v30 = vcombine.high %v4648_v42, %v4648_v42 }
 0x1ae   : > { %v1737_v15 = vrot.slane %v1709_v51, %v15414_v9  ;;  %v4664_v4 = vrot.slane %v4648_v42, %v15414_v9  ;;  %v16504_v33 = vrot.slane %v7828_v46, %v15414_v9  ;;  %v4671_v22 = vrot.slane %v4649_v44, %v15414_v9  ;;  %v16512_v51 = vpop.f32.mrb[24].mxu0 }
 0x1af   : > { %v7425_v2 = vcombine.low %v16498_v61, %v1738_v37  ;;  %v7446_v38 = vrot.slane %v7424_v41, %v15414_v9  ;;  %v16510_v16 = vrot.slane %v4650_v30, %v15414_v9  ;;  %20296 = vst [vmem:[#allocation21_spill] sm:$0xff] %v16512_v51  ;;  %v4592_v46 = vrot.slane %v20295_v5, %v15414_v9 }
 0x1b0   : > { %v7747_v55 = vcombine.low %v1723_v21, %v1737_v15  ;;  %v13850_v60 = vcombine.high %v1723_v21, %v1737_v15  ;;  %v4680_v45 = vcombine.high %v4664_v4, %v4664_v4  ;;  %v8853_v42 = vcombine.low %v4657_v48, %v4671_v22 }
 0x1b1   : > { %v7453_v36 = vrot.slane %v7425_v2, %v15414_v9  ;;  %v13889_v23 = vcombine.high %v4657_v48, %v4671_v22  ;;  %v16517_v37 = vcombine.low %v8453_v3, %v8460_v31  ;;  %v8855_v21 = vcombine.low %v4664_v4, %v16510_v16 }
 0x1b2   : > { %v16522_v15 = vrot.slane %v7747_v55, %v15414_v9  ;;  %v16528_v30 = vrot.slane %v13850_v60, %v15414_v9  ;;  %v16531_v48 = vrot.slane %v4680_v45, %v15414_v9  ;;  %v4599_v5 = vrot.slane %v4585_v7, %v15414_v9 }
 0x1b3   : > { %20297 = vst [vmem:[#allocation24_spill] sm:$0xff] %v16517_v37  ;;  %v16525_v44 = vcombine.low %v7446_v38, %v7453_v36  ;;  %v16535_v3 = vrot.slane %v8853_v42, %v15414_v9  ;;  %v4600_v31 = vcombine.high %v4592_v46, %v4592_v46  ;;  %v4608_v2 = vrot.slane %v4592_v46, %v15414_v9  ;;  %v20303_v46 = vld [vmem:[#allocation31_spill] sm:$0xff] }
 0x1b4   : > { %20298 = vst [vmem:[#allocation15_spill] sm:$0xff] %v16531_v48  ;;  %v20299_v55 = vrot.slane %v15934_v59, %v15414_v9  ;;  %v20300_v4 = vrot.slane %v15916_v63, %v15414_v9  ;;  %v16545_v60 = vrot.slane %v13889_v23, %v15414_v9  ;;  %v4601_v22 = vcombine.high %v4599_v5, %v4599_v5 }
 0x1b5   : > { %v4615_v45 = vrot.slane %v4599_v5, %v15414_v9  ;;  %v6623_v7 = vrot.slane %v16083_v26, %v15414_v9  ;;  %v16551_v36 = vrot.slane %v8855_v21, %v15414_v9  ;;  %v4622_v42 = vrot.slane %v4600_v31, %v15414_v9 }
 0x1b6   : > { %v6608_v38 = vcombine.low %v20300_v4, %v20299_v55  ;;  %20301 = vst [vmem:[#allocation16_spill] sm:$0xff] %v16545_v60  ;;  %v1840_v63 = vcombine.high %v20303_v46, %v20303_v46  ;;  %v4629_v55 = vrot.slane %v4601_v22, %v15414_v9  ;;  %v20304_v23 = vrot.slane %v16054_v49, %v15414_v9 }
 0x1b7   : > { %20302 = vst [vmem:[#allocation18_spill] sm:$0xff] %v16551_v36  ;;  %v1847_v26 = vrot.slane %v20303_v46, %v15414_v9  ;;  %v1791_v21 = vcombine.high %v15878_v35, %v15878_v35  ;;  %v8804_v4 = vcombine.low %v4608_v2, %v4622_v42  ;;  %v13887_v31 = vcombine.high %v4608_v2, %v4622_v42 }
 0x1b8   : > { %v6616_v59 = vrot.slane %v6608_v38, %v15414_v9  ;;  %v6638_v5 = vrot.slane %v20304_v23, %v15414_v9  ;;  %v1854_v38 = vrot.slane %v1840_v63, %v15414_v9  ;;  %v8806_v48 = vcombine.low %v4615_v45, %v4629_v55 }
 0x1b9   : > { %v13888_v51 = vcombine.high %v4615_v45, %v4629_v55  ;;  %v1855_v29 = vcombine.high %v1847_v26, %v1847_v26  ;;  %v1863_v22 = vrot.slane %v1847_v26, %v15414_v9  ;;  %v16569_v37 = vrot.slane %v8804_v4, %v15414_v9 }
 0x1ba   : > { %v6624_v41 = vcombine.low %v6616_v59, %v6623_v7  ;;  %v1856_v49 = vcombine.high %v1854_v38, %v1854_v38  ;;  %v16573_v46 = vrot.slane %v1854_v38, %v15414_v9  ;;  %v1798_v2 = vrot.slane %v15878_v35, %v15414_v9 }
 0x1bb   : > { %v16580_v45 = vrot.slane %v13888_v51, %v15414_v9  ;;  %v1877_v42 = vrot.slane %v1855_v29, %v15414_v9  ;;  %v1805_v59 = vrot.slane %v1791_v21, %v15414_v9  ;;  %v16588_v63 = vrot.slane %v13887_v31, %v15414_v9 }
 0x1bc   : > { %14460 = vmatprep.mubr.msk.f32.mxu1 %vm268_vm0, %v6624_v41  ;;  %v16585_v41 = vpop.f32.mrb[25].mxu0  ;;  %v16591_v55 = vrot.slane %v8806_v48, %v15414_v9  ;;  %v16596_v51 = vrot.slane %v1856_v49, %v15414_v9  ;;  %v1886_v29 = vcombine.high %v16573_v46, %v16573_v46  ;;  %v1806_v4 = vcombine.high %v1798_v2, %v1798_v2 }
 0x1bd   : > { %14461 = vmatmul.mubr.msk.f32.gmra.mrb[52].mxu1 %vm268_vm0, %v6638_v5  ;;  %v7847_v5 = vcombine.low %v1863_v22, %v1877_v42  ;;  %v13855_v26 = vcombine.high %v1863_v22, %v1877_v42  ;;  %v1807_v48 = vcombine.high %v1805_v59, %v1805_v59  ;;  %v1814_v31 = vrot.slane %v1798_v2, %v15414_v9 }
 0x1be   : > { %v1821_v7 = vrot.slane %v1805_v59, %v15414_v9  ;;  %v6934_v23 = vcombine.low %v16107_v14, %v16044_v54  ;;  %v1828_v22 = vrot.slane %v1806_v4, %v15414_v9  ;;  %v20305_v21 = vcombine.low %v16088_v17, %v16093_v25 }
 0x1bf   : > { %v16606_v38 = vrot.slane %v7847_v5, %v15414_v9  ;;  %v16609_v49 = vrot.slane %v13855_v26, %v15414_v9  ;;  %v1835_v42 = vrot.slane %v1807_v48, %v15414_v9  ;;  %v4732_v5 = vcombine.high %v15907_v47, %v15907_v47 }
 0x1c0   : > { %v6941_v2 = vrot.slane %v20305_v21, %v15414_v9  ;;  %v16625_v59 = vcombine.low %v16596_v51, %v1886_v29  ;;  %v6948_v54 = vrot.slane %v6934_v23, %v15414_v9  ;;  %v4739_v14 = vrot.slane %v15907_v47, %v15414_v9 }
 0x1c1   : > { %v7798_v48 = vcombine.low %v1814_v31, %v1828_v22  ;;  %v13853_v17 = vcombine.high %v1814_v31, %v1828_v22  ;;  %v7623_v25 = vrot.slane %v15894_v62, %v15414_v9  ;;  %v4746_v35 = vrot.slane %v4732_v5, %v15414_v9 }
 0x1c2   : > { %v6949_v21 = vcombine.low %v6941_v2, %v6948_v54  ;;  %v4747_v26 = vcombine.high %v4739_v14, %v4739_v14  ;;  %v16636_v29 = vrot.slane %v4739_v14, %v15414_v9  ;;  %v7845_v47 = vcombine.low %v1821_v7, %v1835_v42 }
 0x1c3   : > { %v7820_v23 = vrot.slane %v7798_v48, %v15414_v9  ;;  %v7827_v36 = vrot.slane %v13853_v17, %v15414_v9  ;;  %v13854_v60 = vcombine.high %v1821_v7, %v1835_v42  ;;  %v4748_v4 = vcombine.high %v4746_v35, %v4746_v35 }
 0x1c4   : > { %14471 = vmatprep.mubr.msk.f32.mxu0 %vm268_vm0, %v6949_v21  ;;  %v4762_v31 = vrot.slane %v4746_v35, %v15414_v9  ;;  %v4769_v62 = vrot.slane %v4747_v26, %v15414_v9  ;;  %v4777_v22 = vcombine.high %v16636_v29, %v16636_v29  ;;  %v20306_v5 = vcombine.low %v16077_v58, %v16236_v11 }
 0x1c5   : > { %v7829_v2 = vcombine.low %v7820_v23, %v7827_v36  ;;  %v7630_v54 = vrot.slane %v16059_v1, %v15414_v9  ;;  %v7645_v7 = vrot.slane %v16062_v43, %v15414_v9  ;;  %v20307_v35 = vcombine.low %v16065_v13, %v16070_v52 }
 0x1c6   : > { %14472 = vmatmul.mubr.msk.f32.vlgmr.msra.gmra.mrb[54].mxu0 %vm268_vm0, %v20306_v5  ;;  %v16658_v26 = vrot.slane %v4748_v4, %v15414_v9  ;;  %v4778_v36 = vcombine.high %v4762_v31, %v4762_v31  ;;  %v4779_v14 = vcombine.high %v4769_v62, %v4769_v62  ;;  %v16660_v48 = vcombine.low %v4769_v62, %v4777_v22  ;;  %v16673_v4 = vpop.f32.mrb[32].mxu1 }
 0x1c7   : > { %v7948_v42 = vrot.slane %v20307_v35, %v15414_v9  ;;  %v16663_v58 = vrot.slane %v7829_v2, %v15414_v9  ;;  %v7631_v11 = vcombine.low %v7623_v25, %v7630_v54  ;;  %v20308_v1 = vcombine.low %v15993_v0, %v15996_v34  ;;  %v16688_v22 = vpop.f32.mrb[33].mxu1 }
 0x1c8   : > { %v20309_v13 = vcombine.low %v15999_v57, %v16002_v28  ;;  %v16676_v17 = vrot.slane %v7845_v47, %v15414_v9  ;;  %v9228_v21 = vcombine.low %v4779_v14, %v4762_v31  ;;  %v9229_v23 = vcombine.low %v16658_v26, %v4778_v36  ;;  %20311 = vst [vmem:[#allocation19_spill] sm:$0xff] %v16688_v22 }
 0x1c9   : > { %v7955_v43 = vrot.slane %v20308_v1, %v15414_v9  ;;  %v20310_v25 = vcombine.low %v16148_v19, %v16151_v40  ;;  %v16686_v34 = vrot.slane %v13854_v60, %v15414_v9  ;;  %v14725_v57 = vpack.c.bf16 %v7645_v7, %v7631_v11  ;;  %v16713_v1 = vpop.f32.mrb[26].mxu0 }
 0x1ca   : > { %v7997_v52 = vrot.slane %v20309_v13, %v15414_v9  ;;  %v4682_v2 = vcombine.high %v16510_v16, %v16510_v16  ;;  %v4683_v19 = vcombine.high %v15961_v6, %v15961_v6  ;;  %v9250_v40 = vrot.slane %v9228_v21, %v15414_v9  ;;  %20312 = vst [vmem:[#allocation20_spill] sm:$0xff] %v16713_v1 }
 0x1cb   : > { %v8004_v62 = vrot.slane %v20310_v25, %v15414_v9  ;;  %v7956_v28 = vcombine.low %v7948_v42, %v7955_v43  ;;  %14727 = vmatprep.subr.msk.bf16.mxu1 %vm15827_vm1, %v14725_v57  ;;  %v4690_v60 = vrot.slane %v15961_v6, %v15414_v9  ;;  %v1938_v5 = vcombine.high %v15984_v12, %v15984_v12 }
 0x1cc   : > { %v1945_v54 = vrot.slane %v15984_v12, %v15414_v9  ;;  %v9257_v7 = vrot.slane %v9229_v23, %v15414_v9  ;;  %v4697_v35 = vrot.slane %v4683_v19, %v15414_v9  ;;  %14730 = vmatpush3.bf16.xpose.msk.msra.mxu1 %vm15827_vm1, %v14725_v57  ;;  %v1888_v42 = vcombine.high %v16596_v51, %v16596_v51 }
 0x1cd   : > { %v8005_v31 = vcombine.low %v7997_v52, %v8004_v62  ;;  %v4698_v36 = vcombine.high %v4690_v60, %v4690_v60  ;;  %v4706_v6 = vrot.slane %v4690_v60, %v15414_v9  ;;  %v1952_v14 = vrot.slane %v1938_v5, %v15414_v9  ;;  %v20313_v52 = vld [vmem:[#allocation32_spill] sm:$0xff] }
 0x1ce   : > { %v1953_v11 = vcombine.high %v1945_v54, %v1945_v54  ;;  %v4699_v12 = vcombine.high %v4697_v35, %v4697_v35  ;;  %v4713_v43 = vrot.slane %v4697_v35, %v15414_v9  ;;  %v1961_v13 = vrot.slane %v1945_v54, %v15414_v9 }
 0x1cf   : > { %v14731_v16 = vpack.c.bf16 %v8005_v31, %v7956_v28  ;;  %v1889_v21 = vcombine.high %v20313_v52, %v20313_v52  ;;  %v4720_v51 = vrot.slane %v4698_v36, %v15414_v9  ;;  %v4728_v23 = vcombine.high %v4706_v6, %v4706_v6 }
 0x1d0   : > { %v9177_v25 = vcombine.low %v4682_v2, %v4706_v6  ;;  %v1954_v62 = vcombine.high %v1952_v14, %v1952_v14  ;;  %v4727_v57 = vrot.slane %v4699_v12, %v15414_v9  ;;  %v4729_v28 = vcombine.high %v4713_v43, %v4713_v43 }
 0x1d1   : > { %14733 = vmatprep.subr.msk.bf16.mxu0 %vm15827_vm1, %v14731_v16  ;;  %v1968_v31 = vrot.slane %v1952_v14, %v15414_v9  ;;  %v1975_v19 = vrot.slane %v1953_v11, %v15414_v9  ;;  %v4730_v60 = vcombine.high %v4720_v51, %v4720_v51  ;;  %v9178_v5 = vcombine.low %v4720_v51, %v4728_v23 }
 0x1d2   : > { %14736 = vmatpush3.bf16.xpose.msk.msra.mxu0 %vm15827_vm1, %v14731_v16  ;;  %v9187_v54 = vrot.slane %v9177_v25, %v15414_v9  ;;  %v1896_v35 = vrot.slane %v20313_v52, %v15414_v9  ;;  %v4731_v36 = vcombine.high %v4727_v57, %v4727_v57  ;;  %v9180_v2 = vcombine.low %v4727_v57, %v4729_v28  ;;  %v16740_v52 = vpop.f32.mrb[27].mxu0 }
 0x1d3   : > { %v1983_v6 = vcombine.high %v1961_v13, %v1961_v13  ;;  %v1984_v47 = vcombine.high %v1968_v31, %v1968_v31  ;;  %v9179_v16 = vcombine.low %v4730_v60, %v4713_v43  ;;  %v9194_v0 = vrot.slane %v9178_v5, %v15414_v9  ;;  %20314 = vst [vmem:[#allocation31_spill] sm:$0xff] %v16740_v52 }
 0x1d4   : > { %v1985_v12 = vcombine.high %v1975_v19, %v1975_v19  ;;  %v1903_v1 = vrot.slane %v1889_v21, %v15414_v9  ;;  %v16732_v14 = vcombine.low %v9250_v40, %v9257_v7  ;;  %v16735_v11 = vcombine.low %v4731_v36, %v16636_v29  ;;  %v16750_v21 = vpop.f32.mrb[34].mxu1 }
 0x1d5   : > { %v16738_v51 = vrot.slane %v1954_v62, %v15414_v9  ;;  %v8221_v23 = vcombine.low %v1975_v19, %v1983_v6  ;;  %v9208_v25 = vrot.slane %v9180_v2, %v15414_v9  ;;  %v16743_v57 = vcombine.low %v9187_v54, %v9194_v0  ;;  %20315 = vst [vmem:[#allocation32_spill] sm:$0xff] %v16750_v21 }
 0x1d6   : > { %v8222_v43 = vcombine.low %v1985_v12, %v1968_v31  ;;  %v1904_v28 = vcombine.high %v1896_v35, %v1896_v35  ;;  %v1905_v7 = vcombine.high %v1903_v1, %v1903_v1  ;;  %v1912_v29 = vrot.slane %v1896_v35, %v15414_v9  ;;  %v20316_v12 = vld [vmem:[#allocation42_spill] sm:$0xff] }
 0x1d7   : > { %v8243_v60 = vrot.slane %v8221_v23, %v15414_v9  ;;  %v16747_v40 = vcombine.low %v16738_v51, %v1984_v47  ;;  %v9201_v62 = vrot.slane %v9179_v16, %v15414_v9  ;;  %v1919_v5 = vrot.slane %v1903_v1, %v15414_v9  ;;  %v20317_v23 = vld [vmem:[#allocation11_spill] sm:$0xff] }
 0x1d8   : > { %v8250_v19 = vrot.slane %v8222_v43, %v15414_v9  ;;  %v1926_v0 = vrot.slane %v1904_v28, %v15414_v9  ;;  %v1933_v31 = vrot.slane %v1905_v7, %v15414_v9  ;;  %v1934_v54 = vcombine.high %v1912_v29, %v1912_v29 }
 0x1d9   : > { %v8171_v36 = vcombine.low %v1888_v42, %v1912_v29  ;;  %v8180_v47 = vrot.slane %v16625_v59, %v15414_v9  ;;  %v1935_v35 = vcombine.high %v1919_v5, %v1919_v5  ;;  %v7032_v16 = vcombine.low %v20317_v23, %v20316_v12  ;;  %v16822_v12 = vpop.f32.mrb[35].mxu1 }
 0x1da   : > { %v16759_v2 = vcombine.low %v8243_v60, %v8250_v19  ;;  %v1936_v6 = vcombine.high %v1926_v0, %v1926_v0  ;;  %v1937_v1 = vcombine.high %v1933_v31, %v1933_v31  ;;  %v20318_v42 = vcombine.low %v16219_v10, %v16229_v8  ;;  %v20319_v10 = vld [vmem:[#allocation4_spill] sm:$0xff]  ;;  %20327 = vst [vmem:[#allocation11_spill] sm:$0xff] %v16822_v12 }
 0x1db   : > { %v8187_v28 = vrot.slane %v8171_v36, %v15414_v9  ;;  %v16770_v29 = vcombine.low %v9201_v62, %v9208_v25  ;;  %v16772_v59 = vcombine.low %v1926_v0, %v1934_v54  ;;  %v8219_v60 = vcombine.low %v1933_v31, %v1935_v35  ;;  %v20320_v25 = vld [vmem:[#allocation33_spill] sm:$0xff]  ;;  %v20321_v54 = vld [vmem:[#allocation14_spill] sm:$0xff] }
 0x1dc   : > { %v7039_v7 = vrot.slane %v20318_v42, %v15414_v9  ;;  %v7046_v19 = vrot.slane %v7032_v16, %v15414_v9  ;;  %v16777_v23 = vcombine.low %v1936_v6, %v1919_v5  ;;  %v8220_v36 = vcombine.low %v1937_v1, %v1961_v13 }
 0x1dd   : > { %v16779_v43 = vcombine.low %v8180_v47, %v8187_v28  ;;  %v8229_v21 = vrot.slane %v8219_v60, %v15414_v9  ;;  %v7061_v8 = vrot.slane %v20319_v10, %v15414_v9  ;;  %v2036_v62 = vcombine.high %v20320_v25, %v20320_v25  ;;  %v20323_v47 = vld [vmem:[#allocation41_spill] sm:$0xff]  ;;  %v20325_v28 = vld [vmem:[#allocation35_spill] sm:$0xff] }
 0x1de   : > { %v7047_v52 = vcombine.low %v7039_v7, %v7046_v19  ;;  %v8236_v0 = vrot.slane %v8220_v36, %v15414_v9  ;;  %v2043_v31 = vrot.slane %v20320_v25, %v15414_v9  ;;  %v20322_v5 = vrot.slane %v20321_v54, %v15414_v9 }
 0x1df   : > { %v20324_v13 = vrot.slane %v20323_v47, %v15414_v9  ;;  %v7371_v6 = vrot.slane %v16373_v50, %v15414_v9  ;;  %v2050_v16 = vrot.slane %v2036_v62, %v15414_v9  ;;  %v1986_v1 = vcombine.high %v16738_v51, %v16738_v51 }
 0x1e0   : > { %14474 = vmatprep.mubr.msk.f32.mxu0 %vm268_vm0, %v7047_v52  ;;  %v1987_v42 = vcombine.high %v20325_v28, %v20325_v28  ;;  %v1994_v7 = vrot.slane %v20325_v28, %v15414_v9  ;;  %v16805_v60 = vcombine.low %v8229_v21, %v8236_v0  ;;  %v2051_v19 = vcombine.high %v2043_v31, %v2043_v31 }
 0x1e1   : > { %v7356_v35 = vcombine.low %v20324_v13, %v20322_v5  ;;  %14475 = vmatmul.mubr.msk.f32.gmra.mrb[56].mxu0 %vm268_vm0, %v7061_v8  ;;  %v2059_v50 = vrot.slane %v2043_v31, %v15414_v9  ;;  %v2052_v36 = vcombine.high %v2050_v16, %v2050_v16  ;;  %v2066_v10 = vrot.slane %v2050_v16, %v15414_v9  ;;  %v16819_v13 = vpop.f32.mrb[28].mxu0 }
 0x1e2   : > { %v2001_v51 = vrot.slane %v1987_v42, %v15414_v9  ;;  %v2002_v25 = vcombine.high %v1994_v7, %v1994_v7  ;;  %v2073_v54 = vrot.slane %v2051_v19, %v15414_v9  ;;  %v2010_v0 = vrot.slane %v1994_v7, %v15414_v9  ;;  %20326 = vst [vmem:[#allocation42_spill] sm:$0xff] %v16819_v13 }
 0x1e3   : > { %v7364_v52 = vrot.slane %v7356_v35, %v15414_v9  ;;  %v2080_v8 = vrot.slane %v2052_v36, %v15414_v9 }
 0x1e4   : > { %v2003_v5 = vcombine.high %v2001_v51, %v2001_v51  ;;  %v2017_v31 = vrot.slane %v2001_v51, %v15414_v9  ;;  %v2024_v47 = vrot.slane %v2002_v25, %v15414_v9  ;;  %v8594_v35 = vcombine.low %v2059_v50, %v2073_v54 }
 0x1e5   : > { %v7372_v21 = vcombine.low %v7364_v52, %v7371_v6  ;;  %v13879_v16 = vcombine.high %v2059_v50, %v2073_v54  ;;  %v2032_v28 = vcombine.high %v2010_v0, %v2010_v0  ;;  %v8269_v42 = vcombine.low %v1986_v1, %v2010_v0 }
 0x1e6   : > { %v8596_v6 = vcombine.low %v2066_v10, %v2080_v8  ;;  %v13880_v19 = vcombine.high %v2066_v10, %v2080_v8  ;;  %v16825_v7 = vrot.slane %v2003_v5, %v15414_v9  ;;  %v2034_v52 = vcombine.high %v2024_v47, %v2024_v47  ;;  %v20334_v5 = vld [vmem:[#allocation34_spill] sm:$0xff] }
 0x1e7   : > { %14485 = vmatprep.mubr.msk.f32.mxu1 %vm268_vm0, %v7372_v21  ;;  %v16832_v50 = vrot.slane %v13879_v16, %v15414_v9  ;;  %v16834_v51 = vcombine.low %v2024_v47, %v2032_v28  ;;  %v8278_v1 = vrot.slane %v16747_v40, %v15414_v9  ;;  %v16841_v25 = vrot.slane %v8594_v35, %v15414_v9  ;;  %v16847_v21 = vpop.f32.mrb[29].mxu0  ;;  %v20340_v35 = vld [vmem:[#allocation38_spill] sm:$0xff] }
 0x1e8   : > { %20328 = vst [vmem:[#allocation4_spill] sm:$0xff] %v16825_v7  ;;  %14486 = vmatmul.mubr.msk.f32.vlgmr.msra.gmra.mrb[54].mxu1 %vm268_vm0, %v16424_v56  ;;  %v16844_v54 = vrot.slane %v8596_v6, %v15414_v9  ;;  %v8285_v56 = vrot.slane %v8269_v42, %v15414_v9  ;;  %20333 = vst [vmem:[#allocation45_spill] sm:$0xff] %v16847_v21  ;;  %v16850_v0 = vrot.slane %v13880_v19, %v15414_v9  ;;  %v20336_v42 = vld [vmem:[#allocation39_spill] sm:$0xff]  ;;  %v20337_v6 = vld [vmem:[#allocation40_spill] sm:$0xff] }
 0x1e9   : > { %20329 = vst [vmem:[#allocation33_spill] sm:$0xff] %v16832_v50  ;;  %20330 = vst [vmem:[#allocation14_spill] sm:$0xff] %v16834_v51  ;;  %v16852_v8 = vcombine.low %v2034_v52, %v2017_v31  ;;  %v4830_v40 = vcombine.high %v20334_v5, %v20334_v5  ;;  %v4837_v47 = vrot.slane %v20334_v5, %v15414_v9  ;;  %v20339_v21 = vld [vmem:[#allocation37_spill] sm:$0xff] }
 0x1ea   : > { %20331 = vst [vmem:[#allocation41_spill] sm:$0xff] %v16841_v25  ;;  %20332 = vst [vmem:[#allocation35_spill] sm:$0xff] %v16844_v54  ;;  %v16860_v16 = vcombine.low %v8278_v1, %v8285_v56  ;;  %v13878_v28 = vcombine.high %v2017_v31, %v16825_v7  ;;  %v20338_v19 = vcombine.low %v20336_v42, %v20337_v6  ;;  %v20342_v31 = vld [vmem:[#allocation36_spill] sm:$0xff]  ;;  %v20346_v50 = vld [vmem:[#allocation5_spill] sm:$0xff] }
 0x1eb   : > { %v4844_v62 = vrot.slane %v4830_v40, %v15414_v9  ;;  %v4845_v36 = vcombine.high %v4837_v47, %v4837_v47  ;;  %v4853_v5 = vrot.slane %v4837_v47, %v15414_v9  ;;  %v20341_v1 = vcombine.low %v20339_v21, %v20340_v35  ;;  %v20344_v42 = vld [vmem:[#allocation8_spill] sm:$0xff]  ;;  %v20348_v35 = vld [vmem:[#allocation7_spill] sm:$0xff]  ;;  %v20350_v7 = vld [vmem:[#allocation9_spill] sm:$0xff] }
 0x1ec   : > { %20335 = vst [vmem:[#allocation34_spill] sm:$0xff] %v16860_v16  ;;  %v8046_v10 = vrot.slane %v20338_v19, %v15414_v9  ;;  %v20343_v12 = vrot.slane %v20342_v31, %v15414_v9  ;;  %v8371_v6 = vrot.slane %v20344_v42, %v15414_v9  ;;  %v20345_v19 = vld [vmem:[#allocation30_spill] sm:$0xff]  ;;  %v20347_v21 = vrot.slane %v20346_v50, %v15414_v9 }
 0x1ed   : > { %v8053_v56 = vrot.slane %v20341_v1, %v15414_v9  ;;  %v8378_v52 = vrot.slane %v20345_v19, %v15414_v9  ;;  %v4846_v40 = vcombine.high %v4844_v62, %v4844_v62  ;;  %v4860_v54 = vrot.slane %v4844_v62, %v15414_v9 }
 0x1ee   : > { %v8068_v13 = vrot.slane %v20343_v12, %v15414_v9  ;;  %v4867_v47 = vrot.slane %v4845_v36, %v15414_v9  ;;  %v20349_v1 = vrot.slane %v20348_v35, %v15414_v9  ;;  %v8427_v19 = vrot.slane %v20350_v7, %v15414_v9  ;;  %v20351_v35 = vld [vmem:[#allocation2_spill] sm:$0xff] }
 0x1ef   : > { %v8054_v31 = vcombine.low %v8046_v10, %v8053_v56  ;;  %v8379_v42 = vcombine.low %v8371_v6, %v8378_v52  ;;  %v4874_v16 = vrot.slane %v4846_v40, %v15414_v9  ;;  %v16898_v50 = vrot.slane %v13878_v28, %v15414_v9  ;;  %v20352_v6 = vld [vmem:[#allocation43_spill] sm:$0xff] }
 0x1f0   : > { %v8412_v25 = vcombine.low %v20349_v1, %v20347_v21  ;;  %v9600_v62 = vcombine.low %v4853_v5, %v4867_v47  ;;  %v13912_v51 = vcombine.high %v4853_v5, %v4867_v47  ;;  %v4781_v21 = vcombine.high %v20351_v35, %v20351_v35 }
 0x1f1   : > { %v14737_v22 = vpack.c.bf16 %v8068_v13, %v8054_v31  ;;  %v4788_v10 = vrot.slane %v20351_v35, %v15414_v9  ;;  %v9602_v52 = vcombine.low %v4860_v54, %v4874_v16  ;;  %v13913_v56 = vcombine.high %v4860_v54, %v4874_v16 }
 0x1f2   : > { %v8420_v36 = vrot.slane %v8412_v25, %v15414_v9  ;;  %v4780_v7 = vcombine.high %v16658_v26, %v16658_v26  ;;  %v4928_v5 = vcombine.high %v20352_v6, %v20352_v6  ;;  %v4795_v13 = vrot.slane %v4781_v21, %v15414_v9 }
 0x1f3   : > { %14739 = vmatprep.subr.msk.bf16.mxu0 %vm15827_vm1, %v14737_v22  ;;  %v4796_v28 = vcombine.high %v4788_v10, %v4788_v10  ;;  %v4804_v40 = vrot.slane %v4788_v10, %v15414_v9  ;;  %v16913_v47 = vrot.slane %v9600_v62, %v15414_v9  ;;  %v16916_v54 = vrot.slane %v13912_v51, %v15414_v9  ;;  %v16927_v62 = vpop.f32.mrb[36].mxu1 }
 0x1f4   : > { %v8428_v25 = vcombine.low %v8420_v36, %v8427_v19  ;;  %v16919_v26 = vrot.slane %v9602_v52, %v15414_v9  ;;  %14742 = vmatpush3.bf16.xpose.msk.msra.mxu0 %vm15827_vm1, %v14737_v22  ;;  %v4935_v16 = vrot.slane %v20352_v6, %v15414_v9  ;;  %v4797_v31 = vcombine.high %v4795_v13, %v4795_v13  ;;  %v16946_v12 = vpop.f32.mrb[37].mxu1 }
 0x1f5   : > { %20353 = vst [vmem:[#allocation39_spill] sm:$0xff] %v16913_v47  ;;  %20354 = vst [vmem:[#allocation40_spill] sm:$0xff] %v16916_v54  ;;  %v4811_v19 = vrot.slane %v4795_v13, %v15414_v9  ;;  %v4818_v36 = vrot.slane %v4796_v28, %v15414_v9  ;;  %v16930_v51 = vrot.slane %v13913_v56, %v15414_v9 }
 0x1f6   : > { %v14743_v1 = vpack.c.bf16 %v8428_v25, %v8379_v42  ;;  %20355 = vst [vmem:[#allocation37_spill] sm:$0xff] %v16927_v62  ;;  %v4826_v35 = vcombine.high %v4804_v40, %v4804_v40  ;;  %v9275_v21 = vcombine.low %v4780_v7, %v4804_v40  ;;  %v4942_v10 = vrot.slane %v4928_v5, %v15414_v9 }
 0x1f7   : > { %v16936_v22 = vrot.slane %v4797_v31, %v15414_v9  ;;  %v4827_v42 = vcombine.high %v4811_v19, %v4811_v19  ;;  %v4828_v52 = vcombine.high %v4818_v36, %v4818_v36  ;;  %v4943_v6 = vcombine.high %v4935_v16, %v4935_v16  ;;  %20356 = vst [vmem:[#allocation38_spill] sm:$0xff] %v16946_v12 }
 0x1f8   : > { %14745 = vmatprep.subr.msk.bf16.mxu1 %vm15827_vm1, %v14743_v1  ;;  %v9276_v25 = vcombine.low %v4818_v36, %v4826_v35  ;;  %v9285_v13 = vrot.slane %v9275_v21, %v15414_v9  ;;  %v4944_v56 = vcombine.high %v4942_v10, %v4942_v10  ;;  %v4951_v7 = vrot.slane %v4935_v16, %v15414_v9 }
 0x1f9   : > { %14748 = vmatpush3.bf16.xpose.msk.msra.mxu1 %vm15827_vm1, %v14743_v1  ;;  %v9277_v28 = vcombine.low %v4828_v52, %v4811_v19  ;;  %v9278_v40 = vcombine.low %v16936_v22, %v4827_v42  ;;  %v4958_v31 = vrot.slane %v4942_v10, %v15414_v9  ;;  %v4965_v35 = vrot.slane %v4943_v6, %v15414_v9  ;;  %v20357_v1 = vld [vmem:[#allocation44_spill] sm:$0xff]  ;;  %v16963_v6 = vpop.f32.mrb[30].mxu0 }
 0x1fa   : > { %v9292_v36 = vrot.slane %v9276_v25, %v15414_v9  ;;  %v4972_v21 = vrot.slane %v4944_v56, %v15414_v9  ;;  %v4879_v62 = vcombine.high %v20357_v1, %v20357_v1  ;;  %v4886_v19 = vrot.slane %v20357_v1, %v15414_v9  ;;  %20360 = vst [vmem:[#allocation36_spill] sm:$0xff] %v16963_v6 }
 0x1fb   : > { %v9299_v16 = vrot.slane %v9277_v28, %v15414_v9  ;;  %v9306_v5 = vrot.slane %v9278_v40, %v15414_v9  ;;  %v20358_v10 = vrot.slane %v16329_v39, %v15414_v9  ;;  %v20359_v42 = vrot.slane %v16347_v24, %v15414_v9  ;;  %v16967_v28 = vpop.f32.mrb[31].mxu0 }
 0x1fc   : > { %v16965_v25 = vcombine.low %v9285_v13, %v9292_v36  ;;  %v9698_v56 = vcombine.low %v4951_v7, %v4965_v35  ;;  %v13916_v12 = vcombine.high %v4951_v7, %v4965_v35  ;;  %v9700_v54 = vcombine.low %v4958_v31, %v4972_v21  ;;  %20361 = vst [vmem:[#allocation8_spill] sm:$0xff] %v16967_v28 }
 0x1fd   : > { %v7454_v52 = vcombine.low %v20359_v42, %v20358_v10  ;;  %v13917_v1 = vcombine.high %v4958_v31, %v4972_v21  ;;  %v4893_v47 = vrot.slane %v4879_v62, %v15414_v9  ;;  %v4894_v39 = vcombine.high %v4886_v19, %v4886_v19 }
 0x1fe   : > { %v16974_v10 = vcombine.low %v9299_v16, %v9306_v5  ;;  %v16977_v13 = vrot.slane %v9698_v56, %v15414_v9  ;;  %v4902_v7 = vrot.slane %v4886_v19, %v15414_v9  ;;  %v16981_v36 = vrot.slane %v13916_v12, %v15414_v9  ;;  %v20365_v16 = vld [vmem:[#allocation13_spill] sm:$0xff] }
 0x1ff   : > { %v4895_v35 = vcombine.high %v4893_v47, %v4893_v47  ;;  %v4909_v42 = vrot.slane %v4893_v47, %v15414_v9  ;;  %v4916_v31 = vrot.slane %v4894_v39, %v15414_v9  ;;  %v16986_v62 = vrot.slane %v9700_v54, %v15414_v9 }
 0x200   : > { %20362 = vst [vmem:[#allocation30_spill] sm:$0xff] %v16977_v13  ;;  %20363 = vst [vmem:[#allocation5_spill] sm:$0xff] %v16981_v36  ;;  %v7462_v21 = vrot.slane %v7454_v52, %v15414_v9  ;;  %v7469_v5 = vrot.slane %v16525_v44, %v15414_v9  ;;  %v2134_v56 = vcombine.high %v20365_v16, %v20365_v16 }
 0x201   : > { %20364 = vst [vmem:[#allocation7_spill] sm:$0xff] %v16986_v62  ;;  %v16994_v19 = vrot.slane %v13917_v1, %v15414_v9  ;;  %v4923_v12 = vrot.slane %v4895_v35, %v15414_v9  ;;  %v9649_v40 = vcombine.low %v4902_v7, %v4916_v31  ;;  %v13914_v47 = vcombine.high %v4902_v7, %v4916_v31 }
 0x202   : > { %v7470_v24 = vcombine.low %v7462_v21, %v7469_v5  ;;  %v2141_v54 = vrot.slane %v20365_v16, %v15414_v9  ;;  %v2148_v39 = vrot.slane %v2134_v56, %v15414_v9  ;;  %v20367_v44 = vcombine.high %v16498_v61, %v16498_v61 }
 0x203   : > { %20366 = vst [vmem:[#allocation9_spill] sm:$0xff] %v16994_v19  ;;  %v9651_v28 = vcombine.low %v4909_v42, %v4923_v12  ;;  %v13915_v6 = vcombine.high %v4909_v42, %v4923_v12  ;;  %v17005_v1 = vrot.slane %v9649_v40, %v15414_v9  ;;  %v17008_v35 = vrot.slane %v13914_v47, %v15414_v9  ;;  %v20369_v47 = vld [vmem:[#allocation12_spill] sm:$0xff] }
 0x204   : > { %v7477_v52 = vrot.slane %v20367_v44, %v15414_v9  ;;  %14488 = vmatprep.mubr.msk.f32.mxu1 %vm268_vm0, %v7470_v24  ;;  %v2149_v7 = vcombine.high %v2141_v54, %v2141_v54  ;;  %v2150_v31 = vcombine.high %v2148_v39, %v2148_v39  ;;  %v2157_v21 = vrot.slane %v2141_v54, %v15414_v9 }
 0x205   : > { %v17013_v5 = vrot.slane %v2148_v39, %v15414_v9  ;;  %v17020_v40 = vrot.slane %v9651_v28, %v15414_v9  ;;  %v17024_v24 = vrot.slane %v13915_v6, %v15414_v9  ;;  %v2085_v54 = vcombine.high %v20369_v47, %v20369_v47 }
 0x206   : > { %v7484_v16 = vrot.slane %v7477_v52, %v15414_v9  ;;  %v2171_v56 = vrot.slane %v2149_v7, %v15414_v9  ;;  %v17028_v12 = vrot.slane %v2150_v31, %v15414_v9  ;;  %v2092_v28 = vrot.slane %v20369_v47, %v15414_v9 }
 0x207   : > { %20368 = vst [vmem:[#allocation2_spill] sm:$0xff] %v17013_v5  ;;  %v7779_v6 = vcombine.low %v16522_v15, %v16528_v30  ;;  %v20370_v44 = vcombine.low %v16455_v20, %v16458_v53  ;;  %v20371_v15 = vld [vmem:[#allocation29_spill] sm:$0xff] }
 0x208   : > { %14489 = vmatmul.mubr.msk.f32.gmra.mrb[56].mxu1 %vm268_vm0, %v7484_v16  ;;  %v13883_v31 = vcombine.high %v2157_v21, %v2171_v56  ;;  %v8694_v42 = vcombine.low %v17013_v5, %v17028_v12  ;;  %v2099_v16 = vrot.slane %v2085_v54, %v15414_v9  ;;  %v2100_v61 = vcombine.high %v2092_v28, %v2092_v28 }
 0x209   : > { %v7794_v52 = vrot.slane %v20370_v44, %v15414_v9  ;;  %v2108_v47 = vrot.slane %v2092_v28, %v15414_v9  ;;  %v7787_v39 = vrot.slane %v7779_v6, %v15414_v9  ;;  %v5026_v30 = vcombine.high %v20371_v15, %v20371_v15 }
 0x20a   : > { %v8692_v53 = vcombine.low %v2157_v21, %v2171_v56  ;;  %v17055_v44 = vrot.slane %v13883_v31, %v15414_v9  ;;  %v2101_v7 = vcombine.high %v2099_v16, %v2099_v16  ;;  %v2115_v19 = vrot.slane %v2099_v16, %v15414_v9 }
 0x20b   : > { %v2122_v54 = vrot.slane %v2100_v61, %v15414_v9  ;;  %v7795_v62 = vcombine.low %v7787_v39, %v7794_v52  ;;  %v5033_v28 = vrot.slane %v20371_v15, %v15414_v9  ;;  %v17062_v6 = vrot.slane %v8694_v42, %v15414_v9 }
 0x20c   : > { %20372 = vst [vmem:[#allocation43_spill] sm:$0xff] %v17055_v44  ;;  %v2129_v36 = vrot.slane %v2101_v7, %v15414_v9  ;;  %v5040_v20 = vrot.slane %v5026_v30, %v15414_v9  ;;  %v8469_v21 = vrot.slane %v16465_v32, %v15414_v9  ;;  %v20374_v7 = vcombine.low %v16504_v33, %v16663_v58 }
 0x20d   : > { %20373 = vst [vmem:[#allocation44_spill] sm:$0xff] %v17062_v6  ;;  %v8643_v56 = vcombine.low %v2108_v47, %v2122_v54  ;;  %v13881_v31 = vcombine.high %v2108_v47, %v2122_v54  ;;  %14499 = vmatprep.mubr.msk.f32.mxu0 %vm268_vm0, %v7795_v62  ;;  %v5041_v16 = vcombine.high %v5033_v28, %v5033_v28 }
 0x20e   : > { %v17070_v61 = vrot.slane %v5033_v28, %v15414_v9  ;;  %v8645_v39 = vcombine.low %v2115_v19, %v2129_v36  ;;  %v13882_v52 = vcombine.high %v2115_v19, %v2129_v36  ;;  %v5042_v15 = vcombine.high %v5040_v20, %v5040_v20  ;;  %14500 = vmatmul.mubr.msk.f32.vlgmr.msra.gmra.mrb[58].mxu0 %vm268_vm0, %v20374_v7 }
 0x20f   : > { %v5056_v42 = vrot.slane %v5040_v20, %v15414_v9  ;;  %v8659_v32 = vrot.slane %v8643_v56, %v15414_v9  ;;  %v8666_v47 = vrot.slane %v13881_v31, %v15414_v9  ;;  %v5063_v62 = vrot.slane %v5041_v16, %v15414_v9  ;;  %v20376_v56 = vld [vmem:[#allocation24_spill] sm:$0xff] }
 0x210   : > { %v5071_v30 = vcombine.high %v17070_v61, %v17070_v61  ;;  %v17083_v54 = vrot.slane %v8692_v53, %v15414_v9  ;;  %v8673_v19 = vrot.slane %v8645_v39, %v15414_v9  ;;  %v17089_v33 = vrot.slane %v13882_v52, %v15414_v9  ;;  %v20377_v53 = vld [vmem:[#allocation26_spill] sm:$0xff]  ;;  %v20379_v39 = vld [vmem:[#allocation28_spill] sm:$0xff]  ;;  %v20380_v52 = vld [vmem:[#allocation17_spill] sm:$0xff] }
 0x211   : > { %v8674_v58 = vcombine.low %v16850_v0, %v8659_v32  ;;  %v5072_v20 = vcombine.high %v5056_v42, %v5056_v42  ;;  %v5073_v28 = vcombine.high %v5063_v62, %v5063_v62  ;;  %v8476_v31 = vrot.slane %v20376_v56, %v15414_v9 }
 0x212   : > { %20375 = vst [vmem:[#allocation13_spill] sm:$0xff] %v17089_v33  ;;  %v8675_v16 = vcombine.low %v8666_v47, %v8673_v19  ;;  %v17095_v7 = vrot.slane %v5042_v15, %v15414_v9  ;;  %v20378_v36 = vrot.slane %v20377_v53, %v15414_v9  ;;  %v20381_v5 = vcombine.low %v20379_v39, %v20380_v52  ;;  %v17108_v47 = vpop.f32.mrb[38].mxu1  ;;  %v20383_v19 = vld [vmem:[#allocation6_spill] sm:$0xff]  ;;  %v20384_v53 = vld [vmem:[#allocation25_spill] sm:$0xff] }
 0x213   : > { %v17106_v0 = vrot.slane %v8674_v58, %v15414_v9  ;;  %v10072_v32 = vcombine.low %v5063_v62, %v5071_v30  ;;  %v10073_v44 = vcombine.low %v5073_v28, %v5056_v42  ;;  %v8477_v56 = vcombine.low %v8469_v21, %v8476_v31  ;;  %20382 = vst [vmem:[#allocation12_spill] sm:$0xff] %v17108_v47  ;;  %v17125_v62 = vpop.f32.mrb[39].mxu1  ;;  %v17127_v30 = vpop.f32.mrb[32].mxu0  ;;  %v20390_v31 = vld [vmem:[#allocation3_spill] sm:$0xff] }
 0x214   : > { %v8491_v13 = vrot.slane %v20378_v36, %v15414_v9  ;;  %v8794_v6 = vrot.slane %v20381_v5, %v15414_v9  ;;  %v17111_v15 = vrot.slane %v8675_v16, %v15414_v9  ;;  %v20385_v36 = vcombine.low %v20383_v19, %v20384_v53  ;;  %20388 = vst [vmem:[#allocation29_spill] sm:$0xff] %v17125_v62 }
 0x215   : > { %v20386_v5 = vcombine.low %v16415_v27, %v16569_v37  ;;  %v20387_v42 = vcombine.low %v16588_v63, %v16591_v55  ;;  %20389 = vst [vmem:[#allocation24_spill] sm:$0xff] %v17127_v30  ;;  %v17130_v58 = vcombine.low %v17095_v7, %v5072_v20  ;;  %v4977_v16 = vcombine.high %v20390_v31, %v20390_v31  ;;  %v20391_v55 = vld [vmem:[#allocation23_spill] sm:$0xff] }
 0x216   : > { %v8801_v33 = vrot.slane %v20385_v36, %v15414_v9  ;;  %v14749_v28 = vpack.c.bf16 %v8491_v13, %v8477_v56  ;;  %v4984_v27 = vrot.slane %v20390_v31, %v15414_v9  ;;  %v2232_v19 = vcombine.high %v20391_v55, %v20391_v55  ;;  %v17153_v31 = vpop.f32.mrb[33].mxu0 }
 0x217   : > { %v8843_v39 = vrot.slane %v20386_v5, %v15414_v9  ;;  %v8850_v21 = vrot.slane %v20387_v42, %v15414_v9  ;;  %v10082_v53 = vrot.slane %v10072_v32, %v15414_v9  ;;  %v4991_v13 = vrot.slane %v4977_v16, %v15414_v9  ;;  %20392 = vst [vmem:[#allocation26_spill] sm:$0xff] %v17153_v31 }
 0x218   : > { %v8802_v52 = vcombine.low %v8794_v6, %v8801_v33  ;;  %14751 = vmatprep.subr.msk.bf16.mxu1 %vm15827_vm1, %v14749_v28  ;;  %v4992_v20 = vcombine.high %v4984_v27, %v4984_v27  ;;  %v5000_v56 = vrot.slane %v4984_v27, %v15414_v9  ;;  %v10089_v36 = vrot.slane %v10073_v44, %v15414_v9 }
 0x219   : > { %v8851_v63 = vcombine.low %v8843_v39, %v8850_v21  ;;  %14754 = vmatpush3.bf16.xpose.msk.msra.mxu1 %vm15827_vm1, %v14749_v28  ;;  %v2239_v6 = vrot.slane %v20391_v55, %v15414_v9  ;;  %v2246_v33 = vrot.slane %v2232_v19, %v15414_v9  ;;  %v4993_v32 = vcombine.high %v4991_v13, %v4991_v13 }
 0x21a   : > { %v5007_v39 = vrot.slane %v4991_v13, %v15414_v9  ;;  %v5014_v42 = vrot.slane %v4992_v20, %v15414_v9  ;;  %v5022_v21 = vcombine.high %v5000_v56, %v5000_v56  ;;  %v9753_v44 = vrot.slane %v5000_v56, %v15414_v9 }
 0x21b   : > { %v14755_v5 = vpack.c.bf16 %v8851_v63, %v8802_v52  ;;  %v2247_v16 = vcombine.high %v2239_v6, %v2239_v6  ;;  %v2248_v28 = vcombine.high %v2246_v33, %v2246_v33  ;;  %v2255_v27 = vrot.slane %v2239_v6, %v15414_v9 }
 0x21c   : > { %v5021_v52 = vrot.slane %v4993_v32, %v15414_v9  ;;  %v5023_v63 = vcombine.high %v5007_v39, %v5007_v39  ;;  %v5024_v55 = vcombine.high %v5014_v42, %v5014_v42  ;;  %v10023_v19 = vcombine.low %v5014_v42, %v5022_v21 }
 0x21d   : > { %14757 = vmatprep.subr.msk.bf16.mxu0 %vm15827_vm1, %v14755_v5  ;;  %v17162_v13 = vcombine.low %v10082_v53, %v10089_v36  ;;  %v2262_v20 = vrot.slane %v2246_v33, %v15414_v9  ;;  %v2269_v37 = vrot.slane %v2247_v16, %v15414_v9  ;;  %v17167_v56 = vrot.slane %v2248_v28, %v15414_v9 }
 0x21e   : > { %14760 = vmatpush3.bf16.xpose.msk.msra.mxu0 %vm15827_vm1, %v14755_v5  ;;  %v5025_v31 = vcombine.high %v5021_v52, %v5021_v52  ;;  %v10024_v30 = vcombine.low %v5024_v55, %v5007_v39  ;;  %v17169_v6 = vcombine.low %v5021_v52, %v5023_v63  ;;  %v2182_v32 = vcombine.high %v17028_v12, %v17028_v12  ;;  %v20394_v5 = vld [vmem:[#allocation10_spill] sm:$0xff] }
 0x21f   : > { %20393 = vst [vmem:[#allocation28_spill] sm:$0xff] %v17162_v13  ;;  %v2277_v42 = vcombine.high %v2255_v27, %v2255_v27  ;;  %v2278_v21 = vcombine.high %v2262_v20, %v2262_v20  ;;  %v2279_v62 = vcombine.high %v2269_v37, %v2269_v37  ;;  %v2183_v53 = vcombine.high %v20394_v5, %v20394_v5 }
 0x220   : > { %v17176_v36 = vrot.slane %v9753_v44, %v15414_v9  ;;  %v17179_v33 = vcombine.low %v5025_v31, %v17070_v61  ;;  %v10033_v16 = vrot.slane %v10023_v19, %v15414_v9  ;;  %v2190_v39 = vrot.slane %v20394_v5, %v15414_v9 }
 0x221   : > { %v10040_v28 = vrot.slane %v10024_v30, %v15414_v9  ;;  %v9067_v12 = vcombine.low %v2279_v62, %v2262_v20  ;;  %v9068_v52 = vcombine.low %v17167_v56, %v2278_v21  ;;  %v2197_v63 = vrot.slane %v2183_v53, %v15414_v9 }
 0x222   : > { %v9066_v44 = vcombine.low %v2269_v37, %v2277_v42  ;;  %v2198_v47 = vcombine.high %v2190_v39, %v2190_v39  ;;  %v2206_v61 = vrot.slane %v2190_v39, %v15414_v9  ;;  %v7877_v42 = vcombine.low %v16676_v17, %v16686_v34 }
 0x223   : > { %v9089_v19 = vrot.slane %v9067_v12, %v15414_v9  ;;  %v9096_v5 = vrot.slane %v9068_v52, %v15414_v9  ;;  %v2199_v30 = vcombine.high %v2197_v63, %v2197_v63  ;;  %v2213_v62 = vrot.slane %v2197_v63, %v15414_v9  ;;  %v17205_v52 = vpop.f32.mrb[40].mxu1 }
 0x224   : > { %v2220_v20 = vrot.slane %v2198_v47, %v15414_v9  ;;  %v2228_v21 = vcombine.high %v2206_v61, %v2206_v61  ;;  %v9016_v53 = vcombine.low %v2182_v32, %v2206_v61  ;;  %v20395_v39 = vcombine.low %v16606_v38, %v16609_v49  ;;  %20396 = vst [vmem:[#allocation17_spill] sm:$0xff] %v17205_v52  ;;  %v20397_v49 = vld [vmem:[#allocation27_spill] sm:$0xff]  ;;  %v17265_v52 = vpop.f32.mrb[34].mxu0 }
 0x225   : > { %v17196_v13 = vcombine.low %v9089_v19, %v9096_v5  ;;  %v2227_v37 = vrot.slane %v2199_v30, %v15414_v9  ;;  %v2229_v55 = vcombine.high %v2213_v62, %v2213_v62  ;;  %v17208_v32 = vcombine.low %v10033_v16, %v10040_v28  ;;  %v20398_v28 = vld [vmem:[#allocation21_spill] sm:$0xff]  ;;  %20403 = vst [vmem:[#allocation3_spill] sm:$0xff] %v17265_v52 }
 0x226   : > { %v7892_v12 = vrot.slane %v20395_v39, %v15414_v9  ;;  %v2230_v63 = vcombine.high %v2220_v20, %v2220_v20  ;;  %v9017_v31 = vcombine.low %v2220_v20, %v2228_v21  ;;  %v9026_v47 = vrot.slane %v9016_v53, %v15414_v9 }
 0x227   : > { %v9082_v61 = vrot.slane %v9066_v44, %v15414_v9  ;;  %v2231_v19 = vcombine.high %v2227_v37, %v2227_v37  ;;  %v7885_v5 = vrot.slane %v7877_v42, %v15414_v9  ;;  %v5124_v30 = vcombine.high %v20397_v49, %v20397_v49 }
 0x228   : > { %v17214_v34 = vcombine.low %v2230_v63, %v2213_v62  ;;  %v9033_v38 = vrot.slane %v9017_v31, %v15414_v9  ;;  %v5131_v16 = vrot.slane %v20397_v49, %v15414_v9  ;;  %v2330_v44 = vcombine.high %v20398_v28, %v20398_v28 }
 0x229   : > { %v9065_v20 = vcombine.low %v2231_v19, %v2255_v27  ;;  %v7893_v21 = vcombine.low %v7885_v5, %v7892_v12  ;;  %v17223_v53 = vcombine.low %v2227_v37, %v2229_v55  ;;  %v20399_v62 = vrot.slane %v16573_v46, %v15414_v9 }
 0x22a   : > { %v17225_v42 = vcombine.low %v9026_v47, %v9033_v38  ;;  %v5138_v39 = vrot.slane %v5124_v30, %v15414_v9  ;;  %v5139_v63 = vcombine.high %v5131_v16, %v5131_v16  ;;  %v2337_v55 = vrot.slane %v20398_v28, %v15414_v9 }
 0x22b   : > { %v7907_v31 = vrot.slane %v20399_v62, %v15414_v9  ;;  %v9075_v12 = vrot.slane %v9065_v20, %v15414_v9  ;;  %14502 = vmatprep.mubr.msk.f32.mxu0 %vm268_vm0, %v7893_v21  ;;  %v5147_v47 = vrot.slane %v5131_v16, %v15414_v9  ;;  %v2344_v19 = vrot.slane %v2330_v44, %v15414_v9  ;;  %v20401_v62 = vld [vmem:[#allocation22_spill] sm:$0xff] }
 0x22c   : > { %v5140_v37 = vcombine.high %v5138_v39, %v5138_v39  ;;  %v5154_v46 = vrot.slane %v5138_v39, %v15414_v9  ;;  %v17245_v38 = vrot.slane %v5139_v63, %v15414_v9  ;;  %v2345_v49 = vcombine.high %v2337_v55, %v2337_v55 }
 0x22d   : > { %14503 = vmatmul.mubr.msk.f32.gmra.mrb[60].mxu0 %vm268_vm0, %v7907_v31  ;;  %v17242_v5 = vcombine.low %v9075_v12, %v9082_v61  ;;  %v2353_v30 = vrot.slane %v2337_v55, %v15414_v9  ;;  %v2346_v21 = vcombine.high %v2344_v19, %v2344_v19  ;;  %v2360_v28 = vrot.slane %v2344_v19, %v15414_v9 }
 0x22e   : > { %20400 = vst [vmem:[#allocation6_spill] sm:$0xff] %v17245_v38  ;;  %v5168_v20 = vrot.slane %v5140_v37, %v15414_v9  ;;  %v5075_v16 = vcombine.high %v20401_v62, %v20401_v62  ;;  %v13940_v61 = vcombine.high %v5147_v47, %v17245_v38  ;;  %v2367_v44 = vrot.slane %v2345_v49, %v15414_v9 }
 0x22f   : > { %v5074_v39 = vcombine.high %v17095_v7, %v17095_v7  ;;  %v2374_v55 = vrot.slane %v2346_v21, %v15414_v9  ;;  %v5082_v37 = vrot.slane %v20401_v62, %v15414_v9  ;;  %v17274_v21 = vpop.f32.mrb[41].mxu1 }
 0x230   : > { %v10447_v12 = vcombine.low %v5154_v46, %v5168_v20  ;;  %v13941_v63 = vcombine.high %v5154_v46, %v5168_v20  ;;  %v17262_v19 = vrot.slane %v13940_v61, %v15414_v9  ;;  %v9439_v17 = vcombine.low %v2353_v30, %v2367_v44  ;;  %20405 = vst [vmem:[#allocation10_spill] sm:$0xff] %v17274_v21  ;;  %v17290_v21 = vpop.f32.mrb[35].mxu0 }
 0x231   : > { %v13906_v27 = vcombine.high %v2353_v30, %v2367_v44  ;;  %v5089_v31 = vrot.slane %v5075_v16, %v15414_v9  ;;  %v9441_v20 = vcombine.low %v2360_v28, %v2374_v55  ;;  %v13907_v30 = vcombine.high %v2360_v28, %v2374_v55  ;;  %v17279_v44 = vpop.f32.mrb[42].mxu1  ;;  %20407 = vst [vmem:[#allocation21_spill] sm:$0xff] %v17290_v21 }
 0x232   : > { %20402 = vst [vmem:[#allocation25_spill] sm:$0xff] %v17262_v19  ;;  %v17272_v46 = vrot.slane %v10447_v12, %v15414_v9  ;;  %v17277_v62 = vrot.slane %v13941_v63, %v15414_v9  ;;  %v5090_v61 = vcombine.high %v5082_v37, %v5082_v37  ;;  %20406 = vst [vmem:[#allocation27_spill] sm:$0xff] %v17279_v44 }
 0x233   : > { %v5091_v16 = vcombine.high %v5089_v31, %v5089_v31  ;;  %v17284_v52 = vrot.slane %v9439_v17, %v15414_v9  ;;  %v17287_v12 = vrot.slane %v13906_v27, %v15414_v9  ;;  %v5098_v7 = vrot.slane %v5082_v37, %v15414_v9 }
 0x234   : > { %20404 = vst [vmem:[#allocation23_spill] sm:$0xff] %v17272_v46  ;;  %v17293_v63 = vrot.slane %v9441_v20, %v15414_v9  ;;  %v5105_v28 = vrot.slane %v5089_v31, %v15414_v9  ;;  %v5112_v55 = vrot.slane %v5090_v61, %v15414_v9  ;;  %v10096_v17 = vrot.slane %v17130_v58, %v15414_v9  ;;  %v17306_v20 = vpop.f32.mrb[43].mxu1 }
 0x235   : > { %v5119_v44 = vrot.slane %v5091_v16, %v15414_v9  ;;  %v5120_v49 = vcombine.high %v5098_v7, %v5098_v7  ;;  %v10075_v46 = vcombine.low %v5074_v39, %v5098_v7  ;;  %v20409_v27 = vrot.slane %v16777_v23, %v15414_v9  ;;  %20411 = vst [vmem:[#allocation46_spill] sm:$0xff] %v17306_v20 }
 0x236   : > { %20408 = vst [vmem:[#allocation22_spill] sm:$0xff] %v17293_v63  ;;  %v20410_v37 = vrot.slane %v16772_v59, %v15414_v9  ;;  %v5121_v19 = vcombine.high %v5105_v28, %v5105_v28  ;;  %v5122_v31 = vcombine.high %v5112_v55, %v5112_v55  ;;  %v8210_v61 = vrot.slane %v16779_v43, %v15414_v9 }
 0x237   : > { %v5123_v38 = vcombine.high %v5119_v44, %v5119_v44  ;;  %v17311_v39 = vrot.slane %v13907_v30, %v15414_v9  ;;  %v10103_v58 = vrot.slane %v10075_v46, %v15414_v9  ;;  %v10121_v7 = vcombine.low %v5112_v55, %v5120_v49 }
 0x238   : > { %v8203_v21 = vcombine.low %v20410_v37, %v20409_v27  ;;  %v10122_v16 = vcombine.low %v5122_v31, %v5105_v28  ;;  %v17315_v63 = vcombine.low %v5119_v44, %v5121_v19  ;;  %v2281_v27 = vcombine.high %v16585_v41, %v16585_v41 }
 0x239   : > { %v17317_v59 = vcombine.low %v5123_v38, %v5147_v47  ;;  %v17321_v37 = vcombine.low %v10096_v17, %v10103_v58  ;;  %v2280_v43 = vcombine.high %v17167_v56, %v17167_v56  ;;  %v2288_v46 = vrot.slane %v16585_v41, %v15414_v9  ;;  %v20416_v58 = vld [vmem:[#allocation18_spill] sm:$0xff] }
 0x23a   : > { %v8217_v23 = vrot.slane %v8203_v21, %v15414_v9  ;;  %v10131_v19 = vrot.slane %v10121_v7, %v15414_v9  ;;  %v10138_v47 = vrot.slane %v10122_v16, %v15414_v9  ;;  %v2295_v38 = vrot.slane %v2281_v27, %v15414_v9 }
 0x23b   : > { %v2296_v21 = vcombine.high %v2288_v46, %v2288_v46  ;;  %v2304_v30 = vrot.slane %v2288_v46, %v15414_v9  ;;  %v20412_v56 = vrot.slane %v16759_v2, %v15414_v9  ;;  %v20413_v41 = vrot.slane %v16805_v60, %v15414_v9 }
 0x23c   : > { %v8218_v20 = vcombine.low %v8210_v61, %v8217_v23  ;;  %v20414_v28 = vcombine.low %v16580_v45, %v16535_v3  ;;  %v2297_v31 = vcombine.high %v2295_v38, %v2295_v38  ;;  %v20415_v61 = vld [vmem:[#allocation16_spill] sm:$0xff]  ;;  %v20418_v3 = vld [vmem:[#allocation15_spill] sm:$0xff] }
 0x23d   : > { %v8267_v44 = vcombine.low %v20413_v41, %v20412_v56  ;;  %v20417_v7 = vcombine.low %v20415_v61, %v20416_v58  ;;  %v2318_v23 = vrot.slane %v2296_v21, %v15414_v9  ;;  %v2326_v60 = vcombine.high %v2304_v30, %v2304_v30  ;;  %v20434_v21 = vld [vmem:[#allocation41_spill] sm:$0xff]  ;;  %v20436_v58 = vld [vmem:[#allocation35_spill] sm:$0xff] }
 0x23e   : > { %14513 = vmatprep.mubr.msk.f32.mxu1 %vm268_vm0, %v8218_v20  ;;  %v8892_v55 = vrot.slane %v20414_v28, %v15414_v9  ;;  %v2311_v20 = vrot.slane %v2295_v38, %v15414_v9  ;;  %v9114_v16 = vcombine.low %v2280_v43, %v2304_v30  ;;  %v8914_v45 = vrot.slane %v20418_v3, %v15414_v9 }
 0x23f   : > { %v8899_v2 = vrot.slane %v20417_v7, %v15414_v9  ;;  %14514 = vmatmul.mubr.msk.f32.vlgmr.msra.gmra.mrb[58].mxu1 %vm268_vm0, %v8267_v44  ;;  %v17356_v27 = vrot.slane %v2297_v31, %v15414_v9  ;;  %v9217_v38 = vrot.slane %v16743_v57, %v15414_v9  ;;  %v2328_v41 = vcombine.high %v2318_v23, %v2318_v23 }
 0x240   : > { %v2327_v46 = vcombine.high %v2311_v20, %v2311_v20  ;;  %v9115_v28 = vcombine.low %v2318_v23, %v2326_v60  ;;  %v9124_v61 = vrot.slane %v9114_v16, %v15414_v9  ;;  %v9224_v43 = vrot.slane %v16770_v29, %v15414_v9 }
 0x241   : > { %v8900_v56 = vcombine.low %v8892_v55, %v8899_v2  ;;  %v17365_v30 = vcombine.low %v10131_v19, %v10138_v47  ;;  %v20419_v31 = vrot.slane %v16660_v48, %v15414_v9  ;;  %v20420_v55 = vrot.slane %v16735_v11, %v15414_v9 }
 0x242   : > { %v9131_v7 = vrot.slane %v9115_v28, %v15414_v9  ;;  %v9225_v2 = vcombine.low %v9217_v38, %v9224_v43  ;;  %v9273_v29 = vrot.slane %v16732_v14, %v15414_v9  ;;  %v17379_v19 = vcombine.low %v17356_v27, %v2327_v46  ;;  %v20421_v14 = vld [vmem:[#allocation19_spill] sm:$0xff] }
 0x243   : > { %v14761_v44 = vpack.c.bf16 %v8914_v45, %v8900_v56  ;;  %v9258_v57 = vcombine.low %v20420_v55, %v20419_v31  ;;  %v5222_v11 = vcombine.high %v16673_v4, %v16673_v4  ;;  %v5229_v47 = vrot.slane %v16673_v4, %v15414_v9 }
 0x244   : > { %v17388_v23 = vcombine.low %v2328_v41, %v2311_v20  ;;  %v17390_v60 = vcombine.low %v9124_v61, %v9131_v7  ;;  %v5173_v16 = vcombine.high %v20421_v14, %v20421_v14  ;;  %v5180_v3 = vrot.slane %v20421_v14, %v15414_v9  ;;  %v20423_v61 = vld [vmem:[#allocation14_spill] sm:$0xff] }
 0x245   : > { %14763 = vmatprep.subr.msk.bf16.mxu0 %vm15827_vm1, %v14761_v44  ;;  %v9266_v48 = vrot.slane %v9258_v57, %v15414_v9  ;;  %v5236_v46 = vrot.slane %v5222_v11, %v15414_v9  ;;  %v5237_v56 = vcombine.high %v5229_v47, %v5229_v47  ;;  %v5245_v38 = vrot.slane %v5229_v47, %v15414_v9  ;;  %v20425_v47 = vld [vmem:[#allocation34_spill] sm:$0xff] }
 0x246   : > { %14766 = vmatpush3.bf16.xpose.msk.msra.mxu0 %vm15827_vm1, %v14761_v44  ;;  %v5187_v4 = vrot.slane %v5173_v16, %v15414_v9  ;;  %v5188_v20 = vcombine.high %v5180_v3, %v5180_v3  ;;  %v5196_v41 = vrot.slane %v5180_v3, %v15414_v9  ;;  %v20422_v28 = vrot.slane %v16852_v8, %v15414_v9 }
 0x247   : > { %v9274_v45 = vcombine.low %v9266_v48, %v9273_v29  ;;  %v20424_v43 = vrot.slane %v20423_v61, %v15414_v9  ;;  %v5238_v55 = vcombine.high %v5236_v46, %v5236_v46  ;;  %v5252_v57 = vrot.slane %v5236_v46, %v15414_v9 }
 0x248   : > { %v5259_v7 = vrot.slane %v5237_v56, %v15414_v9  ;;  %v5189_v29 = vcombine.high %v5187_v4, %v5187_v4  ;;  %v5203_v48 = vrot.slane %v5187_v4, %v15414_v9  ;;  %v5210_v11 = vrot.slane %v5188_v20, %v15414_v9  ;;  %v20426_v4 = vld [vmem:[#allocation20_spill] sm:$0xff] }
 0x249   : > { %v8301_v44 = vcombine.low %v20424_v43, %v20422_v28  ;;  %v14767_v31 = vpack.c.bf16 %v9274_v45, %v9225_v2  ;;  %v8308_v14 = vrot.slane %v20425_v47, %v15414_v9  ;;  %v5266_v8 = vrot.slane %v5238_v55, %v15414_v9  ;;  %v17423_v28 = vpop.f32.mrb[36].mxu0 }
 0x24a   : > { %v10498_v16 = vcombine.low %v5245_v38, %v5259_v7  ;;  %v13944_v2 = vcombine.high %v5245_v38, %v5259_v7  ;;  %v5217_v45 = vrot.slane %v5189_v29, %v15414_v9  ;;  %v10449_v46 = vcombine.low %v5196_v41, %v5210_v11  ;;  %20427 = vst [vmem:[#allocation16_spill] sm:$0xff] %v17423_v28  ;;  %v17429_v55 = vpop.f32.mrb[37].mxu0  ;;  %v20438_v38 = vld [vmem:[#allocation32_spill] sm:$0xff] }
 0x24b   : > { %14769 = vmatprep.subr.msk.bf16.mxu1 %vm15827_vm1, %v14767_v31  ;;  %v8315_v3 = vrot.slane %v8301_v44, %v15414_v9  ;;  %v13942_v56 = vcombine.high %v5196_v41, %v5210_v11  ;;  %v2428_v20 = vcombine.high %v20426_v4, %v20426_v4  ;;  %v10545_v43 = vcombine.low %v5252_v57, %v5266_v8 }
 0x24c   : > { %14772 = vmatpush3.bf16.xpose.msk.msra.mxu1 %vm15827_vm1, %v14767_v31  ;;  %v13945_v44 = vcombine.high %v5252_v57, %v5266_v8  ;;  %20428 = vst [vmem:[#allocation18_spill] sm:$0xff] %v17429_v55  ;;  %v17432_v31 = vrot.slane %v10498_v16, %v15414_v9  ;;  %v17435_v41 = vrot.slane %v10449_v46, %v15414_v9  ;;  %v20433_v16 = vld [vmem:[#allocation31_spill] sm:$0xff] }
 0x24d   : > { %v10496_v7 = vcombine.low %v5203_v48, %v5217_v45  ;;  %v13943_v29 = vcombine.high %v5203_v48, %v5217_v45  ;;  %v17438_v11 = vrot.slane %v13944_v2, %v15414_v9  ;;  %v17441_v47 = vrot.slane %v13942_v56, %v15414_v9  ;;  %v20432_v45 = vld [vmem:[#allocation4_spill] sm:$0xff] }
 0x24e   : > { %v8316_v17 = vcombine.low %v8308_v14, %v8315_v3  ;;  %v2435_v57 = vrot.slane %v20426_v4, %v15414_v9  ;;  %v17446_v8 = vrot.slane %v10545_v43, %v15414_v9  ;;  %v2442_v48 = vrot.slane %v2428_v20, %v15414_v9  ;;  %v20435_v43 = vld [vmem:[#allocation33_spill] sm:$0xff] }
 0x24f   : > { %20429 = vst [vmem:[#allocation15_spill] sm:$0xff] %v17438_v11  ;;  %v17451_v46 = vrot.slane %v13943_v29, %v15414_v9  ;;  %v17455_v2 = vrot.slane %v13945_v44, %v15414_v9  ;;  %v8323_v56 = vrot.slane %v20432_v45, %v15414_v9  ;;  %v17462_v4 = vrot.slane %v10496_v7, %v15414_v9 }
 0x250   : > { %20430 = vst [vmem:[#allocation19_spill] sm:$0xff] %v17446_v8  ;;  %14516 = vmatprep.mubr.msk.f32.mxu1 %vm268_vm0, %v8316_v17  ;;  %v2443_v14 = vcombine.high %v2435_v57, %v2435_v57  ;;  %v2451_v3 = vrot.slane %v2435_v57, %v15414_v9  ;;  %v2444_v29 = vcombine.high %v2442_v48, %v2442_v48 }
 0x251   : > { %20431 = vst [vmem:[#allocation14_spill] sm:$0xff] %v17455_v2  ;;  %v17467_v20 = vrot.slane %v2442_v48, %v15414_v9  ;;  %v8330_v17 = vrot.slane %v8323_v56, %v15414_v9  ;;  %v2379_v57 = vcombine.high %v20433_v16, %v20433_v16  ;;  %v2386_v45 = vrot.slane %v20433_v16, %v15414_v9 }
 0x252   : > { %v2465_v44 = vrot.slane %v2443_v14, %v15414_v9  ;;  %v2472_v7 = vrot.slane %v2444_v29, %v15414_v9  ;;  %v8625_v49 = vcombine.low %v16898_v50, %v20434_v21  ;;  %v20437_v48 = vcombine.low %v20435_v43, %v20436_v58 }
 0x253   : > { %v5320_v14 = vcombine.high %v20438_v38, %v20438_v38  ;;  %14517 = vmatmul.mubr.msk.f32.gmra.mrb[60].mxu1 %vm268_vm0, %v8330_v17  ;;  %v2393_v28 = vrot.slane %v2379_v57, %v15414_v9  ;;  %v2394_v16 = vcombine.high %v2386_v45, %v2386_v45  ;;  %v2402_v21 = vrot.slane %v2386_v45, %v15414_v9 }
 0x254   : > { %v8640_v61 = vrot.slane %v20437_v48, %v15414_v9  ;;  %v9537_v56 = vcombine.low %v2451_v3, %v2465_v44  ;;  %v13910_v55 = vcombine.high %v2451_v3, %v2465_v44  ;;  %v9539_v50 = vcombine.low %v17467_v20, %v2472_v7 }
 0x255   : > { %v8633_v58 = vrot.slane %v8625_v49, %v15414_v9  ;;  %v13911_v48 = vcombine.high %v17467_v20, %v2472_v7  ;;  %v2395_v3 = vcombine.high %v2393_v28, %v2393_v28  ;;  %v2409_v44 = vrot.slane %v2393_v28, %v15414_v9 }
 0x256   : > { %v17496_v17 = vrot.slane %v9537_v56, %v15414_v9  ;;  %v17499_v57 = vrot.slane %v13910_v55, %v15414_v9  ;;  %v2416_v29 = vrot.slane %v2394_v16, %v15414_v9  ;;  %v17503_v45 = vrot.slane %v9539_v50, %v15414_v9 }
 0x257   : > { %v8641_v8 = vcombine.low %v8633_v58, %v8640_v61  ;;  %v2423_v49 = vrot.slane %v2395_v3, %v15414_v9  ;;  %v5327_v20 = vrot.slane %v20438_v38, %v15414_v9  ;;  %v5334_v7 = vrot.slane %v5320_v14, %v15414_v9 }
 0x258   : > { %20439 = vst [vmem:[#allocation34_spill] sm:$0xff] %v17499_v57  ;;  %v9488_v28 = vcombine.low %v2402_v21, %v2416_v29  ;;  %v13908_v43 = vcombine.high %v2402_v21, %v2416_v29  ;;  %v9315_v55 = vrot.slane %v16965_v25, %v15414_v9  ;;  %v9322_v61 = vrot.slane %v16974_v10, %v15414_v9 }
 0x259   : > { %14527 = vmatprep.mubr.msk.f32.mxu0 %vm268_vm0, %v8641_v8  ;;  %v9490_v56 = vcombine.low %v2409_v44, %v2423_v49  ;;  %v13909_v16 = vcombine.high %v2409_v44, %v2423_v49  ;;  %v5335_v50 = vcombine.high %v5327_v20, %v5327_v20  ;;  %v5336_v58 = vcombine.high %v5334_v7, %v5334_v7 }
 0x25a   : > { %v20440_v3 = vcombine.low %v17106_v0, %v17111_v15  ;;  %v9498_v38 = vrot.slane %v9488_v28, %v15414_v9  ;;  %v9505_v14 = vrot.slane %v13908_v43, %v15414_v9  ;;  %v17521_v8 = vrot.slane %v5327_v20, %v15414_v9 }
 0x25b   : > { %v5350_v25 = vrot.slane %v5334_v7, %v15414_v9  ;;  %v9512_v10 = vrot.slane %v9490_v56, %v15414_v9  ;;  %v9519_v29 = vrot.slane %v13909_v16, %v15414_v9  ;;  %v5357_v21 = vrot.slane %v5335_v50, %v15414_v9  ;;  %v20442_v16 = vld [vmem:[#allocation39_spill] sm:$0xff] }
 0x25c   : > { %14528 = vmatmul.mubr.msk.f32.vlgmr.msra.gmra.mrb[62].mxu0 %vm268_vm0, %v20440_v3  ;;  %v17528_v44 = vrot.slane %v5336_v58, %v15414_v9  ;;  %v9520_v0 = vcombine.low %v9498_v38, %v9505_v14  ;;  %v5365_v15 = vcombine.high %v17521_v8, %v17521_v8  ;;  %v9323_v43 = vcombine.low %v9315_v55, %v9322_v61  ;;  %v20443_v3 = vld [vmem:[#allocation40_spill] sm:$0xff]  ;;  %v17540_v58 = vpop.f32.mrb[44].mxu1 }
 0x25d   : > { %v5366_v49 = vcombine.high %v5350_v25, %v5350_v25  ;;  %v9521_v28 = vcombine.low %v9512_v10, %v9519_v29  ;;  %v5367_v20 = vcombine.high %v5357_v21, %v5357_v21  ;;  %v20441_v7 = vcombine.high %v16936_v22, %v16936_v22  ;;  %20445 = vst [vmem:[#allocation20_spill] sm:$0xff] %v17540_v58  ;;  %v17552_v10 = vpop.f32.mrb[45].mxu1 }
 0x25e   : > { %v20444_v50 = vcombine.low %v20442_v16, %v20443_v3  ;;  %v17543_v38 = vrot.slane %v9520_v0, %v15414_v9  ;;  %v17545_v14 = vcombine.low %v5357_v21, %v5365_v15  ;;  %v20447_v61 = vcombine.low %v16919_v26, %v16930_v51  ;;  %20448 = vst [vmem:[#allocation31_spill] sm:$0xff] %v17552_v10  ;;  %v20451_v3 = vld [vmem:[#allocation42_spill] sm:$0xff] }
 0x25f   : > { %v9330_v56 = vrot.slane %v20441_v7, %v15414_v9  ;;  %v10919_v55 = vcombine.low %v17528_v44, %v5366_v49  ;;  %v17555_v29 = vrot.slane %v9521_v28, %v15414_v9  ;;  %v10918_v7 = vcombine.low %v5367_v20, %v5350_v25 }
 0x260   : > { %v9640_v11 = vrot.slane %v20444_v50, %v15414_v9  ;;  %20446 = vst [vmem:[#allocation4_spill] sm:$0xff] %v17545_v14  ;;  %v9647_v22 = vrot.slane %v20447_v61, %v15414_v9  ;;  %v20449_v21 = vcombine.low %v17005_v1, %v17008_v35  ;;  %v17563_v15 = vrot.slane %v13911_v48, %v15414_v9  ;;  %v20452_v50 = vld [vmem:[#allocation11_spill] sm:$0xff] }
 0x261   : > { %v9337_v16 = vrot.slane %v9330_v56, %v15414_v9  ;;  %v10935_v49 = vrot.slane %v10919_v55, %v15414_v9  ;;  %v20450_v51 = vcombine.low %v17020_v40, %v17024_v24  ;;  %v10928_v20 = vrot.slane %v10918_v7, %v15414_v9 }
 0x262   : > { %v9689_v0 = vrot.slane %v20449_v21, %v15414_v9  ;;  %v9648_v26 = vcombine.low %v9640_v11, %v9647_v22  ;;  %v2526_v1 = vcombine.high %v20451_v3, %v20451_v3  ;;  %v2533_v48 = vrot.slane %v20451_v3, %v15414_v9 }
 0x263   : > { %v9696_v28 = vrot.slane %v20450_v51, %v15414_v9  ;;  %v14773_v56 = vpack.c.bf16 %v9337_v16, %v9323_v43  ;;  %v5271_v11 = vcombine.high %v20452_v50, %v20452_v50  ;;  %v5278_v40 = vrot.slane %v20452_v50, %v15414_v9  ;;  %v20455_v50 = vld [vmem:[#allocation45_spill] sm:$0xff] }
 0x264   : > { %v17585_v43 = vcombine.low %v10928_v20, %v10935_v49  ;;  %v2540_v61 = vrot.slane %v2526_v1, %v15414_v9  ;;  %v2541_v7 = vcombine.high %v2533_v48, %v2533_v48  ;;  %v17591_v16 = vrot.slane %v2533_v48, %v15414_v9  ;;  %v17598_v20 = vpop.f32.mrb[38].mxu0 }
 0x265   : > { %v9697_v35 = vcombine.low %v9689_v0, %v9696_v28  ;;  %14775 = vmatprep.subr.msk.bf16.mxu1 %vm15827_vm1, %v14773_v56  ;;  %v5285_v21 = vrot.slane %v5271_v11, %v15414_v9  ;;  %v5286_v49 = vcombine.high %v5278_v40, %v5278_v40  ;;  %v5294_v28 = vrot.slane %v5278_v40, %v15414_v9 }
 0x266   : > { %20453 = vst [vmem:[#allocation41_spill] sm:$0xff] %v17585_v43  ;;  %14778 = vmatpush3.bf16.xpose.msk.msra.mxu1 %vm15827_vm1, %v14773_v56  ;;  %v2542_v0 = vcombine.high %v2540_v61, %v2540_v61  ;;  %v2556_v51 = vrot.slane %v2540_v61, %v15414_v9  ;;  %20454 = vst [vmem:[#allocation33_spill] sm:$0xff] %v17598_v20  ;;  %v2571_v3 = vcombine.high %v17591_v16, %v17591_v16  ;;  %v17618_v43 = vpop.f32.mrb[39].mxu0 }
 0x267   : > { %v14779_v22 = vpack.c.bf16 %v9697_v35, %v9648_v26  ;;  %v2563_v26 = vrot.slane %v2541_v7, %v15414_v9  ;;  %v5287_v1 = vcombine.high %v5285_v21, %v5285_v21  ;;  %v5301_v35 = vrot.slane %v5285_v21, %v15414_v9  ;;  %20456 = vst [vmem:[#allocation35_spill] sm:$0xff] %v17618_v43  ;;  %v20467_v43 = vld [vmem:[#allocation37_spill] sm:$0xff] }
 0x268   : > { %v17607_v56 = vrot.slane %v2542_v0, %v15414_v9  ;;  %v5308_v48 = vrot.slane %v5286_v49, %v15414_v9  ;;  %v2477_v11 = vcombine.high %v20455_v50, %v20455_v50  ;;  %v2484_v40 = vrot.slane %v20455_v50, %v15414_v9 }
 0x269   : > { %14781 = vmatprep.subr.msk.bf16.mxu0 %vm15827_vm1, %v14779_v22  ;;  %v2573_v61 = vcombine.high %v2563_v26, %v2563_v26  ;;  %v9911_v7 = vcombine.low %v2563_v26, %v2571_v3  ;;  %v5315_v55 = vrot.slane %v5287_v1, %v15414_v9  ;;  %v5317_v25 = vcombine.high %v5301_v35, %v5301_v35 }
 0x26a   : > { %14784 = vmatpush3.bf16.xpose.msk.msra.mxu0 %vm15827_vm1, %v14779_v22  ;;  %v2572_v21 = vcombine.high %v2556_v51, %v2556_v51  ;;  %v5316_v24 = vcombine.high %v5294_v28, %v5294_v28  ;;  %v5318_v0 = vcombine.high %v5308_v48, %v5308_v48  ;;  %v10547_v20 = vcombine.low %v5294_v28, %v5308_v48  ;;  %v17636_v48 = vpop.f32.mrb[46].mxu1 }
 0x26b   : > { %v9912_v10 = vcombine.low %v2573_v61, %v2556_v51  ;;  %v9921_v49 = vrot.slane %v9911_v7, %v15414_v9  ;;  %v5319_v58 = vcombine.high %v5315_v55, %v5315_v55  ;;  %v10870_v22 = vcombine.low %v5315_v55, %v5317_v25  ;;  %20459 = vst [vmem:[#allocation40_spill] sm:$0xff] %v17636_v48  ;;  %v20465_v25 = vld [vmem:[#allocation44_spill] sm:$0xff] }
 0x26c   : > { %v17621_v14 = vrot.slane %v10547_v20, %v15414_v9  ;;  %v10869_v50 = vcombine.low %v5318_v0, %v5301_v35  ;;  %v2491_v26 = vrot.slane %v2477_v11, %v15414_v9  ;;  %v2492_v3 = vcombine.high %v2484_v40, %v2484_v40 }
 0x26d   : > { %v9928_v1 = vrot.slane %v9912_v10, %v15414_v9  ;;  %v17626_v57 = vcombine.low %v5319_v58, %v17521_v8  ;;  %v10886_v51 = vrot.slane %v10870_v22, %v15414_v9  ;;  %v17630_v28 = vrot.slane %v2484_v40, %v15414_v9 }
 0x26e   : > { %20457 = vst [vmem:[#allocation32_spill] sm:$0xff] %v17621_v14  ;;  %v10879_v55 = vrot.slane %v10869_v50, %v15414_v9  ;;  %v2493_v20 = vcombine.high %v2491_v26, %v2491_v26  ;;  %v2507_v35 = vrot.slane %v2491_v26, %v15414_v9  ;;  %v17639_v10 = vcombine.low %v17607_v56, %v2572_v21 }
 0x26f   : > { %20458 = vst [vmem:[#allocation39_spill] sm:$0xff] %v17626_v57  ;;  %v17641_v8 = vcombine.low %v9921_v49, %v9928_v1  ;;  %v2514_v58 = vrot.slane %v2492_v3, %v15414_v9  ;;  %v2522_v11 = vcombine.high %v17630_v28, %v17630_v28  ;;  %v17647_v40 = vrot.slane %v5316_v24, %v15414_v9  ;;  %v20463_v49 = vld [vmem:[#allocation13_spill] sm:$0xff]  ;;  %v20464_v24 = vld [vmem:[#allocation43_spill] sm:$0xff] }
 0x270   : > { %v2521_v7 = vrot.slane %v2493_v20, %v15414_v9  ;;  %v2523_v0 = vcombine.high %v2507_v35, %v2507_v35  ;;  %v17652_v22 = vcombine.low %v10879_v55, %v10886_v51  ;;  %v8723_v26 = vcombine.low %v20463_v49, %v17083_v54 }
 0x271   : > { %20460 = vst [vmem:[#allocation42_spill] sm:$0xff] %v17647_v40  ;;  %v2524_v21 = vcombine.high %v2514_v58, %v2514_v58  ;;  %v17654_v50 = vcombine.low %v2514_v58, %v2522_v11  ;;  %v20466_v48 = vcombine.low %v20464_v24, %v20465_v25  ;;  %v5418_v20 = vcombine.high %v20467_v43, %v20467_v43 }
 0x272   : > { %20461 = vst [vmem:[#allocation11_spill] sm:$0xff] %v17652_v22  ;;  %v2525_v3 = vcombine.high %v2521_v7, %v2521_v7  ;;  %v17668_v55 = vcombine.low %v2521_v7, %v2523_v0  ;;  %v8731_v58 = vrot.slane %v8723_v26, %v15414_v9  ;;  %v5425_v54 = vrot.slane %v20467_v43, %v15414_v9 }
 0x273   : > { %20462 = vst [vmem:[#allocation45_spill] sm:$0xff] %v17654_v50  ;;  %v8738_v61 = vrot.slane %v20466_v48, %v15414_v9  ;;  %v17673_v11 = vcombine.low %v2524_v21, %v2507_v35  ;;  %v5432_v25 = vrot.slane %v5418_v20, %v15414_v9  ;;  %v20470_v48 = vld [vmem:[#allocation2_spill] sm:$0xff]  ;;  %v20472_v21 = vld [vmem:[#allocation36_spill] sm:$0xff] }
 0x274   : > { %20468 = vst [vmem:[#allocation13_spill] sm:$0xff] %v17668_v55  ;;  %v17676_v49 = vcombine.low %v2525_v3, %v17591_v16  ;;  %v20471_v24 = vcombine.high %v20470_v48, %v20470_v48  ;;  %v5433_v26 = vcombine.high %v5425_v54, %v5425_v54  ;;  %v5441_v51 = vrot.slane %v5425_v54, %v15414_v9  ;;  %v20473_v54 = vld [vmem:[#allocation38_spill] sm:$0xff] }
 0x275   : > { %20469 = vst [vmem:[#allocation43_spill] sm:$0xff] %v17673_v11  ;;  %v8739_v0 = vcombine.low %v8731_v58, %v8738_v61  ;;  %v5434_v43 = vcombine.high %v5432_v25, %v5432_v25  ;;  %v5448_v35 = vrot.slane %v5432_v25, %v15414_v9  ;;  %v2624_v3 = vcombine.high %v20472_v21, %v20472_v21 }
 0x276   : > { %v8746_v1 = vrot.slane %v20471_v24, %v15414_v9  ;;  %v5455_v48 = vrot.slane %v5433_v26, %v15414_v9  ;;  %v5463_v24 = vcombine.high %v5441_v51, %v5441_v51  ;;  %v2631_v61 = vrot.slane %v20472_v21, %v15414_v9 }
 0x277   : > { %14530 = vmatprep.mubr.msk.f32.mxu0 %vm268_vm0, %v8739_v0  ;;  %v5462_v58 = vrot.slane %v5434_v43, %v15414_v9  ;;  %v5369_v25 = vcombine.high %v20473_v54, %v20473_v54  ;;  %v5376_v20 = vrot.slane %v20473_v54, %v15414_v9  ;;  %v5368_v54 = vcombine.high %v17528_v44, %v17528_v44 }
 0x278   : > { %v8753_v16 = vrot.slane %v8746_v1, %v15414_v9  ;;  %v2638_v1 = vrot.slane %v2624_v3, %v15414_v9  ;;  %v5465_v7 = vcombine.high %v5455_v48, %v5455_v48  ;;  %v17703_v0 = vcombine.low %v5455_v48, %v5463_v24  ;;  %v17717_v24 = vpop.f32.mrb[40].mxu0 }
 0x279   : > { %v2639_v26 = vcombine.high %v2631_v61, %v2631_v61  ;;  %v17706_v22 = vrot.slane %v2631_v61, %v15414_v9  ;;  %v11292_v21 = vcombine.low %v5448_v35, %v5462_v58  ;;  %v13968_v57 = vcombine.high %v5448_v35, %v5462_v58  ;;  %20476 = vst [vmem:[#allocation2_spill] sm:$0xff] %v17717_v24 }
 0x27a   : > { %14531 = vmatmul.mubr.msk.f32.gmra.mrb[64].mxu0 %vm268_vm0, %v8753_v16  ;;  %20474 = vst [vmem:[#allocation44_spill] sm:$0xff] %v17703_v0  ;;  %v2640_v43 = vcombine.high %v2638_v1, %v2638_v1  ;;  %v2654_v16 = vrot.slane %v2638_v1, %v15414_v9  ;;  %v5383_v48 = vrot.slane %v5369_v25, %v15414_v9  ;;  %v17735_v0 = vpop.f32.mrb[47].mxu1 }
 0x27b   : > { %v17712_v40 = vrot.slane %v2639_v26, %v15414_v9  ;;  %v17722_v35 = vrot.slane %v11292_v21, %v15414_v9  ;;  %v5384_v1 = vcombine.high %v5376_v20, %v5376_v20  ;;  %v17726_v3 = vrot.slane %v13968_v57, %v15414_v9  ;;  %20480 = vst [vmem:[#allocation48_spill] sm:$0xff] %v17735_v0  ;;  %v17741_v50 = vpop.f32.mrb[48].mxu1 }
 0x27c   : > { %v2668_v58 = vrot.slane %v2640_v43, %v15414_v9  ;;  %v5385_v44 = vcombine.high %v5383_v48, %v5383_v48  ;;  %v5392_v25 = vrot.slane %v5376_v20, %v15414_v9  ;;  %v17732_v24 = vrot.slane %v5465_v7, %v15414_v9  ;;  %20481 = vst [vmem:[#allocation49_spill] sm:$0xff] %v17741_v50  ;;  %v17751_v0 = vpop.f32.mrb[49].mxu1 }
 0x27d   : > { %20475 = vst [vmem:[#allocation37_spill] sm:$0xff] %v17712_v40  ;;  %20477 = vst [vmem:[#allocation36_spill] sm:$0xff] %v17722_v35  ;;  %v13934_v26 = vcombine.high %v17706_v22, %v17712_v40  ;;  %v5399_v21 = vrot.slane %v5383_v48, %v15414_v9  ;;  %v5406_v57 = vrot.slane %v5384_v1, %v15414_v9  ;;  %v20494_v35 = vld [vmem:[#allocation9_spill] sm:$0xff] }
 0x27e   : > { %20478 = vst [vmem:[#allocation38_spill] sm:$0xff] %v17726_v3  ;;  %20479 = vst [vmem:[#allocation47_spill] sm:$0xff] %v17732_v24  ;;  %v10286_v14 = vcombine.low %v2654_v16, %v2668_v58  ;;  %v13935_v61 = vcombine.high %v2654_v16, %v2668_v58  ;;  %v5413_v2 = vrot.slane %v5385_v44, %v15414_v9  ;;  %v17749_v58 = vpop.f32.mrb[41].mxu0 }
 0x27f   : > { %v5414_v55 = vcombine.high %v5392_v25, %v5392_v25  ;;  %v17744_v20 = vrot.slane %v13934_v26, %v15414_v9  ;;  %v5415_v16 = vcombine.high %v5399_v21, %v5399_v21  ;;  %v10920_v48 = vcombine.low %v5368_v54, %v5392_v25  ;;  %20483 = vst [vmem:[#allocation51_spill] sm:$0xff] %v17749_v58 }
 0x280   : > { %v17747_v7 = vrot.slane %v10286_v14, %v15414_v9  ;;  %20484 = vst [vmem:[#allocation52_spill] sm:$0xff] %v17751_v0  ;;  %v5416_v43 = vcombine.high %v5406_v57, %v5406_v57  ;;  %v5417_v44 = vcombine.high %v5413_v2, %v5413_v2  ;;  %v17756_v50 = vrot.slane %v13935_v61, %v15414_v9  ;;  %v20485_v14 = vld [vmem:[#allocation8_spill] sm:$0xff]  ;;  %v20491_v0 = vld [vmem:[#allocation5_spill] sm:$0xff] }
 0x281   : > { %v10921_v24 = vcombine.low %v5406_v57, %v5414_v55  ;;  %v10942_v26 = vrot.slane %v10920_v48, %v15414_v9  ;;  %v10968_v40 = vcombine.low %v5413_v2, %v5415_v16  ;;  %v2575_v11 = vcombine.high %v20485_v14, %v20485_v14 }
 0x282   : > { %20482 = vst [vmem:[#allocation50_spill] sm:$0xff] %v17747_v7  ;;  %v10967_v25 = vcombine.low %v5416_v43, %v5399_v21  ;;  %v17762_v58 = vcombine.low %v5417_v44, %v5441_v51  ;;  %v2582_v1 = vrot.slane %v20485_v14, %v15414_v9  ;;  %v2574_v61 = vcombine.high %v17607_v56, %v17607_v56 }
 0x283   : > { %v10949_v54 = vrot.slane %v10921_v24, %v15414_v9  ;;  %v2589_v57 = vrot.slane %v2575_v11, %v15414_v9  ;;  %v20486_v2 = vrot.slane %v17223_v53, %v15414_v9  ;;  %v20487_v24 = vrot.slane %v17214_v34, %v15414_v9 }
 0x284   : > { %v10984_v43 = vrot.slane %v10968_v40, %v15414_v9  ;;  %v2590_v16 = vcombine.high %v2582_v1, %v2582_v1  ;;  %v9935_v48 = vrot.slane %v17639_v10, %v15414_v9  ;;  %v2598_v56 = vrot.slane %v2582_v1, %v15414_v9 }
 0x285   : > { %v9049_v21 = vcombine.low %v20487_v24, %v20486_v2  ;;  %v17777_v51 = vcombine.low %v10942_v26, %v10949_v54  ;;  %v2591_v44 = vcombine.high %v2589_v57, %v2589_v57  ;;  %v2605_v11 = vrot.slane %v2589_v57, %v15414_v9 }
 0x286   : > { %v9056_v53 = vrot.slane %v17225_v42, %v15414_v9  ;;  %v10977_v14 = vrot.slane %v10967_v25, %v15414_v9  ;;  %v2612_v34 = vrot.slane %v2590_v16, %v15414_v9  ;;  %v20488_v40 = vrot.slane %v17196_v13, %v15414_v9  ;;  %v20490_v25 = vld [vmem:[#allocation30_spill] sm:$0xff] }
 0x287   : > { %v9063_v26 = vrot.slane %v9049_v21, %v15414_v9  ;;  %v20489_v10 = vrot.slane %v17242_v5, %v15414_v9  ;;  %v2619_v1 = vrot.slane %v2591_v44, %v15414_v9  ;;  %v2620_v2 = vcombine.high %v2598_v56, %v2598_v56  ;;  %v20493_v21 = vld [vmem:[#allocation7_spill] sm:$0xff] }
 0x288   : > { %v2621_v57 = vcombine.high %v2605_v11, %v2605_v11  ;;  %v9914_v24 = vcombine.low %v2574_v61, %v2598_v56  ;;  %v2622_v55 = vcombine.high %v2612_v34, %v2612_v34  ;;  %v20492_v16 = vcombine.low %v20490_v25, %v20491_v0 }
 0x289   : > { %v9113_v54 = vcombine.low %v20489_v10, %v20488_v40  ;;  %v9064_v42 = vcombine.low %v9056_v53, %v9063_v26  ;;  %v20495_v13 = vcombine.low %v20493_v21, %v20494_v35  ;;  %v2623_v40 = vcombine.high %v2619_v1, %v2619_v1 }
 0x28a   : > { %v9738_v3 = vrot.slane %v20492_v16, %v15414_v9  ;;  %v9942_v44 = vrot.slane %v9914_v24, %v15414_v9  ;;  %v17807_v10 = vcombine.low %v2612_v34, %v2620_v2  ;;  %v17809_v61 = vcombine.low %v10977_v14, %v10984_v43 }
 0x28b   : > { %v9745_v7 = vrot.slane %v20495_v13, %v15414_v9  ;;  %14541 = vmatprep.mubr.msk.f32.mxu1 %vm268_vm0, %v9064_v42  ;;  %v20496_v0 = vrot.slane %v17179_v33, %v15414_v9  ;;  %v20497_v35 = vrot.slane %v17169_v6, %v15414_v9  ;;  %v10063_v26 = vrot.slane %v17208_v32, %v15414_v9 }
 0x28c   : > { %v9944_v25 = vcombine.low %v9935_v48, %v9942_v44  ;;  %v17820_v16 = vcombine.low %v2622_v55, %v2605_v11  ;;  %v17822_v34 = vcombine.low %v2619_v1, %v2621_v57  ;;  %v17825_v43 = vcombine.low %v2623_v40, %v17706_v22  ;;  %14542 = vmatmul.mubr.msk.f32.vlgmr.msra.gmra.mrb[62].mxu1 %vm268_vm0, %v9113_v54  ;;  %v20499_v11 = vld [vmem:[#allocation12_spill] sm:$0xff]  ;;  %v20500_v54 = vld [vmem:[#allocation29_spill] sm:$0xff] }
 0x28d   : > { %v9746_v56 = vcombine.low %v9738_v3, %v9745_v7  ;;  %v10056_v53 = vcombine.low %v20497_v35, %v20496_v0  ;;  %v20498_v7 = vld [vmem:[#allocation28_spill] sm:$0xff]  ;;  %v10119_v48 = vrot.slane %v17321_v37, %v15414_v9  ;;  %v5516_v22 = vcombine.high %v20499_v11, %v20499_v11  ;;  %v17864_v35 = vpop.f32.mrb[42].mxu0 }
 0x28e   : > { %v10112_v32 = vrot.slane %v20498_v7, %v15414_v9  ;;  %v9958_v55 = vrot.slane %v9944_v25, %v15414_v9  ;;  %v5523_v14 = vrot.slane %v20499_v11, %v15414_v9  ;;  %v5467_v1 = vcombine.high %v20500_v54, %v20500_v54 }
 0x28f   : > { %v14785_v3 = vpack.c.bf16 %v17176_v36, %v9746_v56  ;;  %v10070_v6 = vrot.slane %v10056_v53, %v15414_v9  ;;  %v5474_v2 = vrot.slane %v20500_v54, %v15414_v9  ;;  %v20501_v57 = vrot.slane %v17379_v19, %v15414_v9 }
 0x290   : > { %v20502_v37 = vrot.slane %v17388_v23, %v15414_v9  ;;  %v20503_v42 = vrot.slane %v17641_v8, %v15414_v9  ;;  %v10120_v13 = vcombine.low %v10112_v32, %v10119_v48  ;;  %v5530_v40 = vrot.slane %v5516_v22, %v15414_v9 }
 0x291   : > { %14787 = vmatprep.subr.msk.bf16.mxu0 %vm15827_vm1, %v14785_v3  ;;  %v10071_v36 = vcombine.low %v10063_v26, %v10070_v6  ;;  %v5531_v44 = vcombine.high %v5523_v14, %v5523_v14  ;;  %v5539_v56 = vrot.slane %v5523_v14, %v15414_v9  ;;  %v5481_v19 = vrot.slane %v5467_v1, %v15414_v9  ;;  %v20504_v1 = vld [vmem:[#allocation24_spill] sm:$0xff] }
 0x292   : > { %v9147_v24 = vcombine.low %v20502_v37, %v20501_v57  ;;  %v17856_v21 = vcombine.low %v20503_v42, %v9958_v55  ;;  %14790 = vmatpush3.bf16.xpose.msk.msra.mxu0 %vm15827_vm1, %v14785_v3  ;;  %v5482_v0 = vcombine.high %v5474_v2, %v5474_v2  ;;  %v5490_v23 = vrot.slane %v5474_v2, %v15414_v9 }
 0x293   : > { %v14791_v53 = vpack.c.bf16 %v10120_v13, %v10071_v36  ;;  %v5532_v8 = vcombine.high %v5530_v40, %v5530_v40  ;;  %v5546_v26 = vrot.slane %v5530_v40, %v15414_v9  ;;  %v5553_v25 = vrot.slane %v5531_v44, %v15414_v9 }
 0x294   : > { %v5483_v6 = vcombine.high %v5481_v19, %v5481_v19  ;;  %v5497_v3 = vrot.slane %v5481_v19, %v15414_v9  ;;  %v5504_v7 = vrot.slane %v5482_v0, %v15414_v9  ;;  %v9154_v32 = vrot.slane %v17390_v60, %v15414_v9 }
 0x295   : > { %14793 = vmatprep.subr.msk.bf16.mxu1 %vm15827_vm1, %v14791_v53  ;;  %v5560_v55 = vrot.slane %v5532_v8, %v15414_v9  ;;  %v11343_v48 = vcombine.low %v5539_v56, %v5553_v25  ;;  %v13971_v11 = vcombine.high %v5539_v56, %v5553_v25  ;;  %v9161_v22 = vrot.slane %v9147_v24, %v15414_v9 }
 0x296   : > { %14796 = vmatpush3.bf16.xpose.msk.msra.mxu1 %vm15827_vm1, %v14791_v53  ;;  %v5511_v14 = vrot.slane %v5483_v6, %v15414_v9  ;;  %v11294_v36 = vcombine.low %v5490_v23, %v5504_v7  ;;  %v13969_v54 = vcombine.high %v5490_v23, %v5504_v7  ;;  %v2722_v2 = vcombine.high %v20504_v1, %v20504_v1  ;;  %v17899_v53 = vpop.f32.mrb[43].mxu0 }
 0x297   : > { %v17882_v60 = vrot.slane %v11343_v48, %v15414_v9  ;;  %v17885_v57 = vrot.slane %v13971_v11, %v15414_v9  ;;  %v11390_v37 = vcombine.low %v5546_v26, %v5560_v55  ;;  %v13972_v42 = vcombine.high %v5546_v26, %v5560_v55  ;;  %v20506_v48 = vld [vmem:[#allocation26_spill] sm:$0xff] }
 0x298   : > { %v17888_v24 = vrot.slane %v11294_v36, %v15414_v9  ;;  %v17891_v13 = vrot.slane %v13969_v54, %v15414_v9  ;;  %v11341_v40 = vcombine.low %v5497_v3, %v5511_v14  ;;  %v13970_v44 = vcombine.high %v5497_v3, %v5511_v14 }
 0x299   : > { %v9162_v23 = vcombine.low %v9154_v32, %v9161_v22  ;;  %v17902_v8 = vrot.slane %v11390_v37, %v15414_v9  ;;  %v17905_v26 = vrot.slane %v13972_v42, %v15414_v9  ;;  %v2729_v6 = vrot.slane %v20504_v1, %v15414_v9 }
 0x29a   : > { %v17912_v3 = vrot.slane %v11341_v40, %v15414_v9  ;;  %v2736_v7 = vrot.slane %v2722_v2, %v15414_v9  ;;  %v20505_v32 = vcombine.high %v17356_v27, %v17356_v27  ;;  %v2673_v11 = vcombine.high %v20506_v48, %v20506_v48 }
 0x29b   : > { %14544 = vmatprep.mubr.msk.f32.mxu1 %vm268_vm0, %v9162_v23  ;;  %v17923_v22 = vrot.slane %v13970_v44, %v15414_v9  ;;  %v2737_v14 = vcombine.high %v2729_v6, %v2729_v6  ;;  %v2745_v36 = vrot.slane %v2729_v6, %v15414_v9  ;;  %v2680_v54 = vrot.slane %v20506_v48, %v15414_v9  ;;  %v20507_v44 = vld [vmem:[#allocation22_spill] sm:$0xff] }
 0x29c   : > { %v9169_v55 = vrot.slane %v20505_v32, %v15414_v9  ;;  %v2738_v1 = vcombine.high %v2736_v7, %v2736_v7  ;;  %v2752_v2 = vrot.slane %v2736_v7, %v15414_v9  ;;  %v2687_v27 = vrot.slane %v2673_v11, %v15414_v9 }
 0x29d   : > { %v2759_v42 = vrot.slane %v2737_v14, %v15414_v9  ;;  %v2688_v40 = vcombine.high %v2680_v54, %v2680_v54  ;;  %v2696_v23 = vrot.slane %v2680_v54, %v15414_v9  ;;  %v9472_v32 = vcombine.low %v20507_v44, %v17311_v39  ;;  %v20509_v44 = vld [vmem:[#allocation17_spill] sm:$0xff] }
 0x29e   : > { %v9176_v37 = vrot.slane %v9169_v55, %v15414_v9  ;;  %v2766_v6 = vrot.slane %v2738_v1, %v15414_v9  ;;  %v2689_v48 = vcombine.high %v2687_v27, %v2687_v27  ;;  %v2703_v0 = vrot.slane %v2687_v27, %v15414_v9 }
 0x29f   : > { %v20508_v7 = vcombine.low %v17284_v52, %v17287_v12  ;;  %v10337_v11 = vcombine.low %v2745_v36, %v2759_v42  ;;  %v13938_v14 = vcombine.high %v2745_v36, %v2759_v42  ;;  %v2710_v25 = vrot.slane %v2688_v40, %v15414_v9 }
 0x2a0   : > { %14545 = vmatmul.mubr.msk.f32.gmra.mrb[64].mxu1 %vm268_vm0, %v9176_v37  ;;  %v9486_v54 = vrot.slane %v9472_v32, %v15414_v9  ;;  %v10384_v1 = vcombine.low %v2752_v2, %v2766_v6  ;;  %v2717_v37 = vrot.slane %v2689_v48, %v15414_v9  ;;  %v5614_v27 = vcombine.high %v20509_v44, %v20509_v44 }
 0x2a1   : > { %v9479_v55 = vrot.slane %v20508_v7, %v15414_v9  ;;  %v13939_v52 = vcombine.high %v2752_v2, %v2766_v6  ;;  %v10288_v12 = vcombine.low %v2696_v23, %v2710_v25  ;;  %v13936_v7 = vcombine.high %v2696_v23, %v2710_v25 }
 0x2a2   : > { %v10365_v36 = vrot.slane %v10337_v11, %v15414_v9  ;;  %v17953_v42 = vrot.slane %v13938_v14, %v15414_v9  ;;  %v10335_v40 = vcombine.low %v2703_v0, %v2717_v37  ;;  %v13937_v32 = vcombine.high %v2703_v0, %v2717_v37 }
 0x2a3   : > { %v17956_v39 = vrot.slane %v10288_v12, %v15414_v9  ;;  %v10344_v48 = vrot.slane %v13936_v7, %v15414_v9  ;;  %v9487_v19 = vcombine.low %v9479_v55, %v9486_v54  ;;  %v5621_v33 = vrot.slane %v20509_v44, %v15414_v9 }
 0x2a4   : > { %v17962_v2 = vrot.slane %v10384_v1, %v15414_v9  ;;  %v10351_v25 = vrot.slane %v10335_v40, %v15414_v9  ;;  %v10358_v23 = vrot.slane %v13937_v32, %v15414_v9  ;;  %v5628_v6 = vrot.slane %v5614_v27, %v15414_v9  ;;  %v17999_v32 = vpop.f32.mrb[44].mxu0 }
 0x2a5   : > { %14555 = vmatprep.mubr.msk.f32.mxu0 %vm268_vm0, %v9487_v19  ;;  %v5629_v11 = vcombine.high %v5621_v33, %v5621_v33  ;;  %v17971_v55 = vrot.slane %v5621_v33, %v15414_v9  ;;  %v20510_v14 = vrot.slane %v17317_v59, %v15414_v9  ;;  %v20511_v54 = vrot.slane %v17315_v63, %v15414_v9 }
 0x2a6   : > { %v10366_v37 = vcombine.low %v10344_v48, %v10351_v25  ;;  %v10367_v44 = vcombine.low %v10358_v23, %v10365_v36  ;;  %v5630_v12 = vcombine.high %v5628_v6, %v5628_v6  ;;  %v5644_v27 = vrot.slane %v5628_v6, %v15414_v9  ;;  %20513 = vst [vmem:[#allocation8_spill] sm:$0xff] %v17999_v32  ;;  %v20514_v6 = vld [vmem:[#allocation6_spill] sm:$0xff] }
 0x2a7   : > { %v10154_v1 = vcombine.low %v20511_v54, %v20510_v14  ;;  %v20512_v7 = vcombine.low %v17543_v38, %v17555_v29  ;;  %v5651_v33 = vrot.slane %v5629_v11, %v15414_v9  ;;  %v5659_v19 = vcombine.high %v17971_v55, %v17971_v55  ;;  %v20516_v54 = vld [vmem:[#allocation25_spill] sm:$0xff] }
 0x2a8   : > { %v10161_v59 = vrot.slane %v17365_v30, %v15414_v9  ;;  %v17991_v36 = vrot.slane %v13939_v52, %v15414_v9  ;;  %v17994_v40 = vrot.slane %v10366_v37, %v15414_v9  ;;  %v17997_v38 = vrot.slane %v10367_v44, %v15414_v9 }
 0x2a9   : > { %14556 = vmatmul.mubr.msk.f32.vlgmr.msra.gmra.mrb[66].mxu0 %vm268_vm0, %v20512_v7  ;;  %v10168_v63 = vrot.slane %v10154_v1, %v15414_v9  ;;  %v5660_v29 = vcombine.high %v5644_v27, %v5644_v27  ;;  %v5661_v48 = vcombine.high %v5651_v33, %v5651_v33  ;;  %v11717_v25 = vcombine.low %v5651_v33, %v5659_v19  ;;  %v20517_v1 = vld [vmem:[#allocation23_spill] sm:$0xff]  ;;  %v18017_v19 = vpop.f32.mrb[45].mxu0 }
 0x2aa   : > { %v20515_v30 = vrot.slane %v20514_v6, %v15414_v9  ;;  %v20518_v37 = vcombine.low %v20516_v54, %v20517_v1  ;;  %v20519_v7 = vcombine.low %v17277_v62, %v17435_v41  ;;  %20520 = vst [vmem:[#allocation30_spill] sm:$0xff] %v18017_v19  ;;  %v20522_v54 = vcombine.low %v17451_v46, %v17432_v31  ;;  %v20523_v62 = vld [vmem:[#allocation3_spill] sm:$0xff] }
 0x2ab   : > { %v10169_v23 = vcombine.low %v10161_v59, %v10168_v63  ;;  %v18020_v59 = vrot.slane %v5630_v12, %v15414_v9  ;;  %v11718_v63 = vcombine.low %v5661_v48, %v5644_v27  ;;  %v2820_v41 = vcombine.high %v20523_v62, %v20523_v62 }
 0x2ac   : > { %v10183_v11 = vrot.slane %v20515_v30, %v15414_v9  ;;  %v10486_v44 = vrot.slane %v20518_v37, %v15414_v9  ;;  %v10493_v33 = vrot.slane %v20519_v7, %v15414_v9  ;;  %v20521_v30 = vcombine.low %v17441_v47, %v17462_v4  ;;  %v20524_v47 = vld [vmem:[#allocation10_spill] sm:$0xff] }
 0x2ad   : > { %v10542_v1 = vrot.slane %v20522_v54, %v15414_v9  ;;  %v2827_v12 = vrot.slane %v20523_v62, %v15414_v9  ;;  %v11739_v27 = vrot.slane %v11717_v25, %v15414_v9  ;;  %v18036_v48 = vcombine.low %v18020_v59, %v5660_v29 }
 0x2ae   : > { %v14797_v6 = vpack.c.bf16 %v10183_v11, %v10169_v23  ;;  %v10535_v52 = vrot.slane %v20521_v30, %v15414_v9  ;;  %v10494_v5 = vcombine.low %v10486_v44, %v10493_v33  ;;  %v5565_v4 = vcombine.high %v20524_v47, %v20524_v47 }
 0x2af   : > { %v5572_v31 = vrot.slane %v20524_v47, %v15414_v9  ;;  %v2834_v23 = vrot.slane %v2820_v41, %v15414_v9  ;;  %v2835_v11 = vcombine.high %v2827_v12, %v2827_v12  ;;  %v18046_v37 = vrot.slane %v2827_v12, %v15414_v9  ;;  %v20526_v47 = vld [vmem:[#allocation21_spill] sm:$0xff] }
 0x2b0   : > { %14799 = vmatprep.subr.msk.bf16.mxu1 %vm15827_vm1, %v14797_v6  ;;  %v10543_v46 = vcombine.low %v10535_v52, %v10542_v1  ;;  %v11746_v29 = vrot.slane %v11718_v63, %v15414_v9  ;;  %v5579_v25 = vrot.slane %v5565_v4, %v15414_v9  ;;  %v2771_v4 = vcombine.high %v20526_v47, %v20526_v47 }
 0x2b1   : > { %14802 = vmatpush3.bf16.xpose.msk.msra.mxu1 %vm15827_vm1, %v14797_v6  ;;  %v5580_v44 = vcombine.high %v5572_v31, %v5572_v31  ;;  %v5588_v7 = vrot.slane %v5572_v31, %v15414_v9  ;;  %v2836_v30 = vcombine.high %v2834_v23, %v2834_v23  ;;  %v2850_v52 = vrot.slane %v2834_v23, %v15414_v9  ;;  %v18068_v31 = vpop.f32.mrb[46].mxu0 }
 0x2b2   : > { %v14803_v33 = vpack.c.bf16 %v10543_v46, %v10494_v5  ;;  %v2857_v54 = vrot.slane %v2835_v11, %v15414_v9  ;;  %v2865_v1 = vcombine.high %v18046_v37, %v18046_v37  ;;  %v5581_v62 = vcombine.high %v5579_v25, %v5579_v25  ;;  %20527 = vst [vmem:[#allocation7_spill] sm:$0xff] %v18068_v31 }
 0x2b3   : > { %v18058_v41 = vrot.slane %v5579_v25, %v15414_v9  ;;  %v5602_v63 = vrot.slane %v5580_v44, %v15414_v9  ;;  %v18064_v6 = vrot.slane %v2836_v30, %v15414_v9  ;;  %v2866_v5 = vcombine.high %v2850_v52, %v2850_v52 }
 0x2b4   : > { %14805 = vmatprep.subr.msk.bf16.mxu0 %vm15827_vm1, %v14803_v33  ;;  %v2867_v12 = vcombine.high %v2857_v54, %v2857_v54  ;;  %v5609_v46 = vrot.slane %v5581_v62, %v15414_v9  ;;  %v2778_v25 = vrot.slane %v20526_v47, %v15414_v9  ;;  %v18077_v44 = vcombine.low %v2857_v54, %v2865_v1  ;;  %v18099_v1 = vpop.f32.mrb[47].mxu0 }
 0x2b5   : > { %20525 = vst [vmem:[#allocation5_spill] sm:$0xff] %v18058_v41  ;;  %v5611_v23 = vcombine.high %v18058_v41, %v18058_v41  ;;  %v11392_v11 = vcombine.low %v5588_v7, %v5602_v63  ;;  %14808 = vmatpush3.bf16.xpose.msk.msra.mxu0 %vm15827_vm1, %v14803_v33  ;;  %v10758_v14 = vcombine.low %v18064_v6, %v2866_v5  ;;  %20533 = vst [vmem:[#allocation26_spill] sm:$0xff] %v18099_v1 }
 0x2b6   : > { %v10757_v30 = vcombine.low %v2867_v12, %v2850_v52  ;;  %v13973_v0 = vcombine.high %v5588_v7, %v5602_v63  ;;  %v18080_v56 = vcombine.low %v11739_v27, %v11746_v29  ;;  %v5613_v31 = vcombine.high %v5609_v46, %v5609_v46 }
 0x2b7   : > { %v18083_v62 = vrot.slane %v11392_v11, %v15414_v9  ;;  %v18085_v19 = vcombine.low %v5609_v46, %v5611_v23  ;;  %v10774_v33 = vrot.slane %v10758_v14, %v15414_v9  ;;  %v2785_v52 = vrot.slane %v2771_v4, %v15414_v9 }
 0x2b8   : > { %20528 = vst [vmem:[#allocation9_spill] sm:$0xff] %v18080_v56  ;;  %v10767_v32 = vrot.slane %v10757_v30, %v15414_v9  ;;  %v18090_v47 = vrot.slane %v13973_v0, %v15414_v9  ;;  %v18096_v27 = vcombine.low %v5613_v31, %v17971_v55  ;;  %v2786_v29 = vcombine.high %v2778_v25, %v2778_v25  ;;  %v20534_v31 = vld [vmem:[#allocation27_spill] sm:$0xff] }
 0x2b9   : > { %20529 = vst [vmem:[#allocation28_spill] sm:$0xff] %v18083_v62  ;;  %20530 = vst [vmem:[#allocation12_spill] sm:$0xff] %v18085_v19  ;;  %v2794_v54 = vrot.slane %v2778_v25, %v15414_v9  ;;  %v2787_v14 = vcombine.high %v2785_v52, %v2785_v52  ;;  %v2801_v5 = vrot.slane %v2785_v52, %v15414_v9 }
 0x2ba   : > { %20531 = vst [vmem:[#allocation29_spill] sm:$0xff] %v18090_v47  ;;  %20532 = vst [vmem:[#allocation24_spill] sm:$0xff] %v18096_v27  ;;  %v18106_v12 = vcombine.low %v10767_v32, %v10774_v33  ;;  %v2808_v4 = vrot.slane %v2786_v29, %v15414_v9  ;;  %v5712_v46 = vcombine.high %v20534_v31, %v20534_v31 }
 0x2bb   : > { %v2815_v11 = vrot.slane %v2787_v14, %v15414_v9  ;;  %v2817_v25 = vcombine.high %v2801_v5, %v2801_v5  ;;  %v5719_v30 = vrot.slane %v20534_v31, %v15414_v9  ;;  %v2816_v52 = vcombine.high %v2794_v54, %v2794_v54 }
 0x2bc   : > { %v2818_v32 = vcombine.high %v2808_v4, %v2808_v4  ;;  %v10386_v33 = vcombine.low %v2794_v54, %v2808_v4  ;;  %v5726_v0 = vrot.slane %v5712_v46, %v15414_v9 }
 0x2bd   : > { %v2819_v7 = vcombine.high %v2815_v11, %v2815_v11  ;;  %v18119_v55 = vcombine.low %v2815_v11, %v2817_v25  ;;  %v5727_v29 = vcombine.high %v5719_v30, %v5719_v30  ;;  %v5735_v63 = vrot.slane %v5719_v30, %v15414_v9  ;;  %v18156_v11 = vpop.f32.mrb[48].mxu0 }
 0x2be   : > { %v18125_v14 = vrot.slane %v10386_v33, %v15414_v9  ;;  %v18127_v1 = vcombine.low %v2818_v32, %v2801_v5  ;;  %v5728_v31 = vcombine.high %v5726_v0, %v5726_v0  ;;  %v5742_v54 = vrot.slane %v5726_v0, %v15414_v9  ;;  %20537 = vst [vmem:[#allocation17_spill] sm:$0xff] %v18156_v11 }
 0x2bf   : > { %v18130_v56 = vcombine.low %v2819_v7, %v18046_v37  ;;  %v5749_v4 = vrot.slane %v5727_v29, %v15414_v9  ;;  %v5757_v46 = vcombine.high %v5735_v63, %v5735_v63  ;;  %v18137_v25 = vrot.slane %v2816_v52, %v15414_v9  ;;  %v20536_v7 = vld [vmem:[#allocation46_spill] sm:$0xff] }
 0x2c0   : > { %v18142_v5 = vrot.slane %v5728_v31, %v15414_v9  ;;  %v5663_v0 = vcombine.high %v20536_v7, %v20536_v7  ;;  %v5670_v33 = vrot.slane %v20536_v7, %v15414_v9  ;;  %v5662_v30 = vcombine.high %v18020_v59, %v18020_v59  ;;  %v20538_v52 = vld [vmem:[#allocation34_spill] sm:$0xff] }
 0x2c1   : > { %v5759_v32 = vcombine.high %v5749_v4, %v5749_v4  ;;  %v11815_v37 = vcombine.low %v5749_v4, %v5757_v46  ;;  %v9570_v31 = vcombine.low %v17503_v45, %v17563_v15  ;;  %v11774_v29 = vrot.slane %v18036_v48, %v15414_v9 }
 0x2c2   : > { %20535 = vst [vmem:[#allocation22_spill] sm:$0xff] %v18142_v5  ;;  %v13996_v46 = vcombine.high %v5742_v54, %v18142_v5  ;;  %v5677_v23 = vrot.slane %v5663_v0, %v15414_v9  ;;  %v5678_v7 = vcombine.high %v5670_v33, %v5670_v33  ;;  %v5686_v19 = vrot.slane %v5670_v33, %v15414_v9 }
 0x2c3   : > { %v11816_v4 = vcombine.low %v5759_v32, %v5742_v54  ;;  %v20539_v59 = vcombine.low %v17496_v17, %v20538_v52  ;;  %v9584_v45 = vrot.slane %v9570_v31, %v15414_v9  ;;  %v11837_v15 = vrot.slane %v11815_v37, %v15414_v9 }
 0x2c4   : > { %v5679_v32 = vcombine.high %v5677_v23, %v5677_v23  ;;  %v5693_v54 = vrot.slane %v5677_v23, %v15414_v9  ;;  %v5700_v0 = vrot.slane %v5678_v7, %v15414_v9  ;;  %v5708_v33 = vcombine.high %v5686_v19, %v5686_v19  ;;  %v20541_v23 = vld [vmem:[#allocation16_spill] sm:$0xff] }
 0x2c5   : > { %v9577_v27 = vrot.slane %v20539_v59, %v15414_v9  ;;  %v11844_v11 = vrot.slane %v11816_v4, %v15414_v9  ;;  %v11765_v5 = vcombine.low %v5662_v30, %v5686_v19  ;;  %v20540_v17 = vrot.slane %v17630_v28, %v15414_v9 }
 0x2c6   : > { %v5707_v48 = vrot.slane %v5679_v32, %v15414_v9  ;;  %v5709_v47 = vcombine.high %v5693_v54, %v5693_v54  ;;  %v5710_v62 = vcombine.high %v5700_v0, %v5700_v0  ;;  %v11766_v37 = vcombine.low %v5700_v0, %v5708_v33 }
 0x2c7   : > { %v9585_v41 = vcombine.low %v9577_v27, %v9584_v45  ;;  %v9599_v52 = vrot.slane %v20540_v17, %v15414_v9  ;;  %v11781_v31 = vrot.slane %v11765_v5, %v15414_v9  ;;  %v2918_v4 = vcombine.high %v20541_v23, %v20541_v23  ;;  %v18183_v27 = vpop.f32.mrb[49].mxu0 }
 0x2c8   : > { %v2925_v19 = vrot.slane %v20541_v23, %v15414_v9  ;;  %20542 = vst [vmem:[#allocation6_spill] sm:$0xff] %v18183_v27  ;;  %v18186_v30 = vrot.slane %v13996_v46, %v15414_v9  ;;  %v5711_v7 = vcombine.high %v5707_v48, %v5707_v48  ;;  %v11767_v59 = vcombine.low %v5710_v62, %v5693_v54 }
 0x2c9   : > { %14558 = vmatprep.mubr.msk.f32.mxu0 %vm268_vm0, %v9585_v41  ;;  %v18188_v28 = vcombine.low %v5707_v48, %v5709_v47  ;;  %v11788_v5 = vrot.slane %v11766_v37, %v15414_v9  ;;  %v18192_v41 = vcombine.low %v11774_v29, %v11781_v31  ;;  %v2932_v45 = vrot.slane %v2918_v4, %v15414_v9  ;;  %v20547_v48 = vld [vmem:[#allocation18_spill] sm:$0xff] }
 0x2ca   : > { %14559 = vmatmul.mubr.msk.f32.gmra.mrb[68].mxu0 %vm268_vm0, %v9599_v52  ;;  %v2933_v32 = vcombine.high %v2925_v19, %v2925_v19  ;;  %v18195_v0 = vcombine.low %v11837_v15, %v11844_v11  ;;  %v11795_v33 = vrot.slane %v11767_v59, %v15414_v9  ;;  %v18198_v17 = vcombine.low %v5711_v7, %v5735_v63  ;;  %v20552_v52 = vld [vmem:[#allocation45_spill] sm:$0xff] }
 0x2cb   : > { %20543 = vst [vmem:[#allocation25_spill] sm:$0xff] %v18188_v28  ;;  %v2941_v46 = vrot.slane %v2925_v19, %v15414_v9  ;;  %v2934_v62 = vcombine.high %v2932_v45, %v2932_v45  ;;  %v2948_v47 = vrot.slane %v2932_v45, %v15414_v9  ;;  %v2869_v29 = vcombine.high %v20547_v48, %v20547_v48 }
 0x2cc   : > { %20544 = vst [vmem:[#allocation23_spill] sm:$0xff] %v18195_v0  ;;  %20545 = vst [vmem:[#allocation3_spill] sm:$0xff] %v18198_v17  ;;  %v18203_v54 = vrot.slane %v2933_v32, %v15414_v9  ;;  %v2868_v15 = vcombine.high %v18064_v6, %v18064_v6  ;;  %v2876_v63 = vrot.slane %v20547_v48, %v15414_v9 }
 0x2cd   : > { %v2963_v11 = vcombine.high %v2941_v46, %v2941_v46  ;;  %v18213_v37 = vcombine.low %v11788_v5, %v11795_v33  ;;  %v2962_v23 = vrot.slane %v2934_v62, %v15414_v9  ;;  %v2883_v4 = vrot.slane %v2869_v29, %v15414_v9  ;;  %v20550_v33 = vld [vmem:[#allocation43_spill] sm:$0xff] }
 0x2ce   : > { %20546 = vst [vmem:[#allocation10_spill] sm:$0xff] %v18203_v54  ;;  %v2884_v7 = vcombine.high %v2876_v63, %v2876_v63  ;;  %v2892_v59 = vrot.slane %v2876_v63, %v15414_v9  ;;  %v9893_v6 = vrot.slane %v17676_v49, %v15414_v9  ;;  %v20551_v48 = vrot.slane %v20550_v33, %v15414_v9 }
 0x2cf   : > { %20548 = vst [vmem:[#allocation21_spill] sm:$0xff] %v18213_v37  ;;  %v18220_v19 = vcombine.low %v18203_v54, %v2963_v11  ;;  %v11131_v45 = vcombine.low %v2948_v47, %v2962_v23  ;;  %v2885_v32 = vcombine.high %v2883_v4, %v2883_v4  ;;  %v2899_v5 = vrot.slane %v2883_v4, %v15414_v9 }
 0x2d0   : > { %v20553_v62 = vrot.slane %v20552_v52, %v15414_v9  ;;  %v13962_v31 = vcombine.high %v2948_v47, %v2962_v23  ;;  %v2906_v11 = vrot.slane %v2884_v7, %v15414_v9  ;;  %v2914_v27 = vcombine.high %v2892_v59, %v2892_v59  ;;  %v20554_v52 = vld [vmem:[#allocation13_spill] sm:$0xff] }
 0x2d1   : > { %20549 = vst [vmem:[#allocation27_spill] sm:$0xff] %v18220_v19  ;;  %v10759_v0 = vcombine.low %v2868_v15, %v2892_v59  ;;  %v2913_v4 = vrot.slane %v2885_v32, %v15414_v9  ;;  %v2915_v28 = vcombine.high %v2899_v5, %v2899_v5  ;;  %v20555_v47 = vrot.slane %v20554_v52, %v15414_v9 }
 0x2d2   : > { %v9894_v29 = vcombine.low %v20553_v62, %v20551_v48  ;;  %v2916_v17 = vcombine.high %v2906_v11, %v2906_v11  ;;  %v10760_v33 = vcombine.low %v2906_v11, %v2914_v27  ;;  %v18243_v7 = vrot.slane %v11131_v45, %v15414_v9  ;;  %v20557_v48 = vld [vmem:[#allocation15_spill] sm:$0xff]  ;;  %v20562_v11 = vld [vmem:[#allocation32_spill] sm:$0xff] }
 0x2d3   : > { %v10781_v37 = vrot.slane %v10759_v0, %v15414_v9  ;;  %v9895_v23 = vcombine.low %v20555_v47, %v9893_v6  ;;  %v2917_v15 = vcombine.high %v2913_v4, %v2913_v4  ;;  %v20558_v62 = vld [vmem:[#allocation19_spill] sm:$0xff]  ;;  %v18251_v49 = vrot.slane %v13962_v31, %v15414_v9  ;;  %v20561_v6 = vld [vmem:[#allocation14_spill] sm:$0xff] }
 0x2d4   : > { %20556 = vst [vmem:[#allocation46_spill] sm:$0xff] %v18243_v7  ;;  %v9902_v59 = vrot.slane %v9894_v29, %v15414_v9  ;;  %v20559_v63 = vcombine.low %v20557_v48, %v20558_v62  ;;  %v10788_v27 = vrot.slane %v10760_v33, %v15414_v9  ;;  %v20563_v45 = vcombine.low %v20561_v6, %v20562_v11  ;;  %v20564_v7 = vld [vmem:[#allocation42_spill] sm:$0xff]  ;;  %v20567_v62 = vld [vmem:[#allocation39_spill] sm:$0xff] }
 0x2d5   : > { %20560 = vst [vmem:[#allocation34_spill] sm:$0xff] %v18251_v49  ;;  %v9909_v0 = vrot.slane %v9895_v23, %v15414_v9  ;;  %v18259_v47 = vcombine.low %v2913_v4, %v2915_v28  ;;  %v18261_v29 = vcombine.low %v2917_v15, %v2941_v46  ;;  %v10606_v48 = vrot.slane %v20564_v7, %v15414_v9  ;;  %v20569_v28 = vld [vmem:[#allocation11_spill] sm:$0xff]  ;;  %v20570_v15 = vld [vmem:[#allocation41_spill] sm:$0xff] }
 0x2d6   : > { %v10584_v32 = vrot.slane %v20559_v63, %v15414_v9  ;;  %v10591_v52 = vrot.slane %v20563_v45, %v15414_v9  ;;  %v20565_v63 = vld [vmem:[#allocation4_spill] sm:$0xff]  ;;  %v20568_v33 = vrot.slane %v20567_v62, %v15414_v9  ;;  %v10790_v23 = vcombine.low %v10781_v37, %v10788_v27  ;;  %v20572_v27 = vld [vmem:[#allocation31_spill] sm:$0xff] }
 0x2d7   : > { %v20566_v31 = vrot.slane %v20565_v63, %v15414_v9  ;;  %v18271_v54 = vcombine.low %v2916_v17, %v2899_v5  ;;  %v9910_v19 = vcombine.low %v9902_v59, %v9909_v0  ;;  %v10909_v4 = vrot.slane %v20569_v28, %v15414_v9  ;;  %v20571_v17 = vld [vmem:[#allocation20_spill] sm:$0xff] }
 0x2d8   : > { %v10592_v6 = vcombine.low %v10584_v32, %v10591_v52  ;;  %v10958_v7 = vrot.slane %v20570_v15, %v15414_v9  ;;  %v10965_v11 = vrot.slane %v17777_v51, %v15414_v9  ;;  %v10804_v45 = vrot.slane %v10790_v23, %v15414_v9 }
 0x2d9   : > { %v10902_v49 = vcombine.low %v20568_v33, %v20566_v31  ;;  %14569 = vmatprep.mubr.msk.f32.mxu1 %vm268_vm0, %v9910_v19  ;;  %v5810_v5 = vcombine.high %v20571_v17, %v20571_v17  ;;  %v5817_v59 = vrot.slane %v20571_v17, %v15414_v9  ;;  %v5761_v0 = vcombine.high %v20572_v27, %v20572_v27 }
 0x2da   : > { %v14809_v37 = vpack.c.bf16 %v10606_v48, %v10592_v6  ;;  %14570 = vmatmul.mubr.msk.f32.vlgmr.msra.gmra.mrb[66].mxu1 %vm268_vm0, %v17856_v21  ;;  %v10966_v32 = vcombine.low %v10958_v7, %v10965_v11  ;;  %v5768_v51 = vrot.slane %v20572_v27, %v15414_v9  ;;  %v20573_v19 = vrot.slane %v18106_v12, %v15414_v9 }
 0x2db   : > { %v10916_v46 = vrot.slane %v10902_v49, %v15414_v9  ;;  %v5824_v48 = vrot.slane %v5810_v5, %v15414_v9  ;;  %v5825_v63 = vcombine.high %v5817_v59, %v5817_v59  ;;  %v5833_v21 = vrot.slane %v5817_v59, %v15414_v9 }
 0x2dc   : > { %v18295_v52 = vcombine.low %v20573_v19, %v10804_v45  ;;  %14811 = vmatprep.subr.msk.bf16.mxu0 %vm15827_vm1, %v14809_v37  ;;  %v5775_v62 = vrot.slane %v5761_v0, %v15414_v9  ;;  %v5776_v33 = vcombine.high %v5768_v51, %v5768_v51  ;;  %v5784_v23 = vrot.slane %v5768_v51, %v15414_v9 }
 0x2dd   : > { %v10917_v49 = vcombine.low %v10909_v4, %v10916_v46  ;;  %14814 = vmatpush3.bf16.xpose.msk.msra.mxu0 %vm15827_vm1, %v14809_v37  ;;  %v5826_v12 = vcombine.high %v5824_v48, %v5824_v48  ;;  %v5840_v6 = vrot.slane %v5824_v48, %v15414_v9  ;;  %v5847_v28 = vrot.slane %v5825_v63, %v15414_v9 }
 0x2de   : > { %v9991_v4 = vrot.slane %v17825_v43, %v15414_v9  ;;  %v5777_v46 = vcombine.high %v5775_v62, %v5775_v62  ;;  %v5791_v15 = vrot.slane %v5775_v62, %v15414_v9  ;;  %v5798_v7 = vrot.slane %v5776_v33, %v15414_v9 }
 0x2df   : > { %v14815_v31 = vpack.c.bf16 %v10966_v32, %v10917_v49  ;;  %v20574_v11 = vrot.slane %v17820_v16, %v15414_v9  ;;  %v20575_v45 = vrot.slane %v17807_v10, %v15414_v9  ;;  %v5854_v43 = vrot.slane %v5826_v12, %v15414_v9  ;;  %v20577_v12 = vld [vmem:[#allocation33_spill] sm:$0xff] }
 0x2e0   : > { %v12188_v17 = vcombine.low %v5833_v21, %v5847_v28  ;;  %v13999_v5 = vcombine.high %v5833_v21, %v5847_v28  ;;  %v20576_v59 = vrot.slane %v17822_v34, %v15414_v9  ;;  %v5805_v16 = vrot.slane %v5777_v46, %v15414_v9 }
 0x2e1   : > { %14817 = vmatprep.subr.msk.bf16.mxu1 %vm15827_vm1, %v14815_v31  ;;  %v9992_v37 = vcombine.low %v20575_v45, %v20574_v11  ;;  %v12139_v27 = vcombine.low %v5784_v23, %v5798_v7  ;;  %v13997_v0 = vcombine.high %v5784_v23, %v5798_v7  ;;  %v12190_v51 = vcombine.low %v5840_v6, %v5854_v43 }
 0x2e2   : > { %14820 = vmatpush3.bf16.xpose.msk.msra.mxu1 %vm15827_vm1, %v14815_v31  ;;  %v9993_v49 = vcombine.low %v20576_v59, %v9991_v4  ;;  %v14000_v19 = vcombine.high %v5840_v6, %v5854_v43  ;;  %v18332_v63 = vrot.slane %v12188_v17, %v15414_v9  ;;  %v12141_v21 = vcombine.low %v5791_v15, %v5805_v16  ;;  %v20579_v59 = vld [vmem:[#allocation37_spill] sm:$0xff] }
 0x2e3   : > { %v10000_v48 = vrot.slane %v9992_v37, %v15414_v9  ;;  %v18335_v34 = vrot.slane %v12139_v27, %v15414_v9  ;;  %v13998_v31 = vcombine.high %v5791_v15, %v5805_v16  ;;  %v18338_v62 = vrot.slane %v13999_v5, %v15414_v9 }
 0x2e4   : > { %v18341_v33 = vrot.slane %v13997_v0, %v15414_v9  ;;  %v10007_v23 = vrot.slane %v9993_v49, %v15414_v9  ;;  %v3016_v6 = vcombine.high %v20577_v12, %v20577_v12  ;;  %v18347_v28 = vrot.slane %v12190_v51, %v15414_v9  ;;  %v20581_v51 = vld [vmem:[#allocation35_spill] sm:$0xff] }
 0x2e5   : > { %v18352_v46 = vrot.slane %v13998_v31, %v15414_v9  ;;  %v3023_v15 = vrot.slane %v20577_v12, %v15414_v9  ;;  %v18357_v7 = vrot.slane %v14000_v19, %v15414_v9  ;;  %v18360_v11 = vrot.slane %v12141_v21, %v15414_v9  ;;  %v20582_v31 = vld [vmem:[#allocation50_spill] sm:$0xff] }
 0x2e6   : > { %v10008_v45 = vcombine.low %v10000_v48, %v10007_v23  ;;  %v3030_v37 = vrot.slane %v3016_v6, %v15414_v9  ;;  %v20580_v49 = vrot.slane %v20579_v59, %v15414_v9  ;;  %v2967_v19 = vcombine.high %v20581_v51, %v20581_v51  ;;  %v18388_v59 = vpop.f32.mrb[50].mxu0 }
 0x2e7   : > { %20578 = vst [vmem:[#allocation16_spill] sm:$0xff] %v18357_v7  ;;  %v3031_v17 = vcombine.high %v3023_v15, %v3023_v15  ;;  %v3039_v5 = vrot.slane %v3023_v15, %v15414_v9  ;;  %v2974_v48 = vrot.slane %v20581_v51, %v15414_v9  ;;  %v20583_v23 = vcombine.low %v17744_v20, %v20582_v31  ;;  %v18395_v31 = vpop.f32.mrb[51].mxu0 }
 0x2e8   : > { %v10022_v16 = vrot.slane %v20580_v49, %v15414_v9  ;;  %14572 = vmatprep.mubr.msk.f32.mxu1 %vm268_vm0, %v10008_v45  ;;  %v3032_v27 = vcombine.high %v3030_v37, %v3030_v37  ;;  %v3046_v0 = vrot.slane %v3030_v37, %v15414_v9  ;;  %v20584_v6 = vcombine.low %v17756_v50, %v17956_v39  ;;  %v20585_v45 = vld [vmem:[#allocation40_spill] sm:$0xff]  ;;  %v18390_v49 = vpop.f32.mrb[50].mxu1  ;;  %v18401_v4 = vpop.f32.mrb[52].mxu0 }
 0x2e9   : > { %v3053_v21 = vrot.slane %v3031_v17, %v15414_v9  ;;  %v10325_v12 = vrot.slane %v20583_v23, %v15414_v9  ;;  %v5908_v37 = vcombine.high %v20585_v45, %v20585_v45  ;;  %20586 = vst [vmem:[#allocation18_spill] sm:$0xff] %v18388_v59  ;;  %20587 = vst [vmem:[#allocation43_spill] sm:$0xff] %v18390_v49  ;;  %v18397_v23 = vpop.f32.mrb[51].mxu1 }
 0x2ea   : > { %14573 = vmatmul.mubr.msk.f32.gmra.mrb[68].mxu1 %vm268_vm0, %v10022_v16  ;;  %v10332_v15 = vrot.slane %v20584_v6, %v15414_v9  ;;  %v3060_v17 = vrot.slane %v3032_v27, %v15414_v9  ;;  %v2981_v16 = vrot.slane %v2967_v19, %v15414_v9  ;;  %v2982_v51 = vcombine.high %v2974_v48, %v2974_v48  ;;  %v18403_v10 = vpop.f32.mrb[52].mxu1 }
 0x2eb   : > { %v2990_v20 = vrot.slane %v2974_v48, %v15414_v9  ;;  %20588 = vst [vmem:[#allocation45_spill] sm:$0xff] %v18395_v31  ;;  %20589 = vst [vmem:[#allocation13_spill] sm:$0xff] %v18397_v23  ;;  %v11182_v50 = vcombine.low %v3039_v5, %v3053_v21  ;;  %v13965_v39 = vcombine.high %v3039_v5, %v3053_v21  ;;  %v18406_v48 = vpop.f32.mrb[53].mxu0  ;;  %v18408_v31 = vpop.f32.mrb[53].mxu1 }
 0x2ec   : > { %v10333_v6 = vcombine.low %v10325_v12, %v10332_v15  ;;  %v5915_v43 = vrot.slane %v20585_v45, %v15414_v9  ;;  %20590 = vst [vmem:[#allocation15_spill] sm:$0xff] %v18401_v4  ;;  %20591 = vst [vmem:[#allocation19_spill] sm:$0xff] %v18403_v10  ;;  %v11229_v27 = vcombine.low %v3046_v0, %v3060_v17  ;;  %v18415_v15 = vpop.f32.mrb[54].mxu0 }
 0x2ed   : > { %v13966_v32 = vcombine.high %v3046_v0, %v3060_v17  ;;  %v2983_v19 = vcombine.high %v2981_v16, %v2981_v16  ;;  %v2997_v49 = vrot.slane %v2981_v16, %v15414_v9  ;;  %20592 = vst [vmem:[#allocation14_spill] sm:$0xff] %v18406_v48  ;;  %20593 = vst [vmem:[#allocation32_spill] sm:$0xff] %v18408_v31  ;;  %v18417_v0 = vpop.f32.mrb[54].mxu1 }
 0x2ee   : > { %v11204_v23 = vrot.slane %v11182_v50, %v15414_v9  ;;  %v11211_v5 = vrot.slane %v13965_v39, %v15414_v9  ;;  %v3004_v21 = vrot.slane %v2982_v51, %v15414_v9  ;;  %14583 = vmatprep.mubr.msk.f32.mxu0 %vm268_vm0, %v10333_v6  ;;  %v5922_v12 = vrot.slane %v5908_v37, %v15414_v9  ;;  %v18428_v39 = vpop.f32.mrb[55].mxu0  ;;  %v18432_v45 = vpop.f32.mrb[55].mxu1 }
 0x2ef   : > { %20594 = vst [vmem:[#allocation42_spill] sm:$0xff] %v18415_v15  ;;  %20595 = vst [vmem:[#allocation4_spill] sm:$0xff] %v18417_v0  ;;  %v3011_v16 = vrot.slane %v2983_v19, %v15414_v9  ;;  %v5923_v50 = vcombine.high %v5915_v43, %v5915_v43  ;;  %v20596_v51 = vcombine.low %v17994_v40, %v17997_v38  ;;  %v18430_v10 = vpop.f32.mrb[56].mxu0  ;;  %v18440_v38 = vpop.f32.mrb[56].mxu1 }
 0x2f0   : > { %20597 = vst [vmem:[#allocation39_spill] sm:$0xff] %v18428_v39  ;;  %v11213_v37 = vcombine.low %v11204_v23, %v11211_v5  ;;  %v11133_v6 = vcombine.low %v2990_v20, %v3004_v21  ;;  %v13963_v15 = vcombine.high %v2990_v20, %v3004_v21  ;;  %v5924_v0 = vcombine.high %v5922_v12, %v5922_v12  ;;  %v18438_v40 = vpop.f32.mrb[57].mxu0 }
 0x2f1   : > { %14584 = vmatmul.mubr.msk.f32.vlgmr.msra.gmra.mrb[70].mxu0 %vm268_vm0, %v20596_v51  ;;  %20598 = vst [vmem:[#allocation11_spill] sm:$0xff] %v18430_v10  ;;  %20599 = vst [vmem:[#allocation41_spill] sm:$0xff] %v18432_v45  ;;  %v11180_v31 = vcombine.low %v2997_v49, %v3011_v16  ;;  %v13964_v17 = vcombine.high %v2997_v49, %v3011_v16  ;;  %v18435_v19 = vrot.slane %v5915_v43, %v15414_v9  ;;  %v18468_v10 = vpop.f32.mrb[57].mxu1  ;;  %v20606_v45 = vld [vmem:[#allocation47_spill] sm:$0xff] }
 0x2f2   : > { %v5938_v48 = vrot.slane %v5922_v12, %v15414_v9  ;;  %20600 = vst [vmem:[#allocation20_spill] sm:$0xff] %v18438_v40  ;;  %20601 = vst [vmem:[#allocation31_spill] sm:$0xff] %v18440_v38  ;;  %v18443_v23 = vrot.slane %v11229_v27, %v15414_v9  ;;  %v18446_v20 = vrot.slane %v13966_v32, %v15414_v9  ;;  %v20602_v38 = vld [vmem:[#allocation44_spill] sm:$0xff] }
 0x2f3   : > { %v18449_v5 = vrot.slane %v11133_v6, %v15414_v9  ;;  %v5945_v49 = vrot.slane %v5923_v50, %v15414_v9  ;;  %v18453_v43 = vrot.slane %v13963_v15, %v15414_v9  ;;  %v11190_v21 = vrot.slane %v11180_v31, %v15414_v9  ;;  %20605 = vst [vmem:[#allocation33_spill] sm:$0xff] %v18468_v10 }
 0x2f4   : > { %v11197_v12 = vrot.slane %v13964_v17, %v15414_v9  ;;  %v18458_v16 = vrot.slane %v5924_v0, %v15414_v9  ;;  %v5953_v27 = vcombine.high %v18435_v19, %v18435_v19  ;;  %v5954_v32 = vcombine.high %v5938_v48, %v5938_v48 }
 0x2f5   : > { %v5955_v51 = vcombine.high %v5945_v49, %v5945_v49  ;;  %v20603_v6 = vrot.slane %v20602_v38, %v15414_v9  ;;  %v20604_v50 = vrot.slane %v17762_v58, %v15414_v9  ;;  %v18471_v31 = vrot.slane %v11213_v37, %v15414_v9  ;;  %v20607_v58 = vld [vmem:[#allocation36_spill] sm:$0xff] }
 0x2f6   : > { %v11212_v17 = vcombine.low %v11190_v21, %v11197_v12  ;;  %v11007_v0 = vrot.slane %v17809_v61, %v15414_v9  ;;  %v11029_v40 = vrot.slane %v20606_v45, %v15414_v9  ;;  %v12564_v4 = vcombine.low %v18458_v16, %v5954_v32 }
 0x2f7   : > { %v11000_v15 = vcombine.low %v20604_v50, %v20603_v6  ;;  %v12563_v39 = vcombine.low %v5955_v51, %v5938_v48  ;;  %v20608_v6 = vld [vmem:[#allocation38_spill] sm:$0xff]  ;;  %v20610_v61 = vcombine.low %v17888_v24, %v17891_v13  ;;  %v20611_v45 = vcombine.low %v17912_v3, %v17923_v22 }
 0x2f8   : > { %v20609_v50 = vcombine.low %v20607_v58, %v20608_v6  ;;  %v18486_v21 = vrot.slane %v11212_v17, %v15414_v9  ;;  %v18496_v32 = vcombine.low %v5945_v49, %v5953_v27  ;;  %v20613_v17 = vcombine.low %v17882_v60, %v17885_v57  ;;  %v18503_v6 = vpop.f32.mrb[58].mxu0  ;;  %v20617_v60 = vld [vmem:[#allocation48_spill] sm:$0xff] }
 0x2f9   : > { %v11014_v38 = vrot.slane %v11000_v15, %v15414_v9  ;;  %v11339_v48 = vrot.slane %v20610_v61, %v15414_v9  ;;  %v11381_v12 = vrot.slane %v20611_v45, %v15414_v9  ;;  %v12585_v51 = vrot.slane %v12563_v39, %v15414_v9  ;;  %20614 = vst [vmem:[#allocation35_spill] sm:$0xff] %v18503_v6  ;;  %v18511_v49 = vpop.f32.mrb[59].mxu0 }
 0x2fa   : > { %v11332_v10 = vrot.slane %v20609_v50, %v15414_v9  ;;  %20612 = vst [vmem:[#allocation37_spill] sm:$0xff] %v18496_v32  ;;  %v11388_v58 = vrot.slane %v20613_v17, %v15414_v9  ;;  %v20615_v50 = vld [vmem:[#allocation2_spill] sm:$0xff]  ;;  %20616 = vst [vmem:[#allocation50_spill] sm:$0xff] %v18511_v49  ;;  %v12592_v39 = vrot.slane %v12564_v4, %v15414_v9 }
 0x2fb   : > { %v11015_v15 = vcombine.low %v11007_v0, %v11014_v38  ;;  %v3114_v3 = vcombine.high %v20615_v50, %v20615_v50  ;;  %v3121_v22 = vrot.slane %v20615_v50, %v15414_v9  ;;  %v5859_v57 = vcombine.high %v20617_v60, %v20617_v60 }
 0x2fc   : > { %v11340_v13 = vcombine.low %v11332_v10, %v11339_v48  ;;  %v11389_v0 = vcombine.low %v11381_v12, %v11388_v58  ;;  %v5866_v48 = vrot.slane %v20617_v60, %v15414_v9 }
 0x2fd   : > { %v14821_v27 = vpack.c.bf16 %v11029_v40, %v11015_v15  ;;  %v3128_v38 = vrot.slane %v3114_v3, %v15414_v9  ;;  %v3129_v61 = vcombine.high %v3121_v22, %v3121_v22  ;;  %v18518_v10 = vrot.slane %v3121_v22, %v15414_v9  ;;  %v20618_v40 = vld [vmem:[#allocation51_spill] sm:$0xff] }
 0x2fe   : > { %v14827_v45 = vpack.c.bf16 %v11389_v0, %v11340_v13  ;;  %v5873_v4 = vrot.slane %v5859_v57, %v15414_v9  ;;  %v3065_v12 = vcombine.high %v20618_v40, %v20618_v40  ;;  %v3072_v15 = vrot.slane %v20618_v40, %v15414_v9 }
 0x2ff   : > { %14823 = vmatprep.subr.msk.bf16.mxu1 %vm15827_vm1, %v14821_v27  ;;  %v3130_v17 = vcombine.high %v3128_v38, %v3128_v38  ;;  %v3144_v58 = vrot.slane %v3128_v38, %v15414_v9  ;;  %v3151_v50 = vrot.slane %v3129_v61, %v15414_v9  ;;  %v3159_v3 = vcombine.high %v18518_v10, %v18518_v10 }
 0x300   : > { %14826 = vmatpush3.bf16.xpose.msk.msra.mxu1 %vm15827_vm1, %v14821_v27  ;;  %14829 = vmatprep.subr.msk.bf16.mxu0 %vm15827_vm1, %v14827_v45  ;;  %v5874_v13 = vcombine.high %v5866_v48, %v5866_v48  ;;  %v5875_v22 = vcombine.high %v5873_v4, %v5873_v4  ;;  %v5882_v0 = vrot.slane %v5866_v48, %v15414_v9 }
 0x301   : > { %v5889_v60 = vrot.slane %v5873_v4, %v15414_v9  ;;  %v3160_v38 = vcombine.high %v3144_v58, %v3144_v58  ;;  %v3161_v61 = vcombine.high %v3151_v50, %v3151_v50  ;;  %v18541_v40 = vcombine.low %v3151_v50, %v3159_v3  ;;  %14832 = vmatpush3.bf16.xpose.msk.msra.mxu0 %vm15827_vm1, %v14827_v45 }
 0x302   : > { %v18545_v27 = vcombine.low %v12585_v51, %v12592_v39  ;;  %v5896_v24 = vrot.slane %v5874_v13, %v15414_v9  ;;  %v5903_v37 = vrot.slane %v5875_v22, %v15414_v9  ;;  %v3079_v48 = vrot.slane %v3065_v12, %v15414_v9  ;;  %v18561_v13 = vpop.f32.mrb[60].mxu0 }
 0x303   : > { %v18551_v4 = vrot.slane %v3130_v17, %v15414_v9  ;;  %v18553_v6 = vcombine.low %v3161_v61, %v3144_v58  ;;  %v5905_v57 = vcombine.high %v5889_v60, %v5889_v60  ;;  %v3080_v49 = vcombine.high %v3072_v15, %v3072_v15  ;;  %20620 = vst [vmem:[#allocation44_spill] sm:$0xff] %v18561_v13  ;;  %v18575_v22 = vpop.f32.mrb[61].mxu0 }
 0x304   : > { %20619 = vst [vmem:[#allocation40_spill] sm:$0xff] %v18545_v27  ;;  %v5907_v50 = vcombine.high %v5903_v37, %v5903_v37  ;;  %v12237_v3 = vcombine.low %v5882_v0, %v5896_v24  ;;  %v14001_v59 = vcombine.high %v5882_v0, %v5896_v24  ;;  %v12239_v32 = vcombine.low %v5889_v60, %v5903_v37 }
 0x305   : > { %v18558_v39 = vcombine.low %v18551_v4, %v3160_v38  ;;  %v3081_v45 = vcombine.high %v3079_v48, %v3079_v48  ;;  %v3088_v12 = vrot.slane %v3072_v15, %v15414_v9  ;;  %20625 = vst [vmem:[#allocation48_spill] sm:$0xff] %v18575_v22  ;;  %v18578_v0 = vrot.slane %v3079_v48, %v15414_v9  ;;  %v20626_v38 = vld [vmem:[#allocation49_spill] sm:$0xff] }
 0x306   : > { %v18564_v17 = vrot.slane %v12237_v3, %v15414_v9  ;;  %v18567_v58 = vrot.slane %v14001_v59, %v15414_v9  ;;  %v18570_v24 = vrot.slane %v12239_v32, %v15414_v9  ;;  %v18573_v37 = vcombine.low %v5907_v50, %v18435_v19 }
 0x307   : > { %v3102_v15 = vrot.slane %v3080_v49, %v15414_v9  ;;  %v3109_v60 = vrot.slane %v3081_v45, %v15414_v9  ;;  %v6006_v61 = vcombine.high %v20626_v38, %v20626_v38  ;;  %v18589_v19 = vrot.slane %v5905_v57, %v15414_v9 }
 0x308   : > { %20621 = vst [vmem:[#allocation47_spill] sm:$0xff] %v18564_v17  ;;  %20622 = vst [vmem:[#allocation36_spill] sm:$0xff] %v18567_v58  ;;  %v6013_v48 = vrot.slane %v20626_v38, %v15414_v9  ;;  %v3111_v49 = vcombine.high %v18578_v0, %v18578_v0 }
 0x309   : > { %20623 = vst [vmem:[#allocation38_spill] sm:$0xff] %v18570_v24  ;;  %20624 = vst [vmem:[#allocation2_spill] sm:$0xff] %v18573_v37  ;;  %v3113_v50 = vcombine.high %v3109_v60, %v3109_v60  ;;  %v11231_v3 = vcombine.low %v3088_v12, %v3102_v15  ;;  %v13967_v45 = vcombine.high %v3088_v12, %v3102_v15 }
 0x30a   : > { %20627 = vst [vmem:[#allocation51_spill] sm:$0xff] %v18589_v19  ;;  %v6020_v59 = vrot.slane %v6006_v61, %v15414_v9  ;;  %v6021_v13 = vcombine.high %v6013_v48, %v6013_v48  ;;  %v6029_v32 = vrot.slane %v6013_v48, %v15414_v9  ;;  %v18605_v38 = vcombine.low %v3109_v60, %v3111_v49  ;;  %v20628_v60 = vld [vmem:[#allocation52_spill] sm:$0xff] }
 0x30b   : > { %v18600_v57 = vrot.slane %v11231_v3, %v15414_v9  ;;  %v18603_v22 = vrot.slane %v13967_v45, %v15414_v9  ;;  %v18608_v27 = vcombine.low %v3113_v50, %v18518_v10  ;;  %v5957_v49 = vcombine.high %v20628_v60, %v20628_v60 }
 0x30c   : > { %v6022_v12 = vcombine.high %v6020_v59, %v6020_v59  ;;  %v6036_v15 = vrot.slane %v6020_v59, %v15414_v9  ;;  %v6043_v51 = vrot.slane %v6021_v13, %v15414_v9  ;;  %v6051_v61 = vcombine.high %v6029_v32, %v6029_v32 }
 0x30d   : > { %v5964_v48 = vrot.slane %v20628_v60, %v15414_v9  ;;  %v5971_v37 = vrot.slane %v5957_v49, %v15414_v9  ;;  %v20630_v45 = vcombine.low %v17953_v42, %v17962_v2  ;;  %v20631_v19 = vcombine.low %v17991_v36, %v18125_v14 }
 0x30e   : > { %v18623_v59 = vrot.slane %v6022_v12, %v15414_v9  ;;  %v6052_v13 = vcombine.high %v6036_v15, %v6036_v15  ;;  %v6053_v50 = vcombine.high %v6043_v51, %v6043_v51  ;;  %v18636_v24 = vcombine.low %v6043_v51, %v6051_v61 }
 0x30f   : > { %v10423_v3 = vrot.slane %v20630_v45, %v15414_v9  ;;  %v10430_v10 = vrot.slane %v20631_v19, %v15414_v9  ;;  %v5956_v60 = vcombine.high %v18458_v16, %v18458_v16  ;;  %v5972_v17 = vcombine.high %v5964_v48, %v5964_v48 }
 0x310   : > { %20629 = vst [vmem:[#allocation49_spill] sm:$0xff] %v18623_v59  ;;  %v12661_v12 = vcombine.low %v6053_v50, %v6036_v15  ;;  %v12662_v58 = vcombine.low %v18623_v59, %v6052_v13  ;;  %v5973_v49 = vcombine.high %v5971_v37, %v5971_v37  ;;  %v5980_v7 = vrot.slane %v5964_v48, %v15414_v9 }
 0x311   : > { %v5987_v42 = vrot.slane %v5971_v37, %v15414_v9  ;;  %v10431_v14 = vcombine.low %v10423_v3, %v10430_v10  ;;  %v3212_v51 = vcombine.high %v17864_v35, %v17864_v35  ;;  %v5994_v19 = vrot.slane %v5972_v17, %v15414_v9 }
 0x312   : > { %v12683_v36 = vrot.slane %v12661_v12, %v15414_v9  ;;  %v6001_v15 = vrot.slane %v5973_v49, %v15414_v9  ;;  %v6002_v16 = vcombine.high %v5980_v7, %v5980_v7  ;;  %v12690_v45 = vrot.slane %v12662_v58, %v15414_v9 }
 0x313   : > { %v6003_v61 = vcombine.high %v5987_v42, %v5987_v42  ;;  %v12610_v48 = vcombine.low %v5956_v60, %v5980_v7  ;;  %14586 = vmatprep.mubr.msk.f32.mxu0 %vm268_vm0, %v10431_v14  ;;  %v3219_v37 = vrot.slane %v17864_v35, %v15414_v9  ;;  %v3226_v13 = vrot.slane %v3212_v51, %v15414_v9  ;;  %v18663_v35 = vpop.f32.mrb[58].mxu1 }
 0x314   : > { %v6004_v3 = vcombine.high %v5994_v19, %v5994_v19  ;;  %v6005_v10 = vcombine.high %v6001_v15, %v6001_v15  ;;  %v12611_v50 = vcombine.low %v5994_v19, %v6002_v16  ;;  %20632 = vst [vmem:[#allocation52_spill] sm:$0xff] %v18663_v35  ;;  %v20642_v35 = vld [vmem:[#allocation24_spill] sm:$0xff] }
 0x315   : > { %v12613_v12 = vcombine.low %v6001_v15, %v6003_v61  ;;  %v12620_v17 = vrot.slane %v12610_v48, %v15414_v9  ;;  %v3227_v2 = vcombine.high %v3219_v37, %v3219_v37  ;;  %v3228_v49 = vcombine.high %v3226_v13, %v3226_v13  ;;  %v18672_v61 = vpop.f32.mrb[59].mxu1 }
 0x316   : > { %v18657_v59 = vrot.slane %v3219_v37, %v15414_v9  ;;  %v12612_v58 = vcombine.low %v6004_v3, %v5987_v42  ;;  %v12627_v7 = vrot.slane %v12611_v50, %v15414_v9  ;;  %v18661_v14 = vcombine.low %v6005_v10, %v6029_v32 }
 0x317   : > { %v12641_v60 = vrot.slane %v12613_v12, %v15414_v9  ;;  %v3242_v51 = vrot.slane %v3226_v13, %v15414_v9  ;;  %v3249_v19 = vrot.slane %v3227_v2, %v15414_v9  ;;  %v18668_v15 = vrot.slane %v3228_v49, %v15414_v9 }
 0x318   : > { %v3257_v16 = vcombine.high %v18657_v59, %v18657_v59  ;;  %v12634_v32 = vrot.slane %v12612_v58, %v15414_v9  ;;  %v18677_v48 = vcombine.low %v12620_v17, %v12627_v7  ;;  %v10445_v37 = vrot.slane %v18137_v25, %v15414_v9 }
 0x319   : > { %v18681_v13 = vcombine.low %v12683_v36, %v12690_v45  ;;  %v3259_v3 = vcombine.high %v3249_v19, %v3249_v19  ;;  %v13990_v50 = vcombine.high %v3242_v51, %v18668_v15  ;;  %v3162_v12 = vcombine.high %v18551_v4, %v18551_v4 }
 0x31a   : > { %v18685_v10 = vcombine.low %v3249_v19, %v3257_v16  ;;  %14587 = vmatmul.mubr.msk.f32.gmra.mrb[72].mxu0 %vm268_vm0, %v10445_v37  ;;  %v3163_v17 = vcombine.high %v17899_v53, %v17899_v53  ;;  %v3170_v25 = vrot.slane %v17899_v53, %v15414_v9  ;;  %v18695_v36 = vcombine.low %v12634_v32, %v12641_v60 }
 0x31b   : > { %v18697_v45 = vcombine.low %v3259_v3, %v3242_v51  ;;  %v11613_v49 = vrot.slane %v18558_v39, %v15414_v9  ;;  %v10732_v58 = vrot.slane %v18130_v56, %v15414_v9  ;;  %v20633_v16 = vrot.slane %v18119_v55, %v15414_v9  ;;  %v20637_v3 = vld [vmem:[#allocation28_spill] sm:$0xff] }
 0x31c   : > { %v3177_v7 = vrot.slane %v3163_v17, %v15414_v9  ;;  %v3178_v19 = vcombine.high %v3170_v25, %v3170_v25  ;;  %v3186_v4 = vrot.slane %v3170_v25, %v15414_v9  ;;  %v20634_v53 = vrot.slane %v18127_v1, %v15414_v9  ;;  %v20638_v17 = vld [vmem:[#allocation29_spill] sm:$0xff] }
 0x31d   : > { %v20635_v39 = vrot.slane %v18077_v44, %v15414_v9  ;;  %v20636_v56 = vcombine.low %v17902_v8, %v17905_v26  ;;  %v20639_v55 = vcombine.low %v20637_v3, %v20638_v17 }
 0x31e   : > { %v10740_v60 = vcombine.low %v20634_v53, %v20633_v16  ;;  %v3179_v2 = vcombine.high %v3177_v7, %v3177_v7  ;;  %v3193_v1 = vrot.slane %v3177_v7, %v15414_v9  ;;  %v3200_v16 = vrot.slane %v3178_v19, %v15414_v9 }
 0x31f   : > { %v10741_v32 = vcombine.low %v10732_v58, %v20635_v39  ;;  %v11430_v37 = vrot.slane %v20636_v56, %v15414_v9  ;;  %v11437_v25 = vrot.slane %v20639_v55, %v15414_v9  ;;  %v3208_v53 = vcombine.high %v3186_v4, %v3186_v4  ;;  %v20640_v55 = vld [vmem:[#allocation5_spill] sm:$0xff] }
 0x320   : > { %v11604_v42 = vcombine.low %v3162_v12, %v3186_v4  ;;  %v10748_v44 = vrot.slane %v10740_v60, %v15414_v9  ;;  %v3207_v8 = vrot.slane %v3179_v2, %v15414_v9  ;;  %v3209_v26 = vcombine.high %v3193_v1, %v3193_v1  ;;  %v20644_v4 = vld [vmem:[#allocation12_spill] sm:$0xff] }
 0x321   : > { %v10755_v58 = vrot.slane %v10741_v32, %v15414_v9  ;;  %v11438_v39 = vcombine.low %v11430_v37, %v11437_v25  ;;  %v3210_v56 = vcombine.high %v3200_v16, %v3200_v16  ;;  %v11605_v51 = vcombine.low %v3200_v16, %v3208_v53 }
 0x322   : > { %v11620_v3 = vrot.slane %v11604_v42, %v15414_v9  ;;  %v20641_v7 = vrot.slane %v20640_v55, %v15414_v9  ;;  %v20643_v12 = vrot.slane %v20642_v35, %v15414_v9  ;;  %v20645_v60 = vrot.slane %v20644_v4, %v15414_v9 }
 0x323   : > { %v10756_v17 = vcombine.low %v10748_v44, %v10755_v58  ;;  %v18741_v2 = vrot.slane %v13990_v50, %v15414_v9  ;;  %v3211_v37 = vcombine.high %v3207_v8, %v3207_v8  ;;  %v11606_v25 = vcombine.low %v3210_v56, %v3193_v1  ;;  %v20646_v58 = vld [vmem:[#allocation9_spill] sm:$0xff] }
 0x324   : > { %v11452_v19 = vrot.slane %v20641_v7, %v15414_v9  ;;  %v11747_v32 = vcombine.low %v20645_v60, %v20643_v12  ;;  %v11627_v42 = vrot.slane %v11605_v51, %v15414_v9  ;;  %v11635_v16 = vcombine.low %v11613_v49, %v11620_v3  ;;  %v20651_v60 = vld [vmem:[#allocation30_spill] sm:$0xff] }
 0x325   : > { %14597 = vmatprep.mubr.msk.f32.mxu1 %vm268_vm0, %v10756_v17  ;;  %v11762_v35 = vrot.slane %v20646_v58, %v15414_v9  ;;  %v11634_v55 = vrot.slane %v11606_v25, %v15414_v9  ;;  %v18749_v7 = vcombine.low %v3207_v8, %v3209_v26  ;;  %v18752_v50 = vcombine.low %v3211_v37, %v18657_v59  ;;  %v20648_v8 = vld [vmem:[#allocation8_spill] sm:$0xff] }
 0x326   : > { %v14833_v53 = vpack.c.bf16 %v11452_v19, %v11438_v39  ;;  %v11755_v44 = vrot.slane %v11747_v32, %v15414_v9  ;;  %14598 = vmatmul.mubr.msk.f32.vlgmr.msra.gmra.mrb[70].mxu1 %vm268_vm0, %v18295_v52  ;;  %v11804_v49 = vrot.slane %v18192_v41, %v15414_v9  ;;  %v11643_v51 = vrot.slane %v11635_v16, %v15414_v9  ;;  %v20647_v39 = vld [vmem:[#allocation21_spill] sm:$0xff]  ;;  %v20652_v16 = vld [vmem:[#allocation27_spill] sm:$0xff] }
 0x327   : > { %v11811_v56 = vrot.slane %v20647_v39, %v15414_v9  ;;  %v3310_v26 = vcombine.high %v20648_v8, %v20648_v8  ;;  %v11636_v59 = vcombine.low %v11627_v42, %v11634_v55  ;;  %v3317_v52 = vrot.slane %v20648_v8, %v15414_v9 }
 0x328   : > { %14835 = vmatprep.subr.msk.bf16.mxu0 %vm15827_vm1, %v14833_v53  ;;  %v11763_v1 = vcombine.low %v11755_v44, %v11762_v35  ;;  %v10830_v41 = vrot.slane %v18261_v29, %v15414_v9  ;;  %v20649_v3 = vrot.slane %v18259_v47, %v15414_v9  ;;  %v20650_v17 = vrot.slane %v18271_v54, %v15414_v9 }
 0x329   : > { %14838 = vmatpush3.bf16.xpose.msk.msra.mxu0 %vm15827_vm1, %v14833_v53  ;;  %v11812_v12 = vcombine.low %v11804_v49, %v11811_v56  ;;  %v3324_v4 = vrot.slane %v3310_v26, %v15414_v9  ;;  %v3261_v32 = vcombine.high %v20651_v60, %v20651_v60  ;;  %v3268_v37 = vrot.slane %v20651_v60, %v15414_v9 }
 0x32a   : > { %v10838_v19 = vcombine.low %v20650_v17, %v20649_v3  ;;  %v11650_v25 = vrot.slane %v11636_v59, %v15414_v9  ;;  %v3325_v42 = vcombine.high %v3317_v52, %v3317_v52  ;;  %v3333_v29 = vrot.slane %v3317_v52, %v15414_v9  ;;  %v20654_v59 = vld [vmem:[#allocation10_spill] sm:$0xff] }
 0x32b   : > { %v20653_v47 = vrot.slane %v20652_v16, %v15414_v9  ;;  %v14839_v54 = vpack.c.bf16 %v11812_v12, %v11763_v1  ;;  %v3326_v44 = vcombine.high %v3324_v4, %v3324_v4  ;;  %v18788_v58 = vrot.slane %v3324_v4, %v15414_v9 }
 0x32c   : > { %v10846_v35 = vrot.slane %v10838_v19, %v15414_v9  ;;  %v18791_v55 = vcombine.low %v11643_v51, %v11650_v25  ;;  %v3347_v49 = vrot.slane %v3325_v42, %v15414_v9  ;;  %v3275_v56 = vrot.slane %v3261_v32, %v15414_v9 }
 0x32d   : > { %v10839_v53 = vcombine.low %v10830_v41, %v20653_v47  ;;  %14841 = vmatprep.subr.msk.bf16.mxu1 %vm15827_vm1, %v14839_v54  ;;  %v18799_v8 = vrot.slane %v3326_v44, %v15414_v9  ;;  %v3276_v1 = vcombine.high %v3268_v37, %v3268_v37  ;;  %v3284_v26 = vrot.slane %v3268_v37, %v15414_v9  ;;  %v18806_v41 = vpop.f32.mrb[60].mxu1 }
 0x32e   : > { %v20655_v51 = vcombine.high %v20654_v59, %v20654_v59  ;;  %14844 = vmatpush3.bf16.xpose.msk.msra.mxu1 %vm15827_vm1, %v14839_v54  ;;  %v12027_v3 = vcombine.low %v3333_v29, %v3347_v49  ;;  %v13993_v17 = vcombine.high %v3333_v29, %v3347_v49  ;;  %v3277_v12 = vcombine.high %v3275_v56, %v3275_v56  ;;  %v18810_v4 = vpop.f32.mrb[61].mxu1 }
 0x32f   : > { %v10853_v39 = vrot.slane %v10839_v53, %v15414_v9  ;;  %v12029_v32 = vcombine.low %v18788_v58, %v18799_v8  ;;  %v3291_v37 = vrot.slane %v3275_v56, %v15414_v9  ;;  %v3298_v25 = vrot.slane %v3276_v1, %v15414_v9  ;;  %v20656_v56 = vld [vmem:[#allocation7_spill] sm:$0xff] }
 0x330   : > { %v10861_v52 = vrot.slane %v20655_v51, %v15414_v9  ;;  %v12050_v16 = vrot.slane %v13993_v17, %v15414_v9  ;;  %v3305_v29 = vrot.slane %v3277_v12, %v15414_v9  ;;  %v12043_v53 = vrot.slane %v12027_v3, %v15414_v9  ;;  %v20657_v17 = vld [vmem:[#allocation34_spill] sm:$0xff]  ;;  %v18838_v12 = vpop.f32.mrb[62].mxu0 }
 0x331   : > { %v10854_v19 = vcombine.low %v10846_v35, %v10853_v39  ;;  %v12057_v54 = vrot.slane %v12029_v32, %v15414_v9  ;;  %v11978_v44 = vcombine.low %v3284_v26, %v3298_v25  ;;  %v13991_v35 = vcombine.high %v3284_v26, %v3298_v25  ;;  %20659 = vst [vmem:[#allocation28_spill] sm:$0xff] %v18838_v12 }
 0x332   : > { %v10868_v47 = vrot.slane %v10861_v52, %v15414_v9  ;;  %v11980_v49 = vcombine.low %v3291_v37, %v3305_v29  ;;  %v13992_v39 = vcombine.high %v3291_v37, %v3305_v29  ;;  %v3408_v1 = vcombine.high %v20656_v56, %v20656_v56 }
 0x333   : > { %14600 = vmatprep.mubr.msk.f32.mxu1 %vm268_vm0, %v10854_v19  ;;  %v3415_v59 = vrot.slane %v20656_v56, %v15414_v9  ;;  %v12059_v51 = vcombine.low %v12050_v16, %v12057_v54  ;;  %v13994_v52 = vcombine.high %v18788_v58, %v18799_v8  ;;  %v18834_v3 = vrot.slane %v11978_v44, %v15414_v9  ;;  %v20658_v19 = vld [vmem:[#allocation46_spill] sm:$0xff]  ;;  %v18845_v16 = vpop.f32.mrb[63].mxu0 }
 0x334   : > { %14601 = vmatmul.mubr.msk.f32.gmra.mrb[72].mxu1 %vm268_vm0, %v10868_v47  ;;  %v11163_v26 = vcombine.low %v20658_v19, %v20657_v17  ;;  %v18841_v32 = vrot.slane %v13991_v35, %v15414_v9  ;;  %v12036_v37 = vrot.slane %v13992_v39, %v15414_v9  ;;  %v3422_v25 = vrot.slane %v3408_v1, %v15414_v9  ;;  %v20662_v8 = vld [vmem:[#allocation26_spill] sm:$0xff] }
 0x335   : > { %v3423_v29 = vcombine.high %v3415_v59, %v3415_v59  ;;  %20660 = vst [vmem:[#allocation29_spill] sm:$0xff] %v18845_v16  ;;  %v18848_v58 = vrot.slane %v11980_v49, %v15414_v9  ;;  %v3431_v47 = vrot.slane %v3415_v59, %v15414_v9  ;;  %v18855_v44 = vrot.slane %v12059_v51, %v15414_v9 }
 0x336   : > { %v11171_v54 = vrot.slane %v11163_v26, %v15414_v9  ;;  %v12058_v35 = vcombine.low %v12036_v37, %v12043_v53  ;;  %v3424_v39 = vcombine.high %v3422_v25, %v3422_v25  ;;  %v3438_v56 = vrot.slane %v3422_v25, %v15414_v9 }
 0x337   : > { %v3445_v1 = vrot.slane %v3423_v29, %v15414_v9  ;;  %v3453_v17 = vcombine.high %v3431_v47, %v3431_v47  ;;  %v20661_v49 = vcombine.low %v18449_v5, %v18453_v43  ;;  %v3359_v59 = vcombine.high %v20662_v8, %v20662_v8 }
 0x338   : > { %v18866_v26 = vrot.slane %v12058_v35, %v15414_v9  ;;  %v18869_v51 = vrot.slane %v3424_v39, %v15414_v9  ;;  %v3454_v53 = vcombine.high %v3438_v56, %v3438_v56  ;;  %v3366_v37 = vrot.slane %v20662_v8, %v15414_v9 }
 0x339   : > { %v11178_v19 = vrot.slane %v20661_v49, %v15414_v9  ;;  %v3455_v25 = vcombine.high %v3445_v1, %v3445_v1  ;;  %v18873_v29 = vcombine.low %v3445_v1, %v3453_v17  ;;  %v3373_v5 = vrot.slane %v3359_v59, %v15414_v9 }
 0x33a   : > { %v18879_v49 = vcombine.low %v18869_v51, %v3454_v53  ;;  %v3374_v35 = vcombine.high %v3366_v37, %v3366_v37  ;;  %v3382_v39 = vrot.slane %v3366_v37, %v15414_v9  ;;  %v18883_v60 = vrot.slane %v13994_v52, %v15414_v9  ;;  %v20664_v52 = vld [vmem:[#allocation3_spill] sm:$0xff]  ;;  %v20666_v37 = vld [vmem:[#allocation25_spill] sm:$0xff] }
 0x33b   : > { %v11179_v42 = vcombine.low %v11171_v54, %v11178_v19  ;;  %v18887_v1 = vcombine.low %v3455_v25, %v3438_v56  ;;  %v3375_v54 = vcombine.high %v3373_v5, %v3373_v5  ;;  %v18891_v17 = vrot.slane %v3373_v5, %v15414_v9 }
 0x33c   : > { %v3396_v19 = vrot.slane %v3374_v35, %v15414_v9  ;;  %v20663_v59 = vcombine.low %v18486_v21, %v18471_v31  ;;  %v20665_v53 = vrot.slane %v20664_v52, %v15414_v9  ;;  %v20667_v56 = vrot.slane %v20666_v37, %v15414_v9  ;;  %v20669_v37 = vld [vmem:[#allocation22_spill] sm:$0xff] }
 0x33d   : > { %14611 = vmatprep.mubr.msk.f32.mxu0 %vm268_vm0, %v11179_v42  ;;  %v20668_v42 = vld [vmem:[#allocation23_spill] sm:$0xff]  ;;  %v3403_v21 = vrot.slane %v3375_v54, %v15414_v9  ;;  %v20672_v31 = vcombine.low %v18341_v33, %v18360_v11  ;;  %v3405_v33 = vcombine.high %v18891_v17, %v18891_v17 }
 0x33e   : > { %14612 = vmatmul.mubr.msk.f32.vlgmr.msra.gmra.mrb[74].mxu0 %vm268_vm0, %v20663_v59  ;;  %v11845_v25 = vcombine.low %v20667_v56, %v20665_v53  ;;  %v11860_v43 = vrot.slane %v20668_v42, %v15414_v9  ;;  %v12076_v59 = vcombine.low %v3382_v39, %v3396_v19  ;;  %v20670_v53 = vrot.slane %v20669_v37, %v15414_v9 }
 0x33f   : > { %v20671_v42 = vcombine.low %v18186_v30, %v18335_v34  ;;  %v3407_v8 = vcombine.high %v3403_v21, %v3403_v21  ;;  %v13995_v35 = vcombine.high %v3382_v39, %v3396_v19  ;;  %v12185_v54 = vrot.slane %v20672_v31, %v15414_v9 }
 0x340   : > { %v11853_v52 = vrot.slane %v11845_v25, %v15414_v9  ;;  %v11875_v56 = vrot.slane %v20670_v53, %v15414_v9  ;;  %v20673_v25 = vcombine.low %v18352_v46, %v18332_v63  ;;  %v12078_v37 = vcombine.low %v18891_v17, %v3403_v21  ;;  %v20708_v17 = vld [vmem:[#allocation15_spill] sm:$0xff] }
 0x341   : > { %v12178_v5 = vrot.slane %v20671_v42, %v15414_v9  ;;  %v18932_v53 = vrot.slane %v12076_v59, %v15414_v9  ;;  %v20674_v30 = vcombine.low %v18338_v62, %v18347_v28  ;;  %v18940_v11 = vcombine.low %v3407_v8, %v3431_v47  ;;  %v20676_v8 = vld [vmem:[#allocation17_spill] sm:$0xff] }
 0x342   : > { %v12227_v12 = vrot.slane %v20673_v25, %v15414_v9  ;;  %v11861_v16 = vcombine.low %v11853_v52, %v11860_v43  ;;  %v11261_v63 = vcombine.low %v18443_v23, %v18446_v20  ;;  %v20675_v43 = vcombine.low %v18600_v57, %v18603_v22 }
 0x343   : > { %v12234_v34 = vrot.slane %v20674_v30, %v15414_v9  ;;  %v12186_v39 = vcombine.low %v12178_v5, %v12185_v54  ;;  %v12107_v46 = vcombine.low %v18883_v60, %v18932_v53  ;;  %v18951_v28 = vrot.slane %v13995_v35, %v15414_v9 }
 0x344   : > { %v14845_v19 = vpack.c.bf16 %v11875_v56, %v11861_v16  ;;  %v11276_v62 = vrot.slane %v20675_v43, %v15414_v9  ;;  %v11269_v47 = vrot.slane %v11261_v63, %v15414_v9  ;;  %v3506_v5 = vcombine.high %v20676_v8, %v20676_v8  ;;  %v20678_v16 = vld [vmem:[#allocation6_spill] sm:$0xff] }
 0x345   : > { %v12235_v31 = vcombine.low %v12227_v12, %v12234_v34  ;;  %v3513_v23 = vrot.slane %v20676_v8, %v15414_v9  ;;  %v18959_v20 = vrot.slane %v12078_v37, %v15414_v9  ;;  %v20677_v22 = vrot.slane %v18578_v0, %v15414_v9 }
 0x346   : > { %14847 = vmatprep.subr.msk.bf16.mxu1 %vm15827_vm1, %v14845_v19  ;;  %v3457_v35 = vcombine.high %v20678_v16, %v20678_v16  ;;  %v11277_v21 = vcombine.low %v11269_v47, %v11276_v62  ;;  %v3520_v59 = vrot.slane %v3506_v5, %v15414_v9  ;;  %v3456_v42 = vcombine.high %v18869_v51, %v18869_v51 }
 0x347   : > { %v14851_v12 = vpack.c.bf16 %v12235_v31, %v12186_v39  ;;  %v11291_v57 = vrot.slane %v20677_v22, %v15414_v9  ;;  %14850 = vmatpush3.bf16.xpose.msk.msra.mxu1 %vm15827_vm1, %v14845_v19  ;;  %v3521_v52 = vcombine.high %v3513_v23, %v3513_v23  ;;  %v3529_v56 = vrot.slane %v3513_v23, %v15414_v9 }
 0x348   : > { %v3464_v0 = vrot.slane %v20678_v16, %v15414_v9  ;;  %v3471_v54 = vrot.slane %v3457_v35, %v15414_v9  ;;  %v11571_v25 = vrot.slane %v18608_v27, %v15414_v9  ;;  %14614 = vmatprep.mubr.msk.f32.mxu0 %vm268_vm0, %v11277_v21  ;;  %v3522_v37 = vcombine.high %v3520_v59, %v3520_v59 }
 0x349   : > { %14853 = vmatprep.subr.msk.bf16.mxu0 %vm15827_vm1, %v14851_v12  ;;  %v3536_v30 = vrot.slane %v3520_v59, %v15414_v9  ;;  %v3543_v34 = vrot.slane %v3521_v52, %v15414_v9  ;;  %v3551_v39 = vcombine.high %v3529_v56, %v3529_v56  ;;  %14615 = vmatmul.mubr.msk.f32.gmra.mrb[76].mxu0 %vm268_vm0, %v11291_v57 }
 0x34a   : > { %14856 = vmatpush3.bf16.xpose.msk.msra.mxu0 %vm15827_vm1, %v14851_v12  ;;  %v3472_v51 = vcombine.high %v3464_v0, %v3464_v0  ;;  %v3473_v63 = vcombine.high %v3471_v54, %v3471_v54  ;;  %v3480_v19 = vrot.slane %v3464_v0, %v15414_v9  ;;  %v18990_v31 = vrot.slane %v3522_v37, %v15414_v9 }
 0x34b   : > { %v3552_v27 = vcombine.high %v3536_v30, %v3536_v30  ;;  %v3553_v43 = vcombine.high %v3543_v34, %v3543_v34  ;;  %v3487_v62 = vrot.slane %v3471_v54, %v15414_v9  ;;  %v18993_v47 = vcombine.low %v3543_v34, %v3551_v39 }
 0x34c   : > { %v3494_v8 = vrot.slane %v3472_v51, %v15414_v9  ;;  %v3501_v5 = vrot.slane %v3473_v63, %v15414_v9  ;;  %v3502_v23 = vcombine.high %v3480_v19, %v3480_v19  ;;  %v12108_v12 = vcombine.low %v18951_v28, %v18959_v20 }
 0x34d   : > { %v18999_v22 = vcombine.low %v3553_v43, %v3536_v30  ;;  %v3503_v57 = vcombine.high %v3487_v62, %v3487_v62  ;;  %v20679_v16 = vrot.slane %v18553_v6, %v15414_v9  ;;  %v20680_v35 = vrot.slane %v18541_v40, %v15414_v9  ;;  %v20683_v43 = vld [vmem:[#allocation47_spill] sm:$0xff] }
 0x34e   : > { %v19008_v59 = vcombine.low %v18990_v31, %v3552_v27  ;;  %v3504_v52 = vcombine.high %v3494_v8, %v3494_v8  ;;  %v3505_v0 = vcombine.high %v3501_v5, %v3501_v5  ;;  %v12449_v54 = vcombine.low %v3456_v42, %v3480_v19  ;;  %v20682_v27 = vld [vmem:[#allocation16_spill] sm:$0xff] }
 0x34f   : > { %v11587_v21 = vcombine.low %v20680_v35, %v20679_v16  ;;  %v12515_v37 = vrot.slane %v18993_v47, %v15414_v9  ;;  %v12522_v28 = vrot.slane %v18999_v22, %v15414_v9  ;;  %v12450_v20 = vcombine.low %v3494_v8, %v3502_v23  ;;  %v20685_v23 = vld [vmem:[#allocation36_spill] sm:$0xff]  ;;  %v20688_v16 = vld [vmem:[#allocation51_spill] sm:$0xff] }
 0x350   : > { %v12452_v30 = vcombine.low %v3501_v5, %v3503_v57  ;;  %v12451_v34 = vcombine.low %v3504_v52, %v3487_v62  ;;  %v12459_v6 = vrot.slane %v12449_v54, %v15414_v9  ;;  %v19015_v39 = vcombine.low %v3505_v0, %v3529_v56  ;;  %v20691_v54 = vld [vmem:[#allocation2_spill] sm:$0xff] }
 0x351   : > { %v20681_v40 = vrot.slane %v18605_v38, %v15414_v9  ;;  %v12466_v63 = vrot.slane %v12450_v20, %v15414_v9  ;;  %v11601_v19 = vrot.slane %v11587_v21, %v15414_v9  ;;  %v20684_v8 = vcombine.low %v20682_v27, %v20683_v43  ;;  %v20686_v38 = vld [vmem:[#allocation38_spill] sm:$0xff]  ;;  %v20689_v21 = vld [vmem:[#allocation37_spill] sm:$0xff]  ;;  %v19045_v27 = vpop.f32.mrb[64].mxu0 }
 0x352   : > { %v12480_v42 = vrot.slane %v12452_v30, %v15414_v9  ;;  %v12473_v62 = vrot.slane %v12451_v34, %v15414_v9  ;;  %v12298_v35 = vrot.slane %v20688_v16, %v15414_v9  ;;  %v20690_v0 = vrot.slane %v20689_v21, %v15414_v9  ;;  %v20693_v34 = vld [vmem:[#allocation40_spill] sm:$0xff] }
 0x353   : > { %v11586_v51 = vcombine.low %v20681_v40, %v11571_v25  ;;  %v12276_v5 = vrot.slane %v20684_v8, %v15414_v9  ;;  %v20687_v25 = vcombine.low %v20685_v23, %v20686_v38  ;;  %v12481_v52 = vcombine.low %v12459_v6, %v12466_v63  ;;  %v19049_v63 = vpop.f32.mrb[65].mxu0 }
 0x354   : > { %v20692_v20 = vrot.slane %v20691_v54, %v15414_v9  ;;  %v12608_v40 = vrot.slane %v20693_v34, %v15414_v9  ;;  %v12482_v43 = vcombine.low %v12473_v62, %v12480_v42  ;;  %v12657_v6 = vrot.slane %v18695_v36, %v15414_v9 }
 0x355   : > { %v11594_v56 = vrot.slane %v11586_v51, %v15414_v9  ;;  %v12283_v57 = vrot.slane %v20687_v25, %v15414_v9  ;;  %v12650_v51 = vrot.slane %v18677_v48, %v15414_v9  ;;  %v12489_v38 = vrot.slane %v12481_v52, %v15414_v9 }
 0x356   : > { %v12593_v30 = vcombine.low %v20692_v20, %v20690_v0  ;;  %v11669_v16 = vrot.slane %v18752_v50, %v15414_v9  ;;  %v20694_v48 = vrot.slane %v18697_v45, %v15414_v9  ;;  %v20695_v42 = vrot.slane %v18685_v10, %v15414_v9 }
 0x357   : > { %v11602_v8 = vcombine.low %v11594_v56, %v11601_v19  ;;  %v12284_v23 = vcombine.low %v12276_v5, %v12283_v57  ;;  %v12496_v5 = vrot.slane %v12482_v43, %v15414_v9  ;;  %v12658_v62 = vcombine.low %v12650_v51, %v12657_v6  ;;  %v20705_v6 = vld [vmem:[#allocation18_spill] sm:$0xff] }
 0x358   : > { %v12601_v25 = vrot.slane %v12593_v30, %v15414_v9  ;;  %v11685_v19 = vcombine.low %v20695_v42, %v20694_v48  ;;  %v11707_v56 = vrot.slane %v18668_v15, %v15414_v9  ;;  %v20696_v45 = vrot.slane %v18749_v7, %v15414_v9  ;;  %v20701_v30 = vld [vmem:[#allocation49_spill] sm:$0xff] }
 0x359   : > { %14625 = vmatprep.mubr.msk.f32.mxu1 %vm268_vm0, %v11602_v8  ;;  %v14857_v36 = vpack.c.bf16 %v12298_v35, %v12284_v23  ;;  %v20697_v52 = vcombine.low %v18741_v2, %v18834_v3  ;;  %v12529_v35 = vrot.slane %v19008_v59, %v15414_v9  ;;  %v19077_v0 = vcombine.low %v12489_v38, %v12496_v5 }
 0x35a   : > { %14626 = vmatmul.mubr.msk.f32.vlgmr.msra.gmra.mrb[74].mxu1 %vm268_vm0, %v18791_v55  ;;  %v12609_v50 = vcombine.low %v12601_v25, %v12608_v40  ;;  %v11684_v57 = vcombine.low %v20696_v45, %v11669_v16  ;;  %v11699_v10 = vrot.slane %v11685_v19, %v15414_v9  ;;  %v20698_v15 = vcombine.low %v18841_v32, %v18848_v58 }
 0x35b   : > { %v12017_v21 = vrot.slane %v20697_v52, %v15414_v9  ;;  %14859 = vmatprep.subr.msk.bf16.mxu0 %vm15827_vm1, %v14857_v36  ;;  %v20699_v55 = vrot.slane %v18636_v24, %v15414_v9  ;;  %v20700_v2 = vrot.slane %v18661_v14, %v15414_v9  ;;  %v12706_v20 = vrot.slane %v18681_v13, %v15414_v9 }
 0x35c   : > { %v12024_v7 = vrot.slane %v20698_v15, %v15414_v9  ;;  %v14863_v54 = vpack.c.bf16 %v12658_v62, %v12609_v50  ;;  %14862 = vmatpush3.bf16.xpose.msk.msra.mxu0 %vm15827_vm1, %v14857_v36  ;;  %v11692_v59 = vrot.slane %v11684_v57, %v15414_v9  ;;  %v20702_v32 = vcombine.high %v20701_v30, %v20701_v30  ;;  %v20712_v57 = vld [vmem:[#allocation32_spill] sm:$0xff]  ;;  %v20718_v30 = vld [vmem:[#allocation41_spill] sm:$0xff] }
 0x35d   : > { %v12691_v3 = vcombine.low %v20700_v2, %v20699_v55  ;;  %v12115_v14 = vrot.slane %v12107_v46, %v15414_v9  ;;  %v12122_v40 = vrot.slane %v12108_v12, %v15414_v9  ;;  %v11714_v13 = vrot.slane %v11707_v56, %v15414_v9  ;;  %v20711_v56 = vld [vmem:[#allocation14_spill] sm:$0xff]  ;;  %v20715_v2 = vld [vmem:[#allocation39_spill] sm:$0xff] }
 0x35e   : > { %v12714_v58 = vrot.slane %v20702_v32, %v15414_v9  ;;  %v12025_v34 = vcombine.low %v12017_v21, %v12024_v7  ;;  %14865 = vmatprep.subr.msk.bf16.mxu1 %vm15827_vm1, %v14863_v54  ;;  %v11700_v51 = vcombine.low %v11692_v59, %v11699_v10  ;;  %v12410_v8 = vrot.slane %v18940_v11, %v15414_v9  ;;  %v20713_v21 = vld [vmem:[#allocation43_spill] sm:$0xff] }
 0x35f   : > { %v12699_v24 = vrot.slane %v12691_v3, %v15414_v9  ;;  %14868 = vmatpush3.bf16.xpose.msk.msra.mxu1 %vm15827_vm1, %v14863_v54  ;;  %v12123_v53 = vcombine.low %v12115_v14, %v12122_v40  ;;  %v20703_v46 = vrot.slane %v18879_v49, %v15414_v9  ;;  %v20704_v12 = vrot.slane %v18887_v1, %v15414_v9  ;;  %v19168_v52 = vpop.f32.mrb[62].mxu1  ;;  %v20716_v54 = vld [vmem:[#allocation42_spill] sm:$0xff]  ;;  %v20721_v14 = vld [vmem:[#allocation4_spill] sm:$0xff] }
 0x360   : > { %v12721_v43 = vrot.slane %v12714_v58, %v15414_v9  ;;  %14639 = vmatprep.mubr.msk.f32.mxu0 %vm268_vm0, %v12025_v34  ;;  %v12827_v38 = vsel %vm12823_vm2, %v20705_v6, -inf  ;;  %14628 = vmatprep.mubr.msk.f32.mxu1 %vm268_vm0, %v11700_v51  ;;  %v20706_v11 = vrot.slane %v18873_v29, %v15414_v9  ;;  %v12508_v16 = vrot.slane %v19015_v39, %v15414_v9  ;;  %v19172_v18 = vpop.f32.mrb[63].mxu1  ;;  %v20719_v58 = vld [vmem:[#allocation11_spill] sm:$0xff]  ;;  %v20720_v34 = vld [vmem:[#allocation33_spill] sm:$0xff] }
 0x361   : > { %v12707_v60 = vcombine.low %v12699_v24, %v12706_v20  ;;  %v12433_v23 = vcombine.low %v20704_v12, %v20703_v46  ;;  %v12531_v49 = vcombine.low %v12522_v28, %v12529_v35  ;;  %14629 = vmatmul.mubr.msk.f32.gmra.mrb[76].mxu1 %vm268_vm0, %v11714_v13  ;;  %v12130_v48 = vrot.slane %v3405_v33, %v15414_v9  ;;  %v20717_v20 = vld [vmem:[#allocation20_spill] sm:$0xff]  ;;  %v20724_v46 = vld [vmem:[#allocation35_spill] sm:$0xff] }
 0x362   : > { %v12432_v25 = vcombine.low %v12410_v8, %v20706_v11  ;;  %12828 = vmax.xlane.f32.xlu0 %v12827_v38  ;;  %v12530_v39 = vcombine.low %v12508_v16, %v12515_v37  ;;  %v20707_v28 = vcombine.low %v18866_v26, %v18855_v44  ;;  %v12834_v33 = vsel %vm12833_vm3, %v20708_v17, -inf  ;;  %v20709_v37 = vld [vmem:[#allocation45_spill] sm:$0xff] }
 0x363   : > { %v14869_v1 = vpack.c.bf16 %v12721_v43, %v12707_v60  ;;  %v12447_v42 = vrot.slane %v12433_v23, %v15414_v9  ;;  %v12545_v22 = vrot.slane %v12531_v49, %v15414_v9  ;;  %v12824_v5 = vsel %vm12823_vm2, %v20709_v37, -inf  ;;  %12835 = vmax.xlane.f32.xlu1 %v12834_v33  ;;  %v20710_v26 = vld [vmem:[#allocation13_spill] sm:$0xff]  ;;  %v20722_v43 = vld [vmem:[#allocation31_spill] sm:$0xff]  ;;  %v20723_v60 = vld [vmem:[#allocation50_spill] sm:$0xff] }
 0x364   : > { %v12440_v29 = vrot.slane %v12432_v25, %v15414_v9  ;;  %14640 = vmatmul.mubr.msk.f32.vlgmr.msra.gmra.mrb[78].mxu0 %vm268_vm0, %v20707_v28  ;;  %v12538_v47 = vrot.slane %v12530_v39, %v15414_v9  ;;  %v12137_v36 = vrot.slane %v12130_v48, %v15414_v9  ;;  %v12837_v62 = vsel %vm12823_vm2, %v20710_v26, -inf  ;;  %v20725_v23 = vld [vmem:[#allocation48_spill] sm:$0xff] }
 0x365   : > { %14871 = vmatprep.subr.msk.bf16.mxu1 %vm15827_vm1, %v14869_v1  ;;  %14642 = vmatprep.mubr.msk.f32.mxu0 %vm268_vm0, %v12123_v53  ;;  %v12830_v50 = vsel %vm12823_vm2, %v20711_v56, -inf  ;;  %v3554_v45 = vcombine.high %v18990_v31, %v18990_v31  ;;  %v12843_v10 = vsel %vm12823_vm2, %v20712_v57, -inf  ;;  %v12840_v35 = vsel %vm12823_vm2, %v20713_v21, -inf  ;;  %v20714_v31 = vld [vmem:[#allocation19_spill] sm:$0xff]  ;;  %v20726_v49 = vld [vmem:[#allocation44_spill] sm:$0xff] }
 0x366   : > { %v12448_v19 = vcombine.low %v12440_v29, %v12447_v42  ;;  %12825 = vmax.xlane.f32.xlu0 %v12824_v5  ;;  %v12546_v44 = vcombine.low %v12538_v47, %v12545_v22  ;;  %v12846_v7 = vsel %vm12833_vm3, %v20714_v31, -inf  ;;  %v12849_v3 = vsel %vm12823_vm2, %v20715_v2, -inf  ;;  %v20727_v42 = vld [vmem:[#allocation52_spill] sm:$0xff]  ;;  %v20728_v22 = vld [vmem:[#allocation29_spill] sm:$0xff] }
 0x367   : > { %14874 = vmatpush3.bf16.xpose.msk.msra.mxu1 %vm15827_vm1, %v14869_v1  ;;  %12831 = vmax.xlane.f32.xlu1 %v12830_v50  ;;  %v12553_v15 = vrot.slane %v3554_v45, %v15414_v9  ;;  %v12852_v59 = vsel %vm12823_vm2, %v20716_v54, -inf  ;;  %v12861_v32 = vsel %vm12823_vm2, %v20718_v30, -inf  ;;  %v12867_v24 = vsel %vm12823_vm2, %v20720_v34, -inf  ;;  %v20729_v33 = vld [vmem:[#allocation28_spill] sm:$0xff] }
 0x368   : > { %14653 = vmatprep.mubr.msk.f32.mxu1 %vm268_vm0, %v12448_v19  ;;  %14643 = vmatmul.mubr.msk.f32.gmra.mrb[80].mxu0 %vm268_vm0, %v12137_v36  ;;  %v12864_v40 = vsel %vm12823_vm2, %v20721_v14, -inf  ;;  %v12870_v8 = vsel %vm12833_vm3, %v20722_v43, -inf  ;;  %v12873_v53 = vsel %vm12823_vm2, %v20723_v60, -inf  ;;  %v12876_v12 = vsel %vm12823_vm2, %v20724_v46, -inf }
 0x369   : > { %v12560_v55 = vrot.slane %v12553_v15, %v15414_v9  ;;  %v12858_v9 = vsel %vm12833_vm3, %v20719_v58, -inf  ;;  %v12879_v38 = vsel %vm12823_vm2, %v20725_v23, -inf  ;;  %v12885_v16 = vsel %vm12823_vm2, %v18672_v61, -inf }
 0x36a   : > { %12838 = vmax.xlane.f32.xlu0 %v12837_v62  ;;  %v12882_v1 = vsel %vm12833_vm3, %v20726_v49, -inf  ;;  %v12891_v48 = vsel %vm12823_vm2, %v18810_v4, -inf  ;;  %v12888_v29 = vsel %vm12823_vm2, %v20727_v42, -inf  ;;  %v12894_v39 = vsel %vm12833_vm3, %v18806_v41, -inf }
 0x36b   : > { %12841 = vmax.xlane.f32.xlu1 %v12840_v35  ;;  %v12897_v28 = vsel %vm12823_vm2, %v20728_v22, -inf  ;;  %v12900_v19 = vsel %vm12823_vm2, %v20729_v33, -inf  ;;  %v12903_v47 = vsel %vm12823_vm2, %v19049_v63, -inf  ;;  %v12909_v5 = vsel %vm12823_vm2, %v19172_v18, -inf }
 0x36c   : > { %v12906_v36 = vsel %vm12833_vm3, %v19045_v27, -inf  ;;  %v12912_v62 = vsel %vm12823_vm2, %v19168_v52, -inf }
 0x36e   : > { %12844 = vmax.xlane.f32.xlu0 %v12843_v10  ;;  %14654 = vmatmul.mubr.msk.f32.vlgmr.msra.gmra.mrb[78].mxu1 %vm268_vm0, %v19077_v0  ;;  %v12855_v0 = vsel %vm12823_vm2, %v20717_v20, -inf }
 0x36f   : > { %14656 = vmatprep.mubr.msk.f32.mxu1 %vm268_vm0, %v12546_v44  ;;  %12847 = vmax.xlane.f32.xlu1 %v12846_v7 }
 0x372   : > { %12850 = vmax.xlane.f32.xlu0 %v12849_v3  ;;  %14657 = vmatmul.mubr.msk.f32.gmra.mrb[80].mxu1 %vm268_vm0, %v12560_v55 }
 0x373   : > { %12853 = vmax.xlane.f32.xlu1 %v12852_v59  ;;  %v19196_v51 = vpop.f32.mrb[64].mxu1 }
 0x374   : > { %v19198_v13 = vpop.f32.mrb[65].mxu1  ;;  %v12918_v50 = vsel %vm12833_vm3, %v19196_v51, -inf }
 0x375   : > { %v12915_v44 = vsel %vm12823_vm2, %v19198_v13, -inf }
 0x376   : > { %12856 = vmax.xlane.f32.xlu0 %v12855_v0 }
 0x377   : > { %12859 = vmax.xlane.f32.xlu1 %v12858_v9 }
 0x37a   : > { %12862 = vmax.xlane.f32.xlu0 %v12861_v32 }
 0x37b   : > { %12865 = vmax.xlane.f32.xlu1 %v12864_v40 }
 0x37c   : > { %v19208_v11 = vpop.f32.mrb[66].mxu0 }
 0x37d   : > { %v19210_v25 = vpop.f32.mrb[67].mxu0  ;;  %v12924_v10 = vsel %vm12823_vm2, %v19208_v11, -inf }
 0x37e   : > { %12868 = vmax.xlane.f32.xlu0 %v12867_v24  ;;  %v12921_v45 = vsel %vm12823_vm2, %v19210_v25, -inf }
 0x37f   : > { %12871 = vmax.xlane.f32.xlu1 %v12870_v8 }
 0x382   : > { %12874 = vmax.xlane.f32.xlu0 %v12873_v53 }
 0x383   : > { %12877 = vmax.xlane.f32.xlu1 %v12876_v12 }
 0x386   : > { %12880 = vmax.xlane.f32.xlu0 %v12879_v38 }
 0x387   : > { %12883 = vmax.xlane.f32.xlu1 %v12882_v1 }
 0x38a   : > { %12886 = vmax.xlane.f32.xlu0 %v12885_v16 }
 0x38b   : > { %12889 = vmax.xlane.f32.xlu1 %v12888_v29 }
 0x38e   : > { %12892 = vmax.xlane.f32.xlu0 %v12891_v48 }
 0x38f   : > { %12895 = vmax.xlane.f32.xlu1 %v12894_v39 }
 0x392   : > { %12898 = vmax.xlane.f32.xlu0 %v12897_v28 }
 0x393   : > { %12901 = vmax.xlane.f32.xlu1 %v12900_v19 }
 0x396   : > { %12904 = vmax.xlane.f32.xlu0 %v12903_v47 }
 0x397   : > { %12907 = vmax.xlane.f32.xlu1 %v12906_v36 }
 0x39a   : > { %12910 = vmax.xlane.f32.xlu0 %v12909_v5 }
 0x39b   : > { %12913 = vmax.xlane.f32.xlu1 %v12912_v62 }
 0x39d   : > { %v19242_v35 = vpop.f32.mrb[68].mxu0 }
 0x39e   : > { %12916 = vmax.xlane.f32.xlu0 %v12915_v44  ;;  %v19244_v15 = vpop.f32.mrb[69].mxu0  ;;  %v12930_v7 = vsel %vm12833_vm3, %v19242_v35, -inf }
 0x39f   : > { %12919 = vmax.xlane.f32.xlu1 %v12918_v50  ;;  %v12927_v55 = vsel %vm12823_vm2, %v19244_v15, -inf }
 0x3a2   : > { %12922 = vmax.xlane.f32.xlu0 %v12921_v45 }
 0x3a3   : > { %12925 = vmax.xlane.f32.xlu1 %v12924_v10 }
 0x3a6   : > { %12928 = vmax.xlane.f32.xlu0 %v12927_v55 }
 0x3a7   : > { %12931 = vmax.xlane.f32.xlu1 %v12930_v7 }
 0x3ad   : > { %v19250_v3 = vpop.f32.mrb[66].mxu1 }
 0x3ae   : > { %v19252_v59 = vpop.f32.mrb[67].mxu1  ;;  %v12936_v0 = vsel %vm12823_vm2, %v19250_v3, -inf }
 0x3af   : > { %v12933_v32 = vsel %vm12823_vm2, %v19252_v59, -inf  ;;  %12937 = vmax.xlane.f32.xlu1 %v12936_v0 }
 0x3b0   : > { %12934 = vmax.xlane.f32.xlu0 %v12933_v32 }
 0x3bd   : > { %v19258_v9 = vpop.f32.mrb[68].mxu1 }
 0x3be   : > { %20730 = vst [vmem:[#allocation5_spill] sm:$0xff] %v19258_v9  ;;  %v19260_v24 = vpop.f32.mrb[69].mxu1  ;;  %v12942_v40 = vsel %vm12833_vm3, %v19258_v9, -inf }
 0x3bf   : > { %20731 = vst [vmem:[#allocation24_spill] sm:$0xff] %v19260_v24  ;;  %v12939_v8 = vsel %vm12823_vm2, %v19260_v24, -inf  ;;  %12943 = vmax.xlane.f32.xlu1 %v12942_v40 }
 0x3c0   : > { %12940 = vmax.xlane.f32.xlu0 %v12939_v8 }
 0x3c4   : > { %v19266_v53 = vpop.f32.mrb[70].mxu0 }
 0x3c5   : > { %20732 = vst [vmem:[#allocation12_spill] sm:$0xff] %v19266_v53  ;;  %v19268_v12 = vpop.f32.mrb[71].mxu0  ;;  %v12948_v38 = vsel %vm12823_vm2, %v19266_v53, -inf }
 0x3c6   : > { %20733 = vst [vmem:[#allocation9_spill] sm:$0xff] %v19268_v12  ;;  %v12945_v16 = vsel %vm12823_vm2, %v19268_v12, -inf  ;;  %12949 = vmax.xlane.f32.xlu1 %v12948_v38 }
 0x3c7   : > { %12946 = vmax.xlane.f32.xlu0 %v12945_v16 }
 0x3ed   : > { %v19274_v1 = vpop.f32.mrb[72].mxu0 }
 0x3ee   : > { %20734 = vst [vmem:[#allocation21_spill] sm:$0xff] %v19274_v1  ;;  %v19276_v48 = vpop.f32.mrb[73].mxu0  ;;  %v12954_v29 = vsel %vm12833_vm3, %v19274_v1, -inf }
 0x3ef   : > { %20735 = vst [vmem:[#allocation8_spill] sm:$0xff] %v19276_v48  ;;  %v12951_v39 = vsel %vm12823_vm2, %v19276_v48, -inf  ;;  %12955 = vmax.xlane.f32.xlu1 %v12954_v29  ;;  %v12829_v44 = vpop.xlane.xlu0 %12828 }
 0x3f0   : > { %12952 = vmax.xlane.f32.xlu0 %v12951_v39  ;;  %v19290_v36 = vpop.xlane.xlu1 %12835  ;;  %v13018_v48 = vsub.f32 %v20705_v6, %v12829_v44 }
 0x3f2   : > { %v13083_v6 = vmul.f32 1.442695, %v13018_v48 }
 0x3f3   : > { %v12826_v55 = vpop.xlane.xlu0 %12825 }
 0x3f4   : > { %v12832_v7 = vpop.xlane.xlu1 %12831  ;;  %v13017_v12 = vsub.f32 %v20709_v37, %v12826_v55  ;;  %v13020_v37 = vsub.f32 %v20708_v17, %v19290_v36  ;;  %14901 = vpow2.f32 %v13083_v6 }
 0x3f6   : > { %v13081_v55 = vmul.f32 1.442695, %v13017_v12  ;;  %v13087_v48 = vmul.f32 1.442695, %v13020_v37 }
 0x3f7   : > { %v19302_v32 = vpop.xlane.xlu0 %12838 }
 0x3f8   : > { %v19300_v0 = vpop.xlane.xlu1 %12841  ;;  %14903 = vpow2.f32 %v13081_v55 }
 0x3f9   : > { %v19282_v28 = vpop.f32.mrb[70].mxu1  ;;  %v13022_v17 = vsub.f32 %v20713_v21, %v19300_v0  ;;  %14905 = vpow2.f32 %v13087_v48 }
 0x3fa   : > { %20736 = vst [vmem:[#allocation30_spill] sm:$0xff] %v19282_v28  ;;  %v19284_v19 = vpop.f32.mrb[71].mxu1  ;;  %v12960_v47 = vsel %vm12823_vm2, %v19282_v28, -inf }
 0x3fb   : > { %20737 = vst [vmem:[#allocation27_spill] sm:$0xff] %v19284_v19  ;;  %v12957_v5 = vsel %vm12823_vm2, %v19284_v19, -inf  ;;  %12961 = vmax.xlane.f32.xlu1 %v12960_v47  ;;  %v19314_v39 = vpop.xlane.xlu0 %12844  ;;  %v13091_v6 = vmul.f32 1.442695, %v13022_v17 }
 0x3fc   : > { %12958 = vmax.xlane.f32.xlu0 %v12957_v5  ;;  %v19312_v29 = vpop.xlane.xlu1 %12847 }
 0x3fd   : > { %v13024_v21 = vsub.f32 %v20714_v31, %v19312_v29 }
 0x3ff   : > { %v19318_v5 = vpop.xlane.xlu0 %12850  ;;  %v13095_v31 = vmul.f32 1.442695, %v13024_v21 }
 0x400   : > { %v19316_v47 = vpop.xlane.xlu1 %12853 }
 0x401   : > { %v13026_v29 = vsub.f32 %v20716_v54, %v19316_v47 }
 0x403   : > { %v13099_v47 = vmul.f32 1.442695, %v13026_v29 }
 0x407   : > { %v19292_v62 = vpop.f32.mrb[72].mxu1 }
 0x408   : > { %20738 = vst [vmem:[#allocation10_spill] sm:$0xff] %v19292_v62  ;;  %v19294_v50 = vpop.f32.mrb[73].mxu1  ;;  %v12966_v45 = vsel %vm12833_vm3, %v19292_v62, -inf }
 0x409   : > { %20739 = vst [vmem:[#allocation7_spill] sm:$0xff] %v19294_v50  ;;  %v12963_v10 = vsel %vm12823_vm2, %v19294_v50, -inf  ;;  %12967 = vmax.xlane.f32.xlu1 %v12966_v45 }
 0x40a   : > { %12964 = vmax.xlane.f32.xlu0 %v12963_v10 }
 0x411   : > { %v19304_v40 = vpop.f32.mrb[74].mxu0 }
 0x412   : > { %20740 = vst [vmem:[#allocation34_spill] sm:$0xff] %v19304_v40  ;;  %v19306_v8 = vpop.f32.mrb[75].mxu0  ;;  %v12972_v38 = vsel %vm12823_vm2, %v19304_v40, -inf }
 0x413   : > { %20741 = vst [vmem:[#allocation46_spill] sm:$0xff] %v19306_v8  ;;  %v12969_v16 = vsel %vm12823_vm2, %v19306_v8, -inf  ;;  %12973 = vmax.xlane.f32.xlu1 %v12972_v38  ;;  %v19328_v38 = vpop.xlane.xlu1 %12859 }
 0x414   : > { %12970 = vmax.xlane.f32.xlu0 %v12969_v16  ;;  %v19330_v16 = vpop.xlane.xlu0 %12856 }
 0x417   : > { %v19332_v50 = vpop.xlane.xlu1 %12865 }
 0x418   : > { %v19334_v62 = vpop.xlane.xlu0 %12862 }
 0x41c   : > { %v19320_v45 = vpop.f32.mrb[76].mxu0 }
 0x41d   : > { %20742 = vst [vmem:[#allocation26_spill] sm:$0xff] %v19320_v45  ;;  %v19322_v10 = vpop.f32.mrb[77].mxu0  ;;  %v12978_v40 = vsel %vm12833_vm3, %v19320_v45, -inf }
 0x41e   : > { %20743 = vst [vmem:[#allocation3_spill] sm:$0xff] %v19322_v10  ;;  %v12975_v8 = vsel %vm12823_vm2, %v19322_v10, -inf  ;;  %12979 = vmax.xlane.f32.xlu1 %v12978_v40  ;;  %v19344_v40 = vpop.xlane.xlu1 %12871 }
 0x41f   : > { %12976 = vmax.xlane.f32.xlu0 %v12975_v8  ;;  %v19346_v8 = vpop.xlane.xlu0 %12868 }
 0x423   : > { %v19366_v44 = vpop.xlane.xlu0 %12874 }
 0x42d   : > { %v19336_v19 = vpop.f32.mrb[74].mxu1 }
 0x42e   : > { %20744 = vst [vmem:[#allocation25_spill] sm:$0xff] %v19336_v19  ;;  %v19338_v28 = vpop.f32.mrb[75].mxu1  ;;  %v12984_v45 = vsel %vm12823_vm2, %v19336_v19, -inf }
 0x42f   : > { %20745 = vst [vmem:[#allocation23_spill] sm:$0xff] %v19338_v28  ;;  %v12981_v10 = vsel %vm12823_vm2, %v19338_v28, -inf  ;;  %12985 = vmax.xlane.f32.xlu1 %v12984_v45 }
 0x430   : > { %12982 = vmax.xlane.f32.xlu0 %v12981_v10  ;;  %v19360_v10 = vpop.xlane.xlu1 %12877 }
 0x434   : > { %v19349_v1 = vpop.f32.mrb[76].mxu1  ;;  %v19381_v36 = vpop.xlane.xlu1 %12883 }
 0x435   : > { %20746 = vst [vmem:[#allocation22_spill] sm:$0xff] %v19349_v1  ;;  %v19352_v53 = vpop.f32.mrb[77].mxu1  ;;  %v12990_v19 = vsel %vm12833_vm3, %v19349_v1, -inf  ;;  %v13019_v1 = vsub.f32 %v20711_v56, %v12832_v7  ;;  %v13021_v56 = vsub.f32 %v20710_v26, %v19302_v32  ;;  %v19385_v7 = vpop.xlane.xlu0 %12880  ;;  %v13023_v26 = vsub.f32 %v20712_v57, %v19314_v39 }
 0x436   : > { %20747 = vst [vmem:[#allocation17_spill] sm:$0xff] %v19352_v53  ;;  %v12987_v28 = vsel %vm12823_vm2, %v19352_v53, -inf  ;;  %12991 = vmax.xlane.f32.xlu1 %v12990_v19  ;;  %v13025_v39 = vsub.f32 %v20715_v2, %v19318_v5  ;;  %v13028_v2 = vsub.f32 %v20719_v58, %v19328_v38  ;;  %v13030_v38 = vsub.f32 %v20721_v14, %v19332_v50 }
 0x437   : > { %v19358_v45 = vpop.f32.mrb[78].mxu0  ;;  %12988 = vmax.xlane.f32.xlu0 %v12987_v28  ;;  %v13085_v12 = vmul.f32 1.442695, %v13019_v1  ;;  %v13089_v1 = vmul.f32 1.442695, %v13021_v56  ;;  %v13032_v50 = vsub.f32 %v20722_v43, %v19344_v40  ;;  %v13034_v40 = vsub.f32 %v20724_v46, %v19360_v10 }
 0x438   : > { %v19362_v24 = vpop.f32.mrb[79].mxu0  ;;  %v12996_v53 = vsel %vm12823_vm2, %v19358_v45, -inf  ;;  %v19399_v55 = vpop.xlane.xlu1 %12889  ;;  %v13093_v57 = vmul.f32 1.442695, %v13023_v26  ;;  %v13097_v21 = vmul.f32 1.442695, %v13025_v39  ;;  %v13036_v10 = vsub.f32 %v20726_v49, %v19381_v36 }
 0x439   : > { %v12993_v19 = vsel %vm12823_vm2, %v19362_v24, -inf  ;;  %14907 = vpow2.f32 %v13085_v12  ;;  %v19405_v17 = vpop.xlane.xlu0 %12886  ;;  %v19409_v12 = vpop.eup %14901  ;;  %v13103_v58 = vmul.f32 1.442695, %v13028_v2  ;;  %v13107_v14 = vmul.f32 1.442695, %v13030_v38 }
 0x43a   : > { %12997 = vmax.xlane.f32.xlu1 %v12996_v53  ;;  %14909 = vpow2.f32 %v13091_v6  ;;  %v13212_v5 = vsel %vm12823_vm2, %v19409_v12, 0.0  ;;  %v13111_v43 = vmul.f32 1.442695, %v13032_v50  ;;  %v13115_v46 = vmul.f32 1.442695, %v13034_v40 }
 0x43b   : > { %v19373_v9 = vpop.f32.mrb[80].mxu0  ;;  %12994 = vmax.xlane.f32.xlu0 %v12993_v19  ;;  %14911 = vpow2.f32 %v13089_v1  ;;  %v13027_v1 = vsub.f32 %v20717_v20, %v19330_v16  ;;  %v13119_v49 = vmul.f32 1.442695, %v13036_v10  ;;  %v13038_v36 = vsub.f32 %v20727_v42, %v19399_v55 }
 0x43c   : > { %v19375_v28 = vpop.f32.mrb[81].mxu0  ;;  %v13002_v53 = vsel %vm12833_vm3, %v19373_v9, -inf  ;;  %14913 = vpow2.f32 %v13095_v31  ;;  %v19427_v26 = vpop.xlane.xlu1 %12895 }
 0x43d   : > { %v12999_v19 = vsel %vm12823_vm2, %v19375_v28, -inf  ;;  %14915 = vpow2.f32 %v13093_v57  ;;  %v19433_v31 = vpop.xlane.xlu0 %12892  ;;  %v13101_v16 = vmul.f32 1.442695, %v13027_v1  ;;  %v13029_v57 = vsub.f32 %v20718_v30, %v19334_v62 }
 0x43e   : > { %13003 = vmax.xlane.f32.xlu1 %v13002_v53  ;;  %v19413_v53 = vpop.eup %14903  ;;  %14917 = vpow2.f32 %v13099_v47  ;;  %v13123_v42 = vmul.f32 1.442695, %v13038_v36  ;;  %v13040_v55 = vsub.f32 %v18806_v41, %v19427_v26 }
 0x43f   : > { %13000 = vmax.xlane.f32.xlu0 %v12999_v19  ;;  %14919 = vpow2.f32 %v13097_v21  ;;  %v13105_v30 = vmul.f32 1.442695, %v13029_v57 }
 0x440   : > { %v19449_v47 = vpop.xlane.xlu1 %12901  ;;  %14921 = vpow2.f32 %v13103_v58  ;;  %v13127_v41 = vmul.f32 1.442695, %v13040_v55 }
 0x441   : > { %v19393_v0 = vpop.f32.mrb[78].mxu1  ;;  %v19453_v2 = vpop.xlane.xlu0 %12898  ;;  %14923 = vpow2.f32 %v13101_v16  ;;  %v13042_v26 = vsub.f32 %v20729_v33, %v19449_v47 }
 0x442   : > { %v19395_v32 = vpop.f32.mrb[79].mxu1  ;;  %v13008_v37 = vsel %vm12823_vm2, %v19393_v0, -inf  ;;  %14925 = vpow2.f32 %v13107_v14  ;;  %v13035_v14 = vsub.f32 %v20725_v23, %v19385_v7 }
 0x443   : > { %v13005_v48 = vsel %vm12823_vm2, %v19395_v32, -inf  ;;  %13009 = vmax.xlane.f32.xlu1 %v13008_v37  ;;  %v19429_v37 = vpop.eup %14905  ;;  %14927 = vpow2.f32 %v13105_v30  ;;  %v13131_v33 = vmul.f32 1.442695, %v13042_v26 }
 0x444   : > { %13006 = vmax.xlane.f32.xlu0 %v13005_v48  ;;  %v13209_v48 = vsel %vm12823_vm2, %v19413_v53, 0.0  ;;  %v19435_v29 = vpop.eup %14907  ;;  %v13218_v20 = vsel %vm12833_vm3, %v19429_v37, 0.0  ;;  %14929 = vpow2.f32 %v13111_v43  ;;  %v13117_v23 = vmul.f32 1.442695, %v13035_v14 }
 0x445   : > { %v19411_v56 = vpop.f32.mrb[80].mxu1  ;;  %v19443_v39 = vpop.eup %14909  ;;  %v13037_v43 = vsub.f32 %v18672_v61, %v19405_v17  ;;  %v13039_v61 = vsub.f32 %v18810_v4, %v19433_v31  ;;  %v13041_v31 = vsub.f32 %v20728_v22, %v19453_v2 }
 0x446   : > { %v19415_v19 = vpop.f32.mrb[81].mxu1  ;;  %v13014_v6 = vsel %vm12833_vm3, %v19411_v56, -inf  ;;  %v13224_v62 = vsel %vm12823_vm2, %v19443_v39, 0.0  ;;  %v19477_v57 = vpop.xlane.xlu0 %12904 }
 0x447   : > { %v13011_v54 = vsel %vm12823_vm2, %v19415_v19, -inf  ;;  %13015 = vmax.xlane.f32.xlu1 %v13014_v6  ;;  %v13215_v6 = vsel %vm12823_vm2, %v19435_v29, 0.0  ;;  %v13125_v14 = vmul.f32 1.442695, %v13039_v61  ;;  %v13043_v2 = vsub.f32 %v19049_v63, %v19477_v57 }
 0x448   : > { %13012 = vmax.xlane.f32.xlu0 %v13011_v54  ;;  %v19447_v54 = vpop.eup %14911 }
 0x449   : > { %v19459_v21 = vpop.eup %14913  ;;  %v13221_v1 = vsel %vm12823_vm2, %v19447_v54, 0.0 }
 0x44a   : > { %v13230_v38 = vsel %vm12833_vm3, %v19459_v21, 0.0 }
 0x44b   : > { %13213 = vadd.xlane.f32.xlu1 %v13212_v5  ;;  %v13031_v5 = vsub.f32 %v20720_v34, %v19346_v8  ;;  %v13033_v34 = vsub.f32 %v20723_v60, %v19366_v44  ;;  %v19471_v8 = vpop.xlane.xlu1 %12907 }
 0x44c   : > { %13210 = vadd.xlane.f32.xlu0 %v13209_v48  ;;  %v19463_v48 = vpop.eup %14915  ;;  %v13044_v47 = vsub.f32 %v19045_v27, %v19471_v8 }
 0x44d   : > { %v13109_v58 = vmul.f32 1.442695, %v13031_v5  ;;  %v13227_v16 = vsel %vm12823_vm2, %v19463_v48, 0.0  ;;  %v13113_v60 = vmul.f32 1.442695, %v13033_v34 }
 0x44e   : > { %v13121_v34 = vmul.f32 1.442695, %v13037_v43  ;;  %v13129_v43 = vmul.f32 1.442695, %v13041_v31  ;;  %v13135_v27 = vmul.f32 1.442695, %v13044_v47 }
 0x44f   : > { %13219 = vadd.xlane.f32.xlu1 %v13218_v20  ;;  %v19473_v20 = vpop.eup %14917  ;;  %14931 = vpow2.f32 %v13109_v58  ;;  %v19493_v5 = vpop.xlane.xlu1 %12913 }
 0x450   : > { %13216 = vadd.xlane.f32.xlu0 %v13215_v6  ;;  %v19479_v6 = vpop.eup %14919  ;;  %v13236_v44 = vsel %vm12823_vm2, %v19473_v20, 0.0  ;;  %14933 = vpow2.f32 %v13115_v46  ;;  %v13046_v8 = vsub.f32 %v19168_v52, %v19493_v5 }
 0x451   : > { %v19487_v50 = vpop.eup %14921  ;;  %v13233_v30 = vsel %vm12823_vm2, %v19479_v6, 0.0  ;;  %14935 = vpow2.f32 %v13113_v60 }
 0x452   : > { %v13242_v7 = vsel %vm12833_vm3, %v19487_v50, 0.0  ;;  %14937 = vpow2.f32 %v13119_v49  ;;  %v13139_v52 = vmul.f32 1.442695, %v13046_v8 }
 0x453   : > { %13225 = vadd.xlane.f32.xlu1 %v13224_v62  ;;  %v19491_v62 = vpop.eup %14923  ;;  %14939 = vpow2.f32 %v13117_v23  ;;  %v12920_v17 = vpop.xlane.xlu1 %12919 }
 0x454   : > { %13222 = vadd.xlane.f32.xlu0 %v13221_v1  ;;  %v19497_v1 = vpop.xlane.xlu0 %12910  ;;  %v19503_v40 = vpop.eup %14925  ;;  %v13239_v58 = vsel %vm12823_vm2, %v19491_v62, 0.0  ;;  %14941 = vpow2.f32 %v13123_v42  ;;  %v13048_v5 = vsub.f32 %v19196_v51, %v12920_v17 }
 0x455   : > { %14943 = vpow2.f32 %v13121_v34  ;;  %v13133_v34 = vmul.f32 1.442695, %v13043_v2  ;;  %v13045_v63 = vsub.f32 %v19172_v18, %v19497_v1 }
 0x456   : > { %14945 = vpow2.f32 %v13127_v41  ;;  %v13143_v47 = vmul.f32 1.442695, %v13048_v5 }
 0x457   : > { %13231 = vadd.xlane.f32.xlu1 %v13230_v38  ;;  %v19507_v38 = vpop.eup %14927  ;;  %v12926_v23 = vpop.xlane.xlu1 %12925  ;;  %14947 = vpow2.f32 %v13125_v14  ;;  %v13137_v14 = vmul.f32 1.442695, %v13045_v63 }
 0x458   : > { %13228 = vadd.xlane.f32.xlu0 %v13227_v16  ;;  %v13248_v16 = vsel %vm12823_vm2, %v19503_v40, 0.0  ;;  %v19515_v46 = vpop.eup %14929  ;;  %v13245_v10 = vsel %vm12823_vm2, %v19507_v38, 0.0  ;;  %v12917_v60 = vpop.xlane.xlu0 %12916  ;;  %14949 = vpow2.f32 %v13131_v33  ;;  %v13050_v51 = vsub.f32 %v19208_v11, %v12926_v23 }
 0x459   : > { %v13254_v4 = vsel %vm12833_vm3, %v19515_v46, 0.0  ;;  %14951 = vpow2.f32 %v13129_v43  ;;  %v13047_v1 = vsub.f32 %v19198_v13, %v12917_v60 }
 0x45a   : > { %14953 = vpow2.f32 %v13135_v27  ;;  %v13147_v27 = vmul.f32 1.442695, %v13050_v51 }
 0x45b   : > { %13237 = vadd.xlane.f32.xlu1 %v13236_v44  ;;  %v19519_v44 = vpop.eup %14931  ;;  %v12932_v57 = vpop.xlane.xlu1 %12931  ;;  %14955 = vpow2.f32 %v13133_v34  ;;  %v13141_v43 = vmul.f32 1.442695, %v13047_v1 }
 0x45c   : > { %13234 = vadd.xlane.f32.xlu0 %v13233_v30  ;;  %v19527_v30 = vpop.eup %14933  ;;  %v13251_v49 = vsel %vm12823_vm2, %v19519_v44, 0.0  ;;  %14957 = vpow2.f32 %v13139_v52  ;;  %v13052_v11 = vsub.f32 %v19242_v35, %v12932_v57 }
 0x45d   : > { %v19531_v36 = vpop.eup %14935  ;;  %v13260_v22 = vsel %vm12823_vm2, %v19527_v30, 0.0  ;;  %14959 = vpow2.f32 %v13137_v14 }
 0x45e   : > { %v13257_v42 = vsel %vm12823_vm2, %v19531_v36, 0.0  ;;  %14961 = vpow2.f32 %v13143_v47  ;;  %v13151_v35 = vmul.f32 1.442695, %v13052_v11  ;;  %v20750_v11 = vld [vmem:[#allocation12_spill] sm:$0xff] }
 0x45f   : > { %13243 = vadd.xlane.f32.xlu1 %v13242_v7  ;;  %v12923_v7 = vpop.xlane.xlu0 %12922  ;;  %v12938_v33 = vpop.xlane.xlu1 %12937  ;;  %14963 = vpow2.f32 %v13141_v43 }
 0x460   : > { %13240 = vadd.xlane.f32.xlu0 %v13239_v58  ;;  %v19539_v58 = vpop.eup %14937  ;;  %v13049_v60 = vsub.f32 %v19210_v25, %v12923_v7  ;;  %14965 = vpow2.f32 %v13147_v27  ;;  %v13054_v57 = vsub.f32 %v19250_v3, %v12938_v33  ;;  %v20748_v3 = vld [vmem:[#allocation5_spill] sm:$0xff] }
 0x461   : > { %v19543_v55 = vpop.eup %14939 }
 0x462   : > { %v19551_v61 = vpop.eup %14941  ;;  %v13145_v23 = vmul.f32 1.442695, %v13049_v60 }
 0x463   : > { %13249 = vadd.xlane.f32.xlu1 %v13248_v16  ;;  %v13266_v16 = vsel %vm12833_vm3, %v19539_v58, 0.0  ;;  %v12929_v41 = vpop.xlane.xlu0 %12928  ;;  %v19555_v26 = vpop.eup %14943  ;;  %v13272_v18 = vsel %vm12823_vm2, %v19551_v61, 0.0 }
 0x464   : > { %13246 = vadd.xlane.f32.xlu0 %v13245_v10  ;;  %v13263_v10 = vsel %vm12823_vm2, %v19543_v55, 0.0  ;;  %v13269_v31 = vsel %vm12823_vm2, %v19555_v26, 0.0  ;;  %v13051_v25 = vsub.f32 %v19244_v15, %v12929_v41  ;;  %v12944_v7 = vpop.xlane.xlu1 %12943  ;;  %14967 = vpow2.f32 %v13145_v23 }
 0x465   : > { %14969 = vpow2.f32 %v13151_v35  ;;  %v13056_v33 = vsub.f32 %v20748_v3, %v12944_v7  ;;  %v20751_v7 = vld [vmem:[#allocation9_spill] sm:$0xff] }
 0x466   : > { %v13149_v52 = vmul.f32 1.442695, %v13051_v25 }
 0x467   : > { %13255 = vadd.xlane.f32.xlu1 %v13254_v4  ;;  %v19561_v4 = vpop.eup %14945  ;;  %v12935_v17 = vpop.xlane.xlu0 %12934  ;;  %v13159_v27 = vmul.f32 1.442695, %v13056_v33  ;;  %v20753_v33 = vld [vmem:[#allocation8_spill] sm:$0xff] }
 0x468   : > { %13252 = vadd.xlane.f32.xlu0 %v13251_v49  ;;  %v19565_v49 = vpop.eup %14947  ;;  %v13278_v13 = vsel %vm12833_vm3, %v19561_v4, 0.0  ;;  %v13053_v41 = vsub.f32 %v19252_v59, %v12935_v17  ;;  %v12950_v1 = vpop.xlane.xlu1 %12949  ;;  %14971 = vpow2.f32 %v13149_v52  ;;  %v20749_v17 = vld [vmem:[#allocation24_spill] sm:$0xff] }
 0x469   : > { %v13275_v2 = vsel %vm12823_vm2, %v19565_v49, 0.0  ;;  %v13058_v23 = vsub.f32 %v20750_v11, %v12950_v1 }
 0x46a   : > { %v13153_v51 = vmul.f32 1.442695, %v13053_v41 }
 0x46b   : > { %13261 = vadd.xlane.f32.xlu1 %v13260_v22  ;;  %v19571_v22 = vpop.eup %14949  ;;  %v12941_v63 = vpop.xlane.xlu0 %12940  ;;  %v13163_v41 = vmul.f32 1.442695, %v13058_v23 }
 0x46c   : > { %13258 = vadd.xlane.f32.xlu0 %v13257_v42  ;;  %v19575_v42 = vpop.eup %14951  ;;  %v13284_v8 = vsel %vm12823_vm2, %v19571_v22, 0.0  ;;  %v13055_v43 = vsub.f32 %v20749_v17, %v12941_v63 }
 0x46d   : > { %v19581_v34 = vpop.eup %14953 }
 0x46e   : > { %v13290_v15 = vsel %vm12833_vm3, %v19581_v34, 0.0 }
 0x46f   : > { %13267 = vadd.xlane.f32.xlu1 %v13266_v16  ;;  %v13281_v16 = vsel %vm12823_vm2, %v19575_v42, 0.0  ;;  %v12947_v47 = vpop.xlane.xlu0 %12946 }
 0x470   : > { %13264 = vadd.xlane.f32.xlu0 %v13263_v10  ;;  %v19585_v10 = vpop.eup %14955 }
 0x471   : > { %v19591_v5 = vpop.eup %14957  ;;  %v13287_v14 = vsel %vm12823_vm2, %v19585_v10, 0.0 }
 0x472   : > { %v13296_v59 = vsel %vm12823_vm2, %v19591_v5, 0.0 }
 0x473   : > { %13273 = vadd.xlane.f32.xlu1 %v13272_v18  ;;  %v19595_v18 = vpop.eup %14959 }
 0x474   : > { %13270 = vadd.xlane.f32.xlu0 %v13269_v31  ;;  %v13155_v31 = vmul.f32 1.442695, %v13054_v57  ;;  %v13293_v60 = vsel %vm12823_vm2, %v19595_v18, 0.0 }
 0x476   : > { %14973 = vpow2.f32 %v13155_v31 }
 0x477   : > { %13279 = vadd.xlane.f32.xlu1 %v13278_v13  ;;  %v19601_v13 = vpop.eup %14961  ;;  %14975 = vpow2.f32 %v13153_v51 }
 0x478   : > { %13276 = vadd.xlane.f32.xlu0 %v13275_v2  ;;  %v19605_v2 = vpop.eup %14963  ;;  %v13302_v25 = vsel %vm12833_vm3, %v19601_v13, 0.0  ;;  %14977 = vpow2.f32 %v13159_v27 }
 0x479   : > { %v19611_v35 = vpop.eup %14965  ;;  %v13299_v57 = vsel %vm12823_vm2, %v19605_v2, 0.0 }
 0x47a   : > { %v13308_v3 = vsel %vm12823_vm2, %v19611_v35, 0.0 }
 0x47b   : > { %13285 = vadd.xlane.f32.xlu1 %v13284_v8  ;;  %v13157_v8 = vmul.f32 1.442695, %v13055_v43 }
 0x47c   : > { %13282 = vadd.xlane.f32.xlu0 %v13281_v16  ;;  %v13057_v16 = vsub.f32 %v20751_v7, %v12947_v47  ;;  %v12956_v63 = vpop.xlane.xlu1 %12955 }
 0x47d   : > { %v12953_v52 = vpop.xlane.xlu0 %12952  ;;  %14979 = vpow2.f32 %v13157_v8 }
 0x47e   : > { %v13161_v31 = vmul.f32 1.442695, %v13057_v16  ;;  %v13059_v47 = vsub.f32 %v20753_v33, %v12953_v52  ;;  %14981 = vpow2.f32 %v13163_v41  ;;  %v20754_v16 = vld [vmem:[#allocation30_spill] sm:$0xff] }
 0x47f   : > { %13291 = vadd.xlane.f32.xlu1 %v13290_v15  ;;  %v19615_v15 = vpop.eup %14967 }
 0x480   : > { %13288 = vadd.xlane.f32.xlu0 %v13287_v14  ;;  %v20752_v14 = vld [vmem:[#allocation21_spill] sm:$0xff]  ;;  %v19621_v51 = vpop.eup %14969  ;;  %14983 = vpow2.f32 %v13161_v31 }
 0x481   : > { %v13060_v1 = vsub.f32 %v20752_v14, %v12956_v63  ;;  %v19625_v17 = vpop.eup %14971  ;;  %v13314_v27 = vsel %vm12833_vm3, %v19621_v51, 0.0 }
 0x482   : > { %v19629_v11 = vpop.eup %14973  ;;  %v13311_v23 = vsel %vm12823_vm2, %v19625_v17, 0.0 }
 0x483   : > { %13297 = vadd.xlane.f32.xlu1 %v13296_v59  ;;  %v13305_v59 = vsel %vm12823_vm2, %v19615_v15, 0.0  ;;  %v13167_v43 = vmul.f32 1.442695, %v13060_v1  ;;  %v13320_v14 = vsel %vm12823_vm2, %v19629_v11, 0.0 }
 0x484   : > { %13294 = vadd.xlane.f32.xlu0 %v13293_v60  ;;  %v13165_v60 = vmul.f32 1.442695, %v13059_v47 }
 0x485   : > { %14985 = vpow2.f32 %v13167_v43 }
 0x486   : > { %14987 = vpow2.f32 %v13165_v60 }
 0x487   : > { %13303 = vadd.xlane.f32.xlu1 %v13302_v25  ;;  %v19633_v25 = vpop.eup %14975 }
 0x488   : > { %13300 = vadd.xlane.f32.xlu0 %v13299_v57  ;;  %v12962_v8 = vpop.xlane.xlu1 %12961  ;;  %v20755_v57 = vld [vmem:[#allocation27_spill] sm:$0xff]  ;;  %v19639_v1 = vpop.eup %14977 }
 0x489   : > { %v12959_v7 = vpop.xlane.xlu0 %12958  ;;  %v13062_v63 = vsub.f32 %v20754_v16, %v12962_v8  ;;  %v19643_v33 = vpop.eup %14979  ;;  %v13326_v47 = vsel %vm12833_vm3, %v19639_v1, 0.0 }
 0x48a   : > { %v13061_v52 = vsub.f32 %v20755_v57, %v12959_v7  ;;  %20756 = vst [vmem:[#allocation6_spill] sm:$0xff] %v19643_v33  ;;  %v13323_v43 = vsel %vm12823_vm2, %v19643_v33, 0.0  ;;  %v20761_v57 = vld [vmem:[#allocation10_spill] sm:$0xff] }
 0x48b   : > { %13309 = vadd.xlane.f32.xlu1 %v13308_v3  ;;  %v13171_v41 = vmul.f32 1.442695, %v13062_v63  ;;  %v13317_v3 = vsel %vm12823_vm2, %v19633_v25, 0.0 }
 0x48c   : > { %13306 = vadd.xlane.f32.xlu0 %v13305_v59  ;;  %v13169_v31 = vmul.f32 1.442695, %v13061_v52  ;;  %v19647_v59 = vpop.eup %14981 }
 0x48d   : > { %14989 = vpow2.f32 %v13171_v41  ;;  %20757 = vst [vmem:[#allocation16_spill] sm:$0xff] %v19647_v59  ;;  %v19651_v60 = vpop.eup %14983  ;;  %v20762_v41 = vld [vmem:[#allocation7_spill] sm:$0xff] }
 0x48e   : > { %14991 = vpow2.f32 %v13169_v31  ;;  %20758 = vst [vmem:[#allocation47_spill] sm:$0xff] %v19651_v60  ;;  %v13329_v7 = vsel %vm12823_vm2, %v19651_v60, 0.0 }
 0x48f   : > { %13315 = vadd.xlane.f32.xlu1 %v13314_v27  ;;  %v13332_v27 = vsel %vm12823_vm2, %v19647_v59, 0.0 }
 0x490   : > { %13312 = vadd.xlane.f32.xlu0 %v13311_v23  ;;  %v19655_v23 = vpop.eup %14985 }
 0x491   : > { %20759 = vst [vmem:[#allocation36_spill] sm:$0xff] %v19655_v23  ;;  %v19659_v16 = vpop.eup %14987 }
 0x492   : > { %20760 = vst [vmem:[#allocation38_spill] sm:$0xff] %v19659_v16  ;;  %v13335_v59 = vsel %vm12823_vm2, %v19659_v16, 0.0 }
 0x493   : > { %13321 = vadd.xlane.f32.xlu1 %v13320_v14 }
 0x494   : > { %13318 = vadd.xlane.f32.xlu0 %v13317_v3  ;;  %v13338_v3 = vsel %vm12833_vm3, %v19655_v23, 0.0 }
 0x496   : > { %v12968_v8 = vpop.xlane.xlu1 %12967 }
 0x497   : > { %13327 = vadd.xlane.f32.xlu1 %v13326_v47  ;;  %v12965_v63 = vpop.xlane.xlu0 %12964  ;;  %v13064_v52 = vsub.f32 %v20761_v57, %v12968_v8  ;;  %v19665_v47 = vpop.eup %14989  ;;  %v20765_v57 = vld [vmem:[#allocation34_spill] sm:$0xff] }
 0x498   : > { %13324 = vadd.xlane.f32.xlu0 %v13323_v43  ;;  %v13063_v14 = vsub.f32 %v20762_v41, %v12965_v63  ;;  %20763 = vst [vmem:[#allocation51_spill] sm:$0xff] %v19665_v47  ;;  %v19669_v60 = vpop.eup %14991  ;;  %v20766_v41 = vld [vmem:[#allocation46_spill] sm:$0xff] }
 0x499   : > { %v13175_v31 = vmul.f32 1.442695, %v13064_v52  ;;  %20764 = vst [vmem:[#allocation37_spill] sm:$0xff] %v19669_v60  ;;  %v13341_v8 = vsel %vm12823_vm2, %v19669_v60, 0.0 }
 0x49a   : > { %v13173_v43 = vmul.f32 1.442695, %v13063_v14 }
 0x49b   : > { %13333 = vadd.xlane.f32.xlu1 %v13332_v27  ;;  %14993 = vpow2.f32 %v13175_v31  ;;  %v13344_v27 = vsel %vm12823_vm2, %v19665_v47, 0.0 }
 0x49c   : > { %13330 = vadd.xlane.f32.xlu0 %v13329_v7  ;;  %14995 = vpow2.f32 %v13173_v43 }
 0x49f   : > { %13339 = vadd.xlane.f32.xlu1 %v13338_v3 }
 0x4a0   : > { %13336 = vadd.xlane.f32.xlu0 %v13335_v59  ;;  %v12974_v7 = vpop.xlane.xlu1 %12973 }
 0x4a1   : > { %v12971_v63 = vpop.xlane.xlu0 %12970  ;;  %v13066_v52 = vsub.f32 %v20765_v57, %v12974_v7  ;;  %v20769_v7 = vld [vmem:[#allocation26_spill] sm:$0xff]  ;;  %v20770_v57 = vld [vmem:[#allocation3_spill] sm:$0xff] }
 0x4a2   : > { %v13065_v14 = vsub.f32 %v20766_v41, %v12971_v63 }
 0x4a3   : > { %13345 = vadd.xlane.f32.xlu1 %v13344_v27  ;;  %v13179_v16 = vmul.f32 1.442695, %v13066_v52 }
 0x4a4   : > { %13342 = vadd.xlane.f32.xlu0 %v13341_v8  ;;  %v13177_v23 = vmul.f32 1.442695, %v13065_v14 }
 0x4a5   : > { %v19677_v31 = vpop.eup %14993  ;;  %14997 = vpow2.f32 %v13179_v16 }
 0x4a6   : > { %20767 = vst [vmem:[#allocation2_spill] sm:$0xff] %v19677_v31  ;;  %v19679_v59 = vpop.eup %14995  ;;  %14999 = vpow2.f32 %v13177_v23  ;;  %v13350_v3 = vsel %vm12833_vm3, %v19677_v31, 0.0 }
 0x4a7   : > { %20768 = vst [vmem:[#allocation40_spill] sm:$0xff] %v19679_v59  ;;  %13351 = vadd.xlane.f32.xlu1 %v13350_v3  ;;  %v13347_v43 = vsel %vm12823_vm2, %v19679_v59, 0.0 }
 0x4a8   : > { %13348 = vadd.xlane.f32.xlu0 %v13347_v43 }
 0x4ab   : > { %v12980_v27 = vpop.xlane.xlu1 %12979 }
 0x4ac   : > { %v12977_v8 = vpop.xlane.xlu0 %12976  ;;  %v13068_v63 = vsub.f32 %v20769_v7, %v12980_v27  ;;  %v20773_v7 = vld [vmem:[#allocation25_spill] sm:$0xff] }
 0x4ad   : > { %v13067_v52 = vsub.f32 %v20770_v57, %v12977_v8 }
 0x4ae   : > { %v13183_v16 = vmul.f32 1.442695, %v13068_v63  ;;  %v20775_v63 = vld [vmem:[#allocation23_spill] sm:$0xff] }
 0x4af   : > { %v19687_v41 = vpop.eup %14997  ;;  %v13181_v23 = vmul.f32 1.442695, %v13067_v52 }
 0x4b0   : > { %20771 = vst [vmem:[#allocation49_spill] sm:$0xff] %v19687_v41  ;;  %v19689_v14 = vpop.eup %14999  ;;  %v13356_v31 = vsel %vm12823_vm2, %v19687_v41, 0.0  ;;  %15001 = vpow2.f32 %v13183_v16  ;;  %v20778_v41 = vld [vmem:[#allocation17_spill] sm:$0xff] }
 0x4b1   : > { %20772 = vst [vmem:[#allocation18_spill] sm:$0xff] %v19689_v14  ;;  %13357 = vadd.xlane.f32.xlu1 %v13356_v31  ;;  %v13353_v3 = vsel %vm12823_vm2, %v19689_v14, 0.0  ;;  %15003 = vpow2.f32 %v13181_v23 }
 0x4b2   : > { %13354 = vadd.xlane.f32.xlu0 %v13353_v3 }
 0x4ba   : > { %v19696_v57 = vpop.eup %15001 }
 0x4bb   : > { %20774 = vst [vmem:[#allocation15_spill] sm:$0xff] %v19696_v57  ;;  %v19699_v60 = vpop.eup %15003  ;;  %v13362_v16 = vsel %vm12833_vm3, %v19696_v57, 0.0 }
 0x4bc   : > { %v12986_v43 = vpop.xlane.xlu1 %12985  ;;  %20776 = vst [vmem:[#allocation45_spill] sm:$0xff] %v19699_v60  ;;  %13363 = vadd.xlane.f32.xlu1 %v13362_v16  ;;  %v13359_v23 = vsel %vm12823_vm2, %v19699_v60, 0.0 }
 0x4bd   : > { %v12983_v27 = vpop.xlane.xlu0 %12982  ;;  %v13070_v8 = vsub.f32 %v20773_v7, %v12986_v43  ;;  %13360 = vadd.xlane.f32.xlu0 %v13359_v23  ;;  %v20777_v7 = vld [vmem:[#allocation22_spill] sm:$0xff] }
 0x4be   : > { %v13069_v59 = vsub.f32 %v20775_v63, %v12983_v27 }
 0x4bf   : > { %v13187_v52 = vmul.f32 1.442695, %v13070_v8 }
 0x4c0   : > { %v13185_v31 = vmul.f32 1.442695, %v13069_v59 }
 0x4c1   : > { %15005 = vpow2.f32 %v13187_v52 }
 0x4c2   : > { %15007 = vpow2.f32 %v13185_v31 }
 0x4c3   : > { %v12992_v3 = vpop.xlane.xlu1 %12991 }
 0x4c4   : > { %v12989_v43 = vpop.xlane.xlu0 %12988  ;;  %v13072_v14 = vsub.f32 %v20777_v7, %v12992_v3 }
 0x4c5   : > { %v13071_v27 = vsub.f32 %v20778_v41, %v12989_v43 }
 0x4c6   : > { %v13191_v63 = vmul.f32 1.442695, %v13072_v14 }
 0x4c7   : > { %v13189_v47 = vmul.f32 1.442695, %v13071_v27  ;;  %v12998_v8 = vpop.xlane.xlu1 %12997 }
 0x4c8   : > { %15009 = vpow2.f32 %v13191_v63  ;;  %v12995_v33 = vpop.xlane.xlu0 %12994  ;;  %v13074_v59 = vsub.f32 %v19358_v45, %v12998_v8 }
 0x4c9   : > { %15011 = vpow2.f32 %v13189_v47  ;;  %v13073_v16 = vsub.f32 %v19362_v24, %v12995_v33 }
 0x4ca   : > { %v13195_v60 = vmul.f32 1.442695, %v13074_v59 }
 0x4cb   : > { %v19709_v52 = vpop.eup %15005  ;;  %v13193_v31 = vmul.f32 1.442695, %v13073_v16  ;;  %v13004_v23 = vpop.xlane.xlu1 %13003 }
 0x4cc   : > { %v19711_v57 = vpop.eup %15007  ;;  %15013 = vpow2.f32 %v13195_v60  ;;  %v13001_v3 = vpop.xlane.xlu0 %13000  ;;  %v13076_v41 = vsub.f32 %v19373_v9, %v13004_v23  ;;  %v13368_v14 = vsel %vm12823_vm2, %v19709_v52, 0.0 }
 0x4cd   : > { %15015 = vpow2.f32 %v13193_v31  ;;  %v13075_v45 = vsub.f32 %v19375_v28, %v13001_v3  ;;  %13369 = vadd.xlane.f32.xlu1 %v13368_v14  ;;  %v13365_v24 = vsel %vm12823_vm2, %v19711_v57, 0.0 }
 0x4ce   : > { %v13199_v33 = vmul.f32 1.442695, %v13076_v41  ;;  %13366 = vadd.xlane.f32.xlu0 %v13365_v24 }
 0x4cf   : > { %v13197_v47 = vmul.f32 1.442695, %v13075_v45 }
 0x4d0   : > { %15017 = vpow2.f32 %v13199_v33  ;;  %v13010_v43 = vpop.xlane.xlu1 %13009 }
 0x4d1   : > { %15019 = vpow2.f32 %v13197_v47  ;;  %v13007_v60 = vpop.xlane.xlu0 %13006  ;;  %v13078_v7 = vsub.f32 %v19393_v0, %v13010_v43 }
 0x4d2   : > { %v19720_v9 = vpop.eup %15009  ;;  %v13077_v27 = vsub.f32 %v19395_v32, %v13007_v60 }
 0x4d3   : > { %v19723_v63 = vpop.eup %15011  ;;  %v13203_v28 = vmul.f32 1.442695, %v13078_v7  ;;  %v13374_v8 = vsel %vm12833_vm3, %v19720_v9, 0.0 }
 0x4d4   : > { %v13201_v59 = vmul.f32 1.442695, %v13077_v27  ;;  %v13016_v16 = vpop.xlane.xlu1 %13015  ;;  %13375 = vadd.xlane.f32.xlu1 %v13374_v8  ;;  %v13371_v31 = vsel %vm12823_vm2, %v19723_v63, 0.0 }
 0x4d5   : > { %15021 = vpow2.f32 %v13203_v28  ;;  %v13013_v23 = vpop.xlane.xlu0 %13012  ;;  %v13080_v0 = vsub.f32 %v19411_v56, %v13016_v16  ;;  %13372 = vadd.xlane.f32.xlu0 %v13371_v31 }
 0x4d6   : > { %v19730_v3 = vpop.eup %15013  ;;  %15023 = vpow2.f32 %v13201_v59  ;;  %v13079_v32 = vsub.f32 %v19415_v19, %v13013_v23 }
 0x4d7   : > { %v19733_v41 = vpop.eup %15015  ;;  %v13207_v14 = vmul.f32 1.442695, %v13080_v0  ;;  %v13380_v45 = vsel %vm12823_vm2, %v19730_v3, 0.0 }
 0x4d8   : > { %v13205_v24 = vmul.f32 1.442695, %v13079_v32  ;;  %13381 = vadd.xlane.f32.xlu1 %v13380_v45  ;;  %v13377_v33 = vsel %vm12823_vm2, %v19733_v41, 0.0  ;;  %v13214_v47 = vpop.xlane.xlu1 %13213 }
 0x4d9   : > { %15025 = vpow2.f32 %v13207_v14  ;;  %13378 = vadd.xlane.f32.xlu0 %v13377_v33  ;;  %v13211_v56 = vpop.xlane.xlu0 %13210 }
 0x4da   : > { %v19739_v43 = vpop.eup %15017  ;;  %15027 = vpow2.f32 %v13205_v24 }
 0x4db   : > { %v19741_v60 = vpop.eup %15019  ;;  %v13386_v19 = vsel %vm12833_vm3, %v19739_v43, 0.0  ;;  %15029 = vrcp.f32 %v13214_v47 }
 0x4dc   : > { %13387 = vadd.xlane.f32.xlu1 %v13386_v19  ;;  %v13383_v7 = vsel %vm12823_vm2, %v19741_v60, 0.0  ;;  %v13220_v27 = vpop.xlane.xlu1 %13219  ;;  %15031 = vrcp.f32 %v13211_v56 }
 0x4dd   : > { %13384 = vadd.xlane.f32.xlu0 %v13383_v7  ;;  %15033 = vrcp.f32 %v13220_v27  ;;  %v13217_v28 = vpop.xlane.xlu0 %13216 }
 0x4de   : > { %15035 = vrcp.f32 %v13217_v28 }
 0x4df   : > { %v19747_v8 = vpop.eup %15021 }
 0x4e0   : > { %v19749_v59 = vpop.eup %15023  ;;  %v13392_v16 = vsel %vm12823_vm2, %v19747_v8, 0.0  ;;  %v13226_v31 = vpop.xlane.xlu1 %13225 }
 0x4e1   : > { %13393 = vadd.xlane.f32.xlu1 %v13392_v16  ;;  %v13389_v23 = vsel %vm12823_vm2, %v19749_v59, 0.0  ;;  %15037 = vrcp.f32 %v13226_v31  ;;  %v13223_v0 = vpop.xlane.xlu0 %13222 }
 0x4e2   : > { %13390 = vadd.xlane.f32.xlu0 %v13389_v23  ;;  %15039 = vrcp.f32 %v13223_v0 }
 0x4e3   : > { %v19756_v32 = vpop.eup %15025 }
 0x4e4   : > { %v19758_v14 = vpop.eup %15027  ;;  %v13398_v45 = vsel %vm12833_vm3, %v19756_v32, 0.0  ;;  %v13232_v24 = vpop.xlane.xlu1 %13231 }
 0x4e5   : > { %v15030_v33 = vpop.eup %15029  ;;  %13399 = vadd.xlane.f32.xlu1 %v13398_v45  ;;  %v13395_v47 = vsel %vm12823_vm2, %v19758_v14, 0.0  ;;  %15041 = vrcp.f32 %v13232_v24  ;;  %v13229_v56 = vpop.xlane.xlu0 %13228 }
 0x4e6   : > { %v15032_v19 = vpop.eup %15031  ;;  %13396 = vadd.xlane.f32.xlu0 %v13395_v47  ;;  %v13404_v7 = vmul.f32 %v15030_v33, %v19409_v12  ;;  %15043 = vrcp.f32 %v13229_v56 }
 0x4e7   : > { %v15034_v27 = vpop.eup %15033  ;;  %v13402_v28 = vmul.f32 %v15032_v19, %v19413_v53 }
 0x4e8   : > { %v15036_v16 = vpop.eup %15035  ;;  %13530 = vst.msk [vmem:[%s19765_s24 + $0x8] sm:$0xff] %vm12823_vm2, %v13404_v7  ;;  %v13408_v31 = vmul.f32 %v15034_v27, %v19429_v37  ;;  %v13238_v23 = vpop.xlane.xlu1 %13237 }
 0x4e9   : > { %13529 = vst.msk [vmem:[%s19765_s24] sm:$0xff] %vm12823_vm2, %v13402_v28  ;;  %v13406_v0 = vmul.f32 %v15036_v16, %v19435_v29  ;;  %15045 = vrcp.f32 %v13238_v23  ;;  %v13235_v45 = vpop.xlane.xlu0 %13234 }
 0x4ea   : > { %13532 = vst.msk [vmem:[%s19765_s24 + $0x18] sm:$0x1] %vm12833_vm3, %v13408_v31  ;;  %15047 = vrcp.f32 %v13235_v45 }
 0x4eb   : > { %v15038_v12 = vpop.eup %15037  ;;  %13531 = vst.msk [vmem:[%s19765_s24 + $0x10] sm:$0xff] %vm12823_vm2, %v13406_v0 }
 0x4ec   : > { %v15040_v53 = vpop.eup %15039  ;;  %v13412_v24 = vmul.f32 %v15038_v12, %v19443_v39  ;;  %v13244_v37 = vpop.xlane.xlu1 %13243 }
 0x4ed   : > { %v13410_v33 = vmul.f32 %v15040_v53, %v19447_v54  ;;  %15049 = vrcp.f32 %v13244_v37  ;;  %v13241_v47 = vpop.xlane.xlu0 %13240 }
 0x4ee   : > { %13534 = vst.msk [vmem:[%s19765_s24 + $0x28] sm:$0xff] %vm12823_vm2, %v13412_v24  ;;  %15051 = vrcp.f32 %v13241_v47 }
 0x4ef   : > { %v15042_v29 = vpop.eup %15041  ;;  %13533 = vst.msk [vmem:[%s19765_s24 + $0x20] sm:$0xff] %vm12823_vm2, %v13410_v33 }
 0x4f0   : > { %v15044_v56 = vpop.eup %15043  ;;  %v13416_v19 = vmul.f32 %v15042_v29, %v19459_v21  ;;  %v13250_v7 = vpop.xlane.xlu1 %13249 }
 0x4f1   : > { %v13414_v27 = vmul.f32 %v15044_v56, %v19463_v48  ;;  %15053 = vrcp.f32 %v13250_v7  ;;  %v13247_v39 = vpop.xlane.xlu0 %13246 }
 0x4f2   : > { %13536 = vst.msk [vmem:[%s19765_s24 + $0x38] sm:$0x1] %vm12833_vm3, %v13416_v19  ;;  %15055 = vrcp.f32 %v13247_v39 }
 0x4f3   : > { %v15046_v54 = vpop.eup %15045  ;;  %13535 = vst.msk [vmem:[%s19765_s24 + $0x30] sm:$0xff] %vm12823_vm2, %v13414_v27 }
 0x4f4   : > { %v15048_v28 = vpop.eup %15047  ;;  %v13420_v16 = vmul.f32 %v15046_v54, %v19473_v20  ;;  %v13256_v31 = vpop.xlane.xlu1 %13255 }
 0x4f5   : > { %v13418_v23 = vmul.f32 %v15048_v28, %v19479_v6  ;;  %15057 = vrcp.f32 %v13256_v31  ;;  %v13253_v21 = vpop.xlane.xlu0 %13252 }
 0x4f6   : > { %13538 = vst.msk [vmem:[%s19765_s24 + $0x48] sm:$0xff] %vm12823_vm2, %v13420_v16  ;;  %15059 = vrcp.f32 %v13253_v21 }
 0x4f7   : > { %v15050_v48 = vpop.eup %15049  ;;  %13537 = vst.msk [vmem:[%s19765_s24 + $0x40] sm:$0xff] %vm12823_vm2, %v13418_v23 }
 0x4f8   : > { %v15052_v0 = vpop.eup %15051  ;;  %v13424_v45 = vmul.f32 %v15050_v48, %v19487_v50  ;;  %v13262_v12 = vpop.xlane.xlu1 %13261 }
 0x4f9   : > { %v13422_v53 = vmul.f32 %v15052_v0, %v19491_v62  ;;  %15061 = vrcp.f32 %v13262_v12  ;;  %v13259_v20 = vpop.xlane.xlu0 %13258 }
 0x4fa   : > { %13540 = vst.msk [vmem:[%s19765_s24 + $0x58] sm:$0x1] %vm12833_vm3, %v13424_v45  ;;  %15063 = vrcp.f32 %v13259_v20 }
 0x4fb   : > { %v15054_v6 = vpop.eup %15053  ;;  %13539 = vst.msk [vmem:[%s19765_s24 + $0x50] sm:$0xff] %vm12823_vm2, %v13422_v53 }
 0x4fc   : > { %v15056_v24 = vpop.eup %15055  ;;  %v13428_v37 = vmul.f32 %v15054_v6, %v19503_v40  ;;  %v13268_v33 = vpop.xlane.xlu1 %13267 }
 0x4fd   : > { %v13426_v47 = vmul.f32 %v15056_v24, %v19507_v38  ;;  %15065 = vrcp.f32 %v13268_v33  ;;  %v13265_v50 = vpop.xlane.xlu0 %13264 }
 0x4fe   : > { %13542 = vst.msk [vmem:[%s19765_s24 + $0x68] sm:$0xff] %vm12823_vm2, %v13428_v37  ;;  %15067 = vrcp.f32 %v13265_v50 }
 0x4ff   : > { %v15058_v62 = vpop.eup %15057  ;;  %13541 = vst.msk [vmem:[%s19765_s24 + $0x60] sm:$0xff] %vm12823_vm2, %v13426_v47 }
 0x500   : > { %v15060_v29 = vpop.eup %15059  ;;  %v13432_v56 = vmul.f32 %v15058_v62, %v19515_v46  ;;  %v13274_v19 = vpop.xlane.xlu1 %13273 }
 0x501   : > { %v13430_v7 = vmul.f32 %v15060_v29, %v19519_v44  ;;  %15069 = vrcp.f32 %v13274_v19  ;;  %v13271_v40 = vpop.xlane.xlu0 %13270 }
 0x502   : > { %13544 = vst.msk [vmem:[%s19765_s24 + $0x78] sm:$0x1] %vm12833_vm3, %v13432_v56  ;;  %15071 = vrcp.f32 %v13271_v40 }
 0x503   : > { %v15062_v38 = vpop.eup %15061  ;;  %13543 = vst.msk [vmem:[%s19765_s24 + $0x70] sm:$0xff] %vm12823_vm2, %v13430_v7 }
 0x504   : > { %v15064_v27 = vpop.eup %15063  ;;  %v13436_v39 = vmul.f32 %v15062_v38, %v19527_v30  ;;  %v13280_v54 = vpop.xlane.xlu1 %13279 }
 0x505   : > { %v13434_v28 = vmul.f32 %v15064_v27, %v19531_v36  ;;  %15073 = vrcp.f32 %v13280_v54  ;;  %v13277_v46 = vpop.xlane.xlu0 %13276 }
 0x506   : > { %13546 = vst.msk [vmem:[%s19765_s24 + $0x88] sm:$0xff] %vm12823_vm2, %v13436_v39  ;;  %15075 = vrcp.f32 %v13277_v46 }
 0x507   : > { %v15066_v44 = vpop.eup %15065  ;;  %13545 = vst.msk [vmem:[%s19765_s24 + $0x80] sm:$0xff] %vm12823_vm2, %v13434_v28 }
 0x508   : > { %v15068_v16 = vpop.eup %15067  ;;  %v13440_v31 = vmul.f32 %v15066_v44, %v19539_v58  ;;  %v13286_v23 = vpop.xlane.xlu1 %13285 }
 0x509   : > { %v13438_v21 = vmul.f32 %v15068_v16, %v19543_v55  ;;  %15077 = vrcp.f32 %v13286_v23  ;;  %v13283_v30 = vpop.xlane.xlu0 %13282 }
 0x50a   : > { %13548 = vst.msk [vmem:[%s19765_s24 + $0x98] sm:$0x1] %vm12833_vm3, %v13440_v31  ;;  %15079 = vrcp.f32 %v13283_v30 }
 0x50b   : > { %v15070_v36 = vpop.eup %15069  ;;  %13547 = vst.msk [vmem:[%s19765_s24 + $0x90] sm:$0xff] %vm12823_vm2, %v13438_v21 }
 0x50c   : > { %v15072_v48 = vpop.eup %15071  ;;  %v13444_v0 = vmul.f32 %v15070_v36, %v19551_v61  ;;  %v13292_v45 = vpop.xlane.xlu1 %13291 }
 0x50d   : > { %v13442_v12 = vmul.f32 %v15072_v48, %v19555_v26  ;;  %15081 = vrcp.f32 %v13292_v45  ;;  %v13289_v58 = vpop.xlane.xlu0 %13288 }
 0x50e   : > { %13550 = vst.msk [vmem:[%s19765_s24 + $0xa8] sm:$0xff] %vm12823_vm2, %v13444_v0  ;;  %15083 = vrcp.f32 %v13289_v58 }
 0x50f   : > { %v15074_v55 = vpop.eup %15073  ;;  %13549 = vst.msk [vmem:[%s19765_s24 + $0xa0] sm:$0xff] %vm12823_vm2, %v13442_v12 }
 0x510   : > { %v15076_v53 = vpop.eup %15075  ;;  %v13448_v20 = vmul.f32 %v15074_v55, %v19561_v4  ;;  %v13298_v6 = vpop.xlane.xlu1 %13297 }
 0x511   : > { %v13446_v24 = vmul.f32 %v15076_v53, %v19565_v49  ;;  %15085 = vrcp.f32 %v13298_v6  ;;  %v13295_v61 = vpop.xlane.xlu0 %13294  ;;  %v20779_v6 = vld [vmem:[#allocation6_spill] sm:$0xff] }
 0x512   : > { %13552 = vst.msk [vmem:[%s19765_s24 + $0xb8] sm:$0x1] %vm12833_vm3, %v13448_v20  ;;  %15087 = vrcp.f32 %v13295_v61 }
 0x513   : > { %v15078_v26 = vpop.eup %15077  ;;  %13551 = vst.msk [vmem:[%s19765_s24 + $0xb0] sm:$0xff] %vm12823_vm2, %v13446_v24 }
 0x514   : > { %v15080_v37 = vpop.eup %15079  ;;  %v13452_v33 = vmul.f32 %v15078_v26, %v19571_v22  ;;  %v13304_v47 = vpop.xlane.xlu1 %13303  ;;  %v20780_v26 = vld [vmem:[#allocation16_spill] sm:$0xff] }
 0x515   : > { %v13450_v50 = vmul.f32 %v15080_v37, %v19575_v42  ;;  %15089 = vrcp.f32 %v13304_v47  ;;  %v13301_v4 = vpop.xlane.xlu0 %13300 }
 0x516   : > { %13554 = vst.msk [vmem:[%s19765_s24 + $0xc8] sm:$0xff] %vm12823_vm2, %v13452_v33  ;;  %15091 = vrcp.f32 %v13301_v4  ;;  %v20781_v33 = vld [vmem:[#allocation47_spill] sm:$0xff] }
 0x517   : > { %v15082_v49 = vpop.eup %15081  ;;  %13553 = vst.msk [vmem:[%s19765_s24 + $0xc0] sm:$0xff] %vm12823_vm2, %v13450_v50 }
 0x518   : > { %v15084_v62 = vpop.eup %15083  ;;  %v13456_v29 = vmul.f32 %v15082_v49, %v19581_v34  ;;  %v13310_v56 = vpop.xlane.xlu1 %13309  ;;  %v20782_v49 = vld [vmem:[#allocation36_spill] sm:$0xff] }
 0x519   : > { %v13454_v19 = vmul.f32 %v15084_v62, %v19585_v10  ;;  %15093 = vrcp.f32 %v13310_v56  ;;  %v13307_v22 = vpop.xlane.xlu0 %13306  ;;  %v20783_v56 = vld [vmem:[#allocation38_spill] sm:$0xff] }
 0x51a   : > { %13556 = vst.msk [vmem:[%s19765_s24 + $0xd8] sm:$0x1] %vm12833_vm3, %v13456_v29  ;;  %15095 = vrcp.f32 %v13307_v22 }
 0x51b   : > { %v15086_v42 = vpop.eup %15085  ;;  %13555 = vst.msk [vmem:[%s19765_s24 + $0xd0] sm:$0xff] %vm12823_vm2, %v13454_v19 }
 0x51c   : > { %v15088_v7 = vpop.eup %15087  ;;  %v13460_v40 = vmul.f32 %v15086_v42, %v19591_v5  ;;  %v13316_v38 = vpop.xlane.xlu1 %13315 }
 0x51d   : > { %v13458_v27 = vmul.f32 %v15088_v7, %v19595_v18  ;;  %15097 = vrcp.f32 %v13316_v38  ;;  %v13313_v34 = vpop.xlane.xlu0 %13312  ;;  %v20784_v7 = vld [vmem:[#allocation51_spill] sm:$0xff]  ;;  %v20785_v38 = vld [vmem:[#allocation37_spill] sm:$0xff] }
 0x51e   : > { %13558 = vst.msk [vmem:[%s19765_s24 + $0xe8] sm:$0xff] %vm12823_vm2, %v13460_v40  ;;  %15099 = vrcp.f32 %v13313_v34 }
 0x51f   : > { %v15090_v10 = vpop.eup %15089  ;;  %13557 = vst.msk [vmem:[%s19765_s24 + $0xe0] sm:$0xff] %vm12823_vm2, %v13458_v27 }
 0x520   : > { %v15092_v39 = vpop.eup %15091  ;;  %v13464_v54 = vmul.f32 %v15090_v10, %v19601_v13  ;;  %v13322_v28 = vpop.xlane.xlu1 %13321 }
 0x521   : > { %v13462_v46 = vmul.f32 %v15092_v39, %v19605_v2  ;;  %15101 = vrcp.f32 %v13322_v28  ;;  %v13319_v5 = vpop.xlane.xlu0 %13318  ;;  %v20786_v28 = vld [vmem:[#allocation2_spill] sm:$0xff] }
 0x522   : > { %13560 = vst.msk [vmem:[%s19765_s24 + $0xf8] sm:$0x1] %vm12833_vm3, %v13464_v54  ;;  %15103 = vrcp.f32 %v13319_v5  ;;  %v20787_v5 = vld [vmem:[#allocation40_spill] sm:$0xff] }
 0x523   : > { %v15094_v18 = vpop.eup %15093  ;;  %13559 = vst.msk [vmem:[%s19765_s24 + $0xf0] sm:$0xff] %vm12823_vm2, %v13462_v46 }
 0x524   : > { %v15096_v44 = vpop.eup %15095  ;;  %v13468_v16 = vmul.f32 %v15094_v18, %v19611_v35  ;;  %v13328_v31 = vpop.xlane.xlu1 %13327 }
 0x525   : > { %v13466_v23 = vmul.f32 %v15096_v44, %v19615_v15  ;;  %15105 = vrcp.f32 %v13328_v31  ;;  %v13325_v13 = vpop.xlane.xlu0 %13324  ;;  %v20788_v31 = vld [vmem:[#allocation49_spill] sm:$0xff] }
 0x526   : > { %13562 = vst.msk [vmem:[%s19765_s24 + $0x108] sm:$0xff] %vm12823_vm2, %v13468_v16  ;;  %15107 = vrcp.f32 %v13325_v13 }
 0x527   : > { %v15098_v2 = vpop.eup %15097  ;;  %13561 = vst.msk [vmem:[%s19765_s24 + $0x100] sm:$0xff] %vm12823_vm2, %v13466_v23 }
 0x528   : > { %v15100_v21 = vpop.eup %15099  ;;  %v13472_v30 = vmul.f32 %v15098_v2, %v19621_v51  ;;  %v13334_v36 = vpop.xlane.xlu1 %13333  ;;  %v20789_v2 = vld [vmem:[#allocation18_spill] sm:$0xff] }
 0x529   : > { %v13470_v48 = vmul.f32 %v15100_v21, %v19625_v17  ;;  %15109 = vrcp.f32 %v13334_v36  ;;  %v13331_v35 = vpop.xlane.xlu0 %13330 }
 0x52a   : > { %13564 = vst.msk [vmem:[%s19765_s24 + $0x118] sm:$0x1] %vm12833_vm3, %v13472_v30  ;;  %15111 = vrcp.f32 %v13331_v35  ;;  %v20790_v35 = vld [vmem:[#allocation15_spill] sm:$0xff] }
 0x52b   : > { %v15102_v15 = vpop.eup %15101  ;;  %13563 = vst.msk [vmem:[%s19765_s24 + $0x110] sm:$0xff] %vm12823_vm2, %v13470_v48 }
 0x52c   : > { %v15104_v0 = vpop.eup %15103  ;;  %v13476_v45 = vmul.f32 %v15102_v15, %v19629_v11  ;;  %v13340_v12 = vpop.xlane.xlu1 %13339 }
 0x52d   : > { %v13474_v58 = vmul.f32 %v15104_v0, %v19633_v25  ;;  %15113 = vrcp.f32 %v13340_v12  ;;  %v13337_v51 = vpop.xlane.xlu0 %13336  ;;  %v20791_v0 = vld [vmem:[#allocation45_spill] sm:$0xff] }
 0x52e   : > { %13566 = vst.msk [vmem:[%s19765_s24 + $0x128] sm:$0xff] %vm12823_vm2, %v13476_v45  ;;  %15115 = vrcp.f32 %v13337_v51 }
 0x52f   : > { %v15106_v17 = vpop.eup %15105  ;;  %13565 = vst.msk [vmem:[%s19765_s24 + $0x120] sm:$0xff] %vm12823_vm2, %v13474_v58 }
 0x530   : > { %v15108_v55 = vpop.eup %15107  ;;  %v13480_v53 = vmul.f32 %v15106_v17, %v19639_v1  ;;  %v13346_v20 = vpop.xlane.xlu1 %13345 }
 0x531   : > { %v13478_v11 = vmul.f32 %v15108_v55, %v20779_v6  ;;  %15117 = vrcp.f32 %v13346_v20  ;;  %v13343_v24 = vpop.xlane.xlu0 %13342 }
 0x532   : > { %13568 = vst.msk [vmem:[%s19765_s24 + $0x138] sm:$0x1] %vm12833_vm3, %v13480_v53  ;;  %15119 = vrcp.f32 %v13343_v24 }
 0x533   : > { %v15110_v25 = vpop.eup %15109  ;;  %13567 = vst.msk [vmem:[%s19765_s24 + $0x130] sm:$0xff] %vm12823_vm2, %v13478_v11 }
 0x534   : > { %v15112_v61 = vpop.eup %15111  ;;  %v13484_v37 = vmul.f32 %v15110_v25, %v20780_v26  ;;  %v13352_v50 = vpop.xlane.xlu1 %13351 }
 0x535   : > { %v13482_v47 = vmul.f32 %v15112_v61, %v20781_v33  ;;  %15121 = vrcp.f32 %v13352_v50  ;;  %v13349_v29 = vpop.xlane.xlu0 %13348 }
 0x536   : > { %13570 = vst.msk [vmem:[%s19765_s24 + $0x148] sm:$0xff] %vm12823_vm2, %v13484_v37  ;;  %15123 = vrcp.f32 %v13349_v29 }
 0x537   : > { %v15114_v1 = vpop.eup %15113  ;;  %13569 = vst.msk [vmem:[%s19765_s24 + $0x140] sm:$0xff] %vm12823_vm2, %v13482_v47 }
 0x538   : > { %v15116_v4 = vpop.eup %15115  ;;  %v13488_v62 = vmul.f32 %v15114_v1, %v20782_v49 }
 0x539   : > { %v13486_v19 = vmul.f32 %v15116_v4, %v20783_v56 }
 0x53a   : > { %13572 = vst.msk [vmem:[%s19765_s24 + $0x158] sm:$0x1] %vm12833_vm3, %v13488_v62 }
 0x53b   : > { %v15118_v22 = vpop.eup %15117  ;;  %13571 = vst.msk [vmem:[%s19765_s24 + $0x150] sm:$0xff] %vm12823_vm2, %v13486_v19 }
 0x53c   : > { %v15120_v42 = vpop.eup %15119  ;;  %v13492_v40 = vmul.f32 %v15118_v22, %v20784_v7 }
 0x53d   : > { %v13490_v27 = vmul.f32 %v15120_v42, %v20785_v38 }
 0x53e   : > { %13574 = vst.msk [vmem:[%s19765_s24 + $0x168] sm:$0xff] %vm12823_vm2, %v13492_v40  ;;  %v13358_v34 = vpop.xlane.xlu1 %13357 }
 0x53f   : > { %13573 = vst.msk [vmem:[%s19765_s24 + $0x160] sm:$0xff] %vm12823_vm2, %v13490_v27  ;;  %v15122_v10 = vpop.eup %15121  ;;  %15125 = vrcp.f32 %v13358_v34  ;;  %v13355_v39 = vpop.xlane.xlu0 %13354 }
 0x540   : > { %v15124_v54 = vpop.eup %15123  ;;  %v13496_v46 = vmul.f32 %v15122_v10, %v20786_v28  ;;  %15127 = vrcp.f32 %v13355_v39 }
 0x541   : > { %v13494_v18 = vmul.f32 %v15124_v54, %v20787_v5 }
 0x542   : > { %13576 = vst.msk [vmem:[%s19765_s24 + $0x178] sm:$0x1] %vm12833_vm3, %v13496_v46 }
 0x543   : > { %13575 = vst.msk [vmem:[%s19765_s24 + $0x170] sm:$0xff] %vm12823_vm2, %v13494_v18 }
 0x549   : > { %v15126_v44 = vpop.eup %15125  ;;  %v13364_v13 = vpop.xlane.xlu1 %13363 }
 0x54a   : > { %v15128_v16 = vpop.eup %15127  ;;  %v13500_v23 = vmul.f32 %v15126_v44, %v20788_v31  ;;  %15129 = vrcp.f32 %v13364_v13  ;;  %v13361_v30 = vpop.xlane.xlu0 %13360 }
 0x54b   : > { %v13498_v21 = vmul.f32 %v15128_v16, %v20789_v2  ;;  %15131 = vrcp.f32 %v13361_v30 }
 0x54c   : > { %13578 = vst.msk [vmem:[%s19765_s24 + $0x188] sm:$0xff] %vm12823_vm2, %v13500_v23 }
 0x54d   : > { %13577 = vst.msk [vmem:[%s19765_s24 + $0x180] sm:$0xff] %vm12823_vm2, %v13498_v21 }
 0x554   : > { %v15130_v36 = vpop.eup %15129 }
 0x555   : > { %v15132_v48 = vpop.eup %15131  ;;  %v13504_v15 = vmul.f32 %v15130_v36, %v20790_v35 }
 0x556   : > { %v13502_v45 = vmul.f32 %v15132_v48, %v20791_v0 }
 0x557   : > { %13580 = vst.msk [vmem:[%s19765_s24 + $0x198] sm:$0x1] %vm12833_vm3, %v13504_v15 }
 0x558   : > { %13579 = vst.msk [vmem:[%s19765_s24 + $0x190] sm:$0xff] %vm12823_vm2, %v13502_v45 }
 0x55a   : > { %v13370_v12 = vpop.xlane.xlu1 %13369 }
 0x55b   : > { %15133 = vrcp.f32 %v13370_v12  ;;  %v13367_v58 = vpop.xlane.xlu0 %13366 }
 0x55c   : > { %15135 = vrcp.f32 %v13367_v58 }
 0x561   : > { %v13376_v51 = vpop.xlane.xlu1 %13375 }
 0x562   : > { %15137 = vrcp.f32 %v13376_v51  ;;  %v13373_v17 = vpop.xlane.xlu0 %13372 }
 0x563   : > { %15139 = vrcp.f32 %v13373_v17 }
 0x565   : > { %v15134_v55 = vpop.eup %15133  ;;  %v13382_v53 = vpop.xlane.xlu1 %13381 }
 0x566   : > { %v15136_v20 = vpop.eup %15135  ;;  %v13508_v6 = vmul.f32 %v15134_v55, %v19709_v52  ;;  %15141 = vrcp.f32 %v13382_v53  ;;  %v13379_v11 = vpop.xlane.xlu0 %13378 }
 0x567   : > { %v13506_v24 = vmul.f32 %v15136_v20, %v19711_v57  ;;  %15143 = vrcp.f32 %v13379_v11 }
 0x568   : > { %13582 = vst.msk [vmem:[%s19765_s24 + $0x1a8] sm:$0xff] %vm12823_vm2, %v13508_v6 }
 0x569   : > { %13581 = vst.msk [vmem:[%s19765_s24 + $0x1a0] sm:$0xff] %vm12823_vm2, %v13506_v24  ;;  %v13388_v25 = vpop.xlane.xlu1 %13387 }
 0x56a   : > { %15145 = vrcp.f32 %v13388_v25  ;;  %v13385_v61 = vpop.xlane.xlu0 %13384 }
 0x56b   : > { %15147 = vrcp.f32 %v13385_v61 }
 0x56c   : > { %v15138_v26 = vpop.eup %15137 }
 0x56d   : > { %v15140_v37 = vpop.eup %15139  ;;  %v13512_v52 = vmul.f32 %v15138_v26, %v19720_v9 }
 0x56e   : > { %v13510_v33 = vmul.f32 %v15140_v37, %v19723_v63  ;;  %v13394_v47 = vpop.xlane.xlu1 %13393 }
 0x56f   : > { %13584 = vst.msk [vmem:[%s19765_s24 + $0x1b8] sm:$0x1] %vm12833_vm3, %v13512_v52  ;;  %15149 = vrcp.f32 %v13394_v47  ;;  %v13391_v57 = vpop.xlane.xlu0 %13390 }
 0x570   : > { %v15142_v1 = vpop.eup %15141  ;;  %13583 = vst.msk [vmem:[%s19765_s24 + $0x1b0] sm:$0xff] %vm12823_vm2, %v13510_v33  ;;  %15151 = vrcp.f32 %v13391_v57 }
 0x571   : > { %v15144_v50 = vpop.eup %15143  ;;  %v13516_v4 = vmul.f32 %v15142_v1, %v19730_v3 }
 0x572   : > { %v13514_v49 = vmul.f32 %v15144_v50, %v19733_v41  ;;  %v13400_v9 = vpop.xlane.xlu1 %13399 }
 0x573   : > { %13586 = vst.msk [vmem:[%s19765_s24 + $0x1c8] sm:$0xff] %vm12823_vm2, %v13516_v4  ;;  %15153 = vrcp.f32 %v13400_v9  ;;  %v13397_v63 = vpop.xlane.xlu0 %13396 }
 0x574   : > { %v15146_v62 = vpop.eup %15145  ;;  %13585 = vst.msk [vmem:[%s19765_s24 + $0x1c0] sm:$0xff] %vm12823_vm2, %v13514_v49  ;;  %15155 = vrcp.f32 %v13397_v63 }
 0x575   : > { %v15148_v29 = vpop.eup %15147  ;;  %v13520_v56 = vmul.f32 %v15146_v62, %v19739_v43 }
 0x576   : > { %v13518_v3 = vmul.f32 %v15148_v29, %v19741_v60 }
 0x577   : > { %13588 = vst.msk [vmem:[%s19765_s24 + $0x1d8] sm:$0x1] %vm12833_vm3, %v13520_v56 }
 0x578   : > { %13587 = vst.msk [vmem:[%s19765_s24 + $0x1d0] sm:$0xff] %vm12823_vm2, %v13518_v3 }
 0x579   : > { %v15150_v41 = vpop.eup %15149 }
 0x57a   : > { %v15152_v19 = vpop.eup %15151  ;;  %v13524_v22 = vmul.f32 %v15150_v41, %v19747_v8 }
 0x57b   : > { %v13522_v42 = vmul.f32 %v15152_v19, %v19749_v59 }
 0x57c   : > { %13590 = vst.msk [vmem:[%s19765_s24 + $0x1e8] sm:$0xff] %vm12823_vm2, %v13524_v22 }
 0x57d   : > { %v15154_v7 = vpop.eup %15153  ;;  %13589 = vst.msk [vmem:[%s19765_s24 + $0x1e0] sm:$0xff] %vm12823_vm2, %v13522_v42 }
 0x57e   : > { %v15156_v40 = vpop.eup %15155  ;;  %v13528_v43 = vmul.f32 %v15154_v7, %v19756_v32 }
 0x57f   : > { %v13526_v60 = vmul.f32 %v15156_v40, %v19758_v14 }
 0x580   : > { %13592 = vst.msk [vmem:[%s19765_s24 + $0x1f8] sm:$0x1] %vm12833_vm3, %v13528_v43 }
 0x581   : > { %13591 = vst.msk [vmem:[%s19765_s24 + $0x1f0] sm:$0xff] %vm12823_vm2, %v13526_v60 }
 0x582 PF: > { %s13_s14 = sadd.s32 1, %s15179_s14   ;;  %s20792_s12 = smov %s15175_s13 }
 0x583   : > { %p10_p5 = scmp.ge.s32.totalorder %s13_s14, 4   ;;  %s20793_s13 = smov %s20795_s15 }
 0x585   :  { %12 = sbr.rel (!%p10_p5) target bundleno = 2 (0x2), region = 62 }

</bundles_post_ra>
